<compile_context>
chip_gen: v5e
topology: v5e:2x2
jax: 0.10.0
libtpu: 0.0.40
codegen_flags: <defaults>
</compile_context>

<pallas_src>
import functools

import jax
import jax.numpy as jnp
from jax import lax
from jax.experimental import pallas as pl
from jax.experimental.pallas import tpu as pltpu


def _round_up(x, m):
    return (x + m - 1) // m * m


def _cdiv(a, b):
    return -(-a // b)


def _pad2(a, rows, cols):
    pr, pc = rows - a.shape[0], cols - a.shape[1]
    if pr == 0 and pc == 0:
        return a
    return jnp.pad(a, ((0, pr), (0, pc)))


# ----------------------------------------------------------------------------
# Pallas GEMM kernels: bf16 MXU inputs, f32 accumulation, fused BN-shift /
# residual-add / ReLU epilogue.  Two variants:
#   * full-K : grid (i, j), single K block resident in VMEM, no scratch.
#   * K-loop : grid (i, j, k) with an f32 VMEM accumulator ("arbitrary" k).
# ----------------------------------------------------------------------------
def _epilogue(y, b_ref, r_ref, relu, out_dtype):
    y = y + b_ref[...]
    if r_ref is not None:
        y = y + r_ref[...].astype(jnp.float32)
    if relu:
        y = jnp.maximum(y, 0.0)
    return y.astype(out_dtype)


def _gemm_fullk_kernel(x_ref, w_ref, b_ref, *rest, relu):
    r_ref, o_ref = rest if len(rest) == 2 else (None, rest[0])
    y = jnp.dot(x_ref[...], w_ref[...], preferred_element_type=jnp.float32)
    o_ref[...] = _epilogue(y, b_ref, r_ref, relu, o_ref.dtype)


def _gemm_kloop_kernel(x_ref, w_ref, b_ref, *rest, relu):
    r_ref, o_ref, acc_ref = rest if len(rest) == 3 else (None,) + rest
    k = pl.program_id(2)

    @pl.when(k == 0)
    def _():
        acc_ref[...] = jnp.zeros_like(acc_ref)

    acc_ref[...] += jnp.dot(x_ref[...], w_ref[...],
                            preferred_element_type=jnp.float32)

    @pl.when(k == pl.num_programs(2) - 1)
    def _():
        o_ref[...] = _epilogue(acc_ref[...], b_ref, r_ref, relu, o_ref.dtype)


# ----------------------------------------------------------------------------
# Tile selection: no N padding, no M padding when a divisor exists, full-K
# collapse when it fits VMEM, v7x megacore occupancy, bf16-friendly tm.
# ----------------------------------------------------------------------------
_STREAM_BUDGET = 12 * 1024 * 1024   # bytes for double-buffered x + w blocks
_VMEM_LIMIT = 32 * 1024 * 1024      # explicit scoped-VMEM limit (v5e..v7x safe)


def _pick_tn(N):
    if N % 256 == 0:
        return 256
    if N % 128 == 0:
        return 128
    return N            # full-dim block: legal, never padded/sliced


def _pick_tm(M, n_j_tiles):
    if M < 16:
        return _round_up(max(M, 8), 8)          # tiny deep-layer GEMMs
    tm = None
    for c in (512, 256, 128, 64, 32, 16):        # divisor of M -> no M pad/slice
        if M % c == 0:
            tm = c
            break
    if tm is None:
        tm = min(256, _round_up(M, 16))          # bf16 packs 2 rows / sublane
    # v7x megacore: keep >= 2 (i, j) tiles so both TensorCores get work.
    if n_j_tiles * _cdiv(M, tm) < 2 and tm >= 64 and M % (tm // 2) == 0:
        tm //= 2
    return tm


def _pick_tk(K, tm, tn):
    # Collapse the K grid axis when double-buffered bf16 x+w blocks fit.
    if 2 * 2 * K * (tm + tn) <= _STREAM_BUDGET:
        return K
    # Otherwise a 128-multiple <= 512 (v7x-friendly) minimizing K padding.
    best_c, best_pad = 128, (-K) % 128
    for c in (512, 384, 256):
        pad = (-K) % c
        if pad < best_pad or (pad == best_pad and c > best_c):
            best_c, best_pad = c, pad
    return best_c


def matmul_fused(x, w, shift, *, residual=None, relu=False,
                 out_dtype=jnp.bfloat16):
    """y = maybe_relu(x @ w + shift [+ residual]).

    x:(M,K), w:(K,N) bf16 (BN scale pre-folded), shift:(N,) f32,
    residual:(M,N) or None.  f32 accumulation on the MXU.
    """
    M, K = x.shape
    K2, N = w.shape
    assert K == K2
    tn = _pick_tn(N)
    n_j = N // tn
    tm = _pick_tm(M, n_j)
    tk = _pick_tk(K, tm, tn)
    Mp, Kp = _round_up(M, tm), _round_up(K, tk)

    xp = x.astype(jnp.bfloat16)
    if (Mp, Kp) != (M, K):
        xp = _pad2(xp, Mp, Kp)
    wp = w.astype(jnp.bfloat16)
    if Kp != K:
        wp = jnp.pad(wp, ((0, Kp - K), (0, 0)))
    bp = shift.astype(jnp.float32).reshape(1, N)

    rp = None
    if residual is not None:
        rp = residual.astype(jnp.bfloat16)
        if Mp != M:
            rp = _pad2(rp, Mp, N)

    cost = pl.CostEstimate(
        flops=2 * Mp * N * Kp, transcendentals=0,
        bytes_accessed=(Mp * Kp + Kp * N) * 2
        + Mp * N * jnp.dtype(out_dtype).itemsize
        + (Mp * N * 2 if residual is not None else 0))

    single_k = (Kp == tk)
    if single_k:
        grid = (Mp // tm, n_j)
        in_specs = [pl.BlockSpec((tm, Kp), lambda i, j: (i, 0)),
                    pl.BlockSpec((Kp, tn), lambda i, j: (0, j)),
                    pl.BlockSpec((1, tn), lambda i, j: (0, j))]
        if residual is not None:
            in_specs.append(pl.BlockSpec((tm, tn), lambda i, j: (i, j)))
        out_spec = pl.BlockSpec((tm, tn), lambda i, j: (i, j))
        kernel = functools.partial(_gemm_fullk_kernel, relu=relu)
        scratch = []
        semantics = ("parallel", "parallel")
    else:
        grid = (Mp // tm, n_j, Kp // tk)
        in_specs = [pl.BlockSpec((tm, tk), lambda i, j, k: (i, k)),
                    pl.BlockSpec((tk, tn), lambda i, j, k: (k, j)),
                    pl.BlockSpec((1, tn), lambda i, j, k: (0, j))]
        if residual is not None:
            in_specs.append(pl.BlockSpec((tm, tn), lambda i, j, k: (i, j)))
        out_spec = pl.BlockSpec((tm, tn), lambda i, j, k: (i, j))
        kernel = functools.partial(_gemm_kloop_kernel, relu=relu)
        scratch = [pltpu.VMEM((tm, tn), jnp.float32)]
        semantics = ("parallel", "parallel", "arbitrary")

    args = [xp, wp, bp] + ([rp] if residual is not None else [])
    out = pl.pallas_call(
        kernel,
        out_shape=jax.ShapeDtypeStruct((Mp, N), out_dtype),
        grid_spec=pltpu.PrefetchScalarGridSpec(
            num_scalar_prefetch=0, grid=grid,
            in_specs=in_specs, out_specs=out_spec, scratch_shapes=scratch),
        compiler_params=pltpu.CompilerParams(
            dimension_semantics=semantics, vmem_limit_bytes=_VMEM_LIMIT),
        cost_estimate=cost,
    )(*args)

    return out[:M] if Mp != M else out


# ----------------------------------------------------------------------------
# Conv3d = im2col (JAX glue, bf16, lane-dense) + Pallas GEMM with fused
# BN shift / residual / ReLU.
# ----------------------------------------------------------------------------
def _im2col3d(x, ksize, stride, pad):
    """x: (N, D, H, W, C) bf16 -> (N*Do*Ho*Wo, kd*kh*kw*C) patches.

    K layout is tap-major / C-minor, matching the (kd,kh,kw,cin)->K weight
    flattening.  For Cin == 1 (stem) taps go straight onto the last (lane)
    axis so the intermediate is lane-dense (no size-1 minor dim)."""
    kd, kh, kw = ksize
    sd, sh, sw = stride
    pd, ph, pw = pad
    if pd or ph or pw:
        x = jnp.pad(x, ((0, 0), (pd, pd), (ph, ph), (pw, pw), (0, 0)))
    N, Dp, Hp, Wp, C = x.shape
    Do = (Dp - kd) // sd + 1
    Ho = (Hp - kh) // sh + 1
    Wo = (Wp - kw) // sw + 1
    cols = []
    for a in range(kd):
        for b in range(kh):
            for c in range(kw):
                cols.append(x[:,
                              a:a + sd * (Do - 1) + 1:sd,
                              b:b + sh * (Ho - 1) + 1:sh,
                              c:c + sw * (Wo - 1) + 1:sw,
                              :])
    if len(cols) == 1:                      # 1x1x1 conv: no duplication at all
        patches = cols[0]
    elif C == 1:                            # stem: lane-dense tap stacking
        patches = jnp.stack([col[..., 0] for col in cols], axis=-1)
    else:
        patches = jnp.concatenate(cols, axis=-1)   # (N,Do,Ho,Wo, taps*C)
    return patches.reshape(N * Do * Ho * Wo, kd * kh * kw * C), (N, Do, Ho, Wo)


def conv3d_bn_act(x, conv, stride, padding, relu, residual=None):
    """x: NDHWC bf16.  conv: {'wmat': (K,Cout) bf16 (BN scale folded),
    'shift': (Cout,) f32, 'ksize': (kd,kh,kw)}.  residual: (M,Cout) or None."""
    kd, kh, kw = conv['ksize']
    Cout = conv['wmat'].shape[1]
    patches, (N, Do, Ho, Wo) = _im2col3d(x, (kd, kh, kw), stride, padding)
    y = matmul_fused(patches, conv['wmat'], conv['shift'],
                     residual=residual, relu=relu, out_dtype=jnp.bfloat16)
    return y.reshape(N, Do, Ho, Wo, Cout)


# ----------------------------------------------------------------------------
# BasicBlock (expansion = 1) with the residual fused into conv2's epilogue
# ----------------------------------------------------------------------------
def basic_block(x, blk):
    s = blk['stride']
    out = conv3d_bn_act(x, blk['conv1'], (s, s, s), (1, 1, 1), relu=True)
    if 'ds' in blk:   # shortcut_type 'B': conv1x1x1(stride) + BN
        residual = conv3d_bn_act(x, blk['ds'], (s, s, s), (0, 0, 0), relu=False)
    else:
        residual = x
    C = residual.shape[-1]
    # relu(bn(conv2(out)) + residual) fused in the GEMM epilogue
    return conv3d_bn_act(out, blk['conv2'], (1, 1, 1), (1, 1, 1),
                         relu=True, residual=residual.reshape(-1, C))


# ----------------------------------------------------------------------------
# Parameter init (deterministic, matching the module's __init__ shapes).
# BN scale is folded into the (K, Cout) bf16 weight matrix; only the shift
# remains for the GEMM epilogue.  Weight reorder happens ONCE here.
# ----------------------------------------------------------------------------
def init_params(key, *, layers, block_inplanes, n_input_channels, conv1_t_size,
                n_classes, widen_factor=1.0):
    block_inplanes = [int(c * widen_factor) for c in block_inplanes]
    bn_eps = 1e-5
    keys = iter(jax.random.split(key, 256))

    def make_conv(cout, cin, kd, kh, kw):
        # kaiming_normal_(mode='fan_out', nonlinearity='relu')
        std = (2.0 / (cout * kd * kh * kw)) ** 0.5
        w = std * jax.random.normal(next(keys), (cout, cin, kd, kh, kw),
                                    jnp.float32)
        # fresh BatchNorm (eval form): gamma=1, beta=0, mean=0, var=1
        gamma = jnp.ones((cout,), jnp.float32)
        beta = jnp.zeros((cout,), jnp.float32)
        mean = jnp.zeros((cout,), jnp.float32)
        var = jnp.ones((cout,), jnp.float32)
        scale = gamma / jnp.sqrt(var + bn_eps)
        shift = beta - mean * scale
        wmat = jnp.transpose(w, (2, 3, 4, 1, 0)).reshape(kd * kh * kw * cin, cout)
        wmat = (wmat * scale[None, :]).astype(jnp.bfloat16)
        return {'wmat': wmat, 'shift': shift, 'ksize': (kd, kh, kw)}

    p = {}
    in_planes = block_inplanes[0]
    p['conv1'] = make_conv(in_planes, n_input_channels, conv1_t_size, 7, 7)

    p['layers'] = []
    for li, (planes, nblocks) in enumerate(zip(block_inplanes, layers)):
        layer_stride = 1 if li == 0 else 2
        blocks = []
        for bi in range(nblocks):
            s = layer_stride if bi == 0 else 1
            blk = {'stride': s,
                   'conv1': make_conv(planes, in_planes, 3, 3, 3),
                   'conv2': make_conv(planes, planes, 3, 3, 3)}
            if s != 1 or in_planes != planes:   # expansion == 1
                blk['ds'] = make_conv(planes, in_planes, 1, 1, 1)
            in_planes = planes
            blocks.append(blk)
        p['layers'].append(blocks)

    fan_in = block_inplanes[3]
    bound = 1.0 / (fan_in ** 0.5)
    p['fc_w'] = jax.random.uniform(next(keys), (fan_in, n_classes), jnp.float32,
                                   -bound, bound)
    p['fc_b'] = jax.random.uniform(next(keys), (n_classes,), jnp.float32,
                                   -bound, bound)
    return p


# ----------------------------------------------------------------------------
# Full forward (mirrors ResNetEncoder.forward)
# ----------------------------------------------------------------------------
def resnet_encoder_forward(params, cfg, x_ncdhw):
    # NCDHW -> NDHWC, bf16 activations internally
    x = jnp.transpose(x_ncdhw, (0, 2, 3, 4, 1)).astype(jnp.bfloat16)

    t = cfg['conv1_t_size']
    x = conv3d_bn_act(x, params['conv1'],
                      stride=(cfg['conv1_t_stride'], 2, 2),
                      padding=(t // 2, 3, 3), relu=True)

    if not cfg['no_max_pool']:
        # MaxPool3d(kernel_size=3, stride=2, padding=1)
        x = lax.reduce_window(x, jnp.asarray(-jnp.inf, x.dtype), lax.max,
                              (1, 3, 3, 3, 1), (1, 2, 2, 2, 1),
                              ((0, 0), (1, 1), (1, 1), (1, 1), (0, 0)))

    feats = []
    for blocks in params['layers']:
        for blk in blocks:
            x = basic_block(x, blk)
        feats.append(x)

    # AdaptiveAvgPool3d((1,1,1)) + flatten + Linear.
    # The FC is a tiny (batch, C) x (C, n_classes) GEMM: pallas_call overhead
    # dwarfs the work, so it goes through XLA's f32 dot (full logits precision).
    pooled = jnp.mean(x.astype(jnp.float32), axis=(1, 2, 3))   # (N, C) f32
    logits = pooled @ params['fc_w'] + params['fc_b']

    # Feature maps in PyTorch NCDHW f32 convention to match the reference.
    # (Downstream consumers that accept bf16 / channels-last can skip this.)
    l1, l2, l3, l4 = [jnp.transpose(f, (0, 4, 1, 2, 3)).astype(jnp.float32)
                      for f in feats]
    return (l1, l2, l3, l4, logits)


if __name__ == "__main__":
    key = jax.random.PRNGKey(0)
    kx, kp = jax.random.split(key)

    cfg = dict(conv1_t_size=7, conv1_t_stride=2, no_max_pool=False)
    # Small synthetic config: BasicBlock, layers=[1,1,1,1], block_inplanes=[4,8,16,32]
    params = init_params(kp,
                         layers=(1, 1, 1, 1),
                         block_inplanes=(4, 8, 16, 32),
                         n_input_channels=1,
                         conv1_t_size=cfg['conv1_t_size'],
                         n_classes=16)

    # input is PyTorch-style NCDHW: (batch=2, C=1, D=16, H=16, W=16)
    x = jax.random.normal(kx, (2, 1, 16, 16, 16), dtype=jnp.float32)

    fwd = jax.jit(lambda inp: resnet_encoder_forward(params, cfg, inp))
    outs = fwd(x)
    outs = jax.block_until_ready(outs)
    print("KERNEL_OK")
</pallas_src>

<mosaic_0001>
module attributes {stable_mosaic.version = 11 : i64} {
  func.func @_gemm_fullk_kernel(%arg0: i32, %arg1: i32, %arg2: memref<512x343xbf16, #tpu.memory_space<vmem>>, %arg3: memref<343x4xbf16, #tpu.memory_space<vmem>>, %arg4: memref<1x4xf32, #tpu.memory_space<vmem>>, %arg5: memref<512x4xbf16, #tpu.memory_space<vmem>>) attributes {dimension_semantics = [#tpu.dimension_semantics<parallel>, #tpu.dimension_semantics<parallel>], iteration_bounds = array<i64: 2, 1>, scalar_prefetch = 0 : i64, scratch_operands = 0 : i64, tpu.core_type = #tpu.core_type<tc>, window_params = [{transform_indices = @transform_0, window_bounds = array<i64: 512, 343>}, {transform_indices = @transform_1, window_bounds = array<i64: 343, 4>}, {transform_indices = @transform_2, window_bounds = array<i64: 1, 4>}, {transform_indices = @transform_3, window_bounds = array<i64: 512, 4>}]} {
    %c0 = arith.constant 0 : index
    %c0_0 = arith.constant 0 : index
    %0 = vector.load %arg2[%c0, %c0_0] : memref<512x343xbf16, #tpu.memory_space<vmem>>, vector<512x343xbf16>
    %c0_1 = arith.constant 0 : index
    %c0_2 = arith.constant 0 : index
    %1 = vector.load %arg3[%c0_1, %c0_2] : memref<343x4xbf16, #tpu.memory_space<vmem>>, vector<343x4xbf16>
    %cst = arith.constant dense<0.000000e+00> : vector<512x4xf32>
    %2 = tpu.matmul %0, %1, %cst {dimension_numbers = #tpu.dot_dimension_numbers<[1], [0], [0], [1], [0, 0, 1, 1], [], []>} : vector<512x343xbf16>, vector<343x4xbf16>, vector<512x4xf32> -> vector<512x4xf32>
    %c0_3 = arith.constant 0 : index
    %c0_4 = arith.constant 0 : index
    %3 = vector.load %arg4[%c0_3, %c0_4] : memref<1x4xf32, #tpu.memory_space<vmem>>, vector<1x4xf32>
    %4 = vector.broadcast %3 : vector<1x4xf32> to vector<512x4xf32>
    %5 = arith.addf %2, %4 : vector<512x4xf32>
    %cst_5 = arith.constant 0.000000e+00 : f32
    %6 = vector.broadcast %cst_5 : f32 to vector<512x4xf32>
    %7 = arith.maximumf %5, %6 : vector<512x4xf32>
    %8 = arith.truncf %7 : vector<512x4xf32> to vector<512x4xbf16>
    %c0_6 = arith.constant 0 : index
    %c0_7 = arith.constant 0 : index
    %9 = vector.load %arg5[%c0_6, %c0_7] : memref<512x4xbf16, #tpu.memory_space<vmem>>, vector<512x4xbf16>
    tpu.vector_store %arg5[%c0_6, %c0_7], %8 {strides = array<i32>} : memref<512x4xbf16, #tpu.memory_space<vmem>>, vector<512x4xbf16>,
    return
  }
  func.func @transform_0(%arg0: i32, %arg1: i32) -> (i32, i32) {
    %c0_i32 = arith.constant 0 : i32
    %c0_i32_0 = arith.constant 0 : i32
    return %arg0, %c0_i32 : i32, i32
  }
  func.func @transform_1(%arg0: i32, %arg1: i32) -> (i32, i32) {
    %c0_i32 = arith.constant 0 : i32
    %c0_i32_0 = arith.constant 0 : i32
    return %c0_i32, %arg1 : i32, i32
  }
  func.func @transform_2(%arg0: i32, %arg1: i32) -> (i32, i32) {
    %c0_i32 = arith.constant 0 : i32
    %c0_i32_0 = arith.constant 0 : i32
    return %c0_i32, %arg1 : i32, i32
  }
  func.func @transform_3(%arg0: i32, %arg1: i32) -> (i32, i32) {
    %c0_i32 = arith.constant 0 : i32
    return %arg0, %arg1 : i32, i32
  }
}

module attributes {stable_mosaic.version = 11 : i64} {
  func.func @_gemm_fullk_kernel(%arg0: i32, %arg1: i32, %arg2: memref<64x108xbf16, #tpu.memory_space<vmem>>, %arg3: memref<108x4xbf16, #tpu.memory_space<vmem>>, %arg4: memref<1x4xf32, #tpu.memory_space<vmem>>, %arg5: memref<64x4xbf16, #tpu.memory_space<vmem>>) attributes {dimension_semantics = [#tpu.dimension_semantics<parallel>, #tpu.dimension_semantics<parallel>], iteration_bounds = array<i64: 2, 1>, scalar_prefetch = 0 : i64, scratch_operands = 0 : i64, tpu.core_type = #tpu.core_type<tc>, window_params = [{transform_indices = @transform_0, window_bounds = array<i64: 64, 108>}, {transform_indices = @transform_1, window_bounds = array<i64: 108, 4>}, {transform_indices = @transform_2, window_bounds = array<i64: 1, 4>}, {transform_indices = @transform_3, window_bounds = array<i64: 64, 4>}]} {
    %c0 = arith.constant 0 : index
    %c0_0 = arith.constant 0 : index
    %0 = vector.load %arg2[%c0, %c0_0] : memref<64x108xbf16, #tpu.memory_space<vmem>>, vector<64x108xbf16>
    %c0_1 = arith.constant 0 : index
    %c0_2 = arith.constant 0 : index
    %1 = vector.load %arg3[%c0_1, %c0_2] : memref<108x4xbf16, #tpu.memory_space<vmem>>, vector<108x4xbf16>
    %cst = arith.constant dense<0.000000e+00> : vector<64x4xf32>
    %2 = tpu.matmul %0, %1, %cst {dimension_numbers = #tpu.dot_dimension_numbers<[1], [0], [0], [1], [0, 0, 1, 1], [], []>} : vector<64x108xbf16>, vector<108x4xbf16>, vector<64x4xf32> -> vector<64x4xf32>
    %c0_3 = arith.constant 0 : index
    %c0_4 = arith.constant 0 : index
    %3 = vector.load %arg4[%c0_3, %c0_4] : memref<1x4xf32, #tpu.memory_space<vmem>>, vector<1x4xf32>
    %4 = vector.broadcast %3 : vector<1x4xf32> to vector<64x4xf32>
    %5 = arith.addf %2, %4 : vector<64x4xf32>
    %cst_5 = arith.constant 0.000000e+00 : f32
    %6 = vector.broadcast %cst_5 : f32 to vector<64x4xf32>
    %7 = arith.maximumf %5, %6 : vector<64x4xf32>
    %8 = arith.truncf %7 : vector<64x4xf32> to vector<64x4xbf16>
    %c0_6 = arith.constant 0 : index
    %c0_7 = arith.constant 0 : index
    %9 = vector.load %arg5[%c0_6, %c0_7] : memref<64x4xbf16, #tpu.memory_space<vmem>>, vector<64x4xbf16>
    tpu.vector_store %arg5[%c0_6, %c0_7], %8 {strides = array<i32>} : memref<64x4xbf16, #tpu.memory_space<vmem>>, vector<64x4xbf16>,
    return
  }
  func.func @transform_0(%arg0: i32, %arg1: i32) -> (i32, i32) {
    %c0_i32 = arith.constant 0 : i32
    %c0_i32_0 = arith.constant 0 : i32
    return %arg0, %c0_i32 : i32, i32
  }
  func.func @transform_1(%arg0: i32, %arg1: i32) -> (i32, i32) {
    %c0_i32 = arith.constant 0 : i32
    %c0_i32_0 = arith.constant 0 : i32
    return %c0_i32, %arg1 : i32, i32
  }
  func.func @transform_2(%arg0: i32, %arg1: i32) -> (i32, i32) {
    %c0_i32 = arith.constant 0 : i32
    %c0_i32_0 = arith.constant 0 : i32
    return %c0_i32, %arg1 : i32, i32
  }
  func.func @transform_3(%arg0: i32, %arg1: i32) -> (i32, i32) {
    %c0_i32 = arith.constant 0 : i32
    return %arg0, %arg1 : i32, i32
  }
}

module attributes {stable_mosaic.version = 11 : i64} {
  func.func @_gemm_fullk_kernel(%arg0: i32, %arg1: i32, %arg2: memref<64x108xbf16, #tpu.memory_space<vmem>>, %arg3: memref<108x4xbf16, #tpu.memory_space<vmem>>, %arg4: memref<1x4xf32, #tpu.memory_space<vmem>>, %arg5: memref<64x4xbf16, #tpu.memory_space<vmem>>, %arg6: memref<64x4xbf16, #tpu.memory_space<vmem>>) attributes {dimension_semantics = [#tpu.dimension_semantics<parallel>, #tpu.dimension_semantics<parallel>], iteration_bounds = array<i64: 2, 1>, scalar_prefetch = 0 : i64, scratch_operands = 0 : i64, tpu.core_type = #tpu.core_type<tc>, window_params = [{transform_indices = @transform_0, window_bounds = array<i64: 64, 108>}, {transform_indices = @transform_1, window_bounds = array<i64: 108, 4>}, {transform_indices = @transform_2, window_bounds = array<i64: 1, 4>}, {transform_indices = @transform_3, window_bounds = array<i64: 64, 4>}, {transform_indices = @transform_4, window_bounds = array<i64: 64, 4>}]} {
    %c0 = arith.constant 0 : index
    %c0_0 = arith.constant 0 : index
    %0 = vector.load %arg2[%c0, %c0_0] : memref<64x108xbf16, #tpu.memory_space<vmem>>, vector<64x108xbf16>
    %c0_1 = arith.constant 0 : index
    %c0_2 = arith.constant 0 : index
    %1 = vector.load %arg3[%c0_1, %c0_2] : memref<108x4xbf16, #tpu.memory_space<vmem>>, vector<108x4xbf16>
    %cst = arith.constant dense<0.000000e+00> : vector<64x4xf32>
    %2 = tpu.matmul %0, %1, %cst {dimension_numbers = #tpu.dot_dimension_numbers<[1], [0], [0], [1], [0, 0, 1, 1], [], []>} : vector<64x108xbf16>, vector<108x4xbf16>, vector<64x4xf32> -> vector<64x4xf32>
    %c0_3 = arith.constant 0 : index
    %c0_4 = arith.constant 0 : index
    %3 = vector.load %arg4[%c0_3, %c0_4] : memref<1x4xf32, #tpu.memory_space<vmem>>, vector<1x4xf32>
    %4 = vector.broadcast %3 : vector<1x4xf32> to vector<64x4xf32>
    %5 = arith.addf %2, %4 : vector<64x4xf32>
    %c0_5 = arith.constant 0 : index
    %c0_6 = arith.constant 0 : index
    %6 = vector.load %arg5[%c0_5, %c0_6] : memref<64x4xbf16, #tpu.memory_space<vmem>>, vector<64x4xbf16>
    %7 = arith.extf %6 : vector<64x4xbf16> to vector<64x4xf32>
    %8 = arith.addf %5, %7 : vector<64x4xf32>
    %cst_7 = arith.constant 0.000000e+00 : f32
    %9 = vector.broadcast %cst_7 : f32 to vector<64x4xf32>
    %10 = arith.maximumf %8, %9 : vector<64x4xf32>
    %11 = arith.truncf %10 : vector<64x4xf32> to vector<64x4xbf16>
    %c0_8 = arith.constant 0 : index
    %c0_9 = arith.constant 0 : index
    %12 = vector.load %arg6[%c0_8, %c0_9] : memref<64x4xbf16, #tpu.memory_space<vmem>>, vector<64x4xbf16>
    tpu.vector_store %arg6[%c0_8, %c0_9], %11 {strides = array<i32>} : memref<64x4xbf16, #tpu.memory_space<vmem>>, vector<64x4xbf16>,
    return
  }
  func.func @transform_0(%arg0: i32, %arg1: i32) -> (i32, i32) {
    %c0_i32 = arith.constant 0 : i32
    %c0_i32_0 = arith.constant 0 : i32
    return %arg0, %c0_i32 : i32, i32
  }
  func.func @transform_1(%arg0: i32, %arg1: i32) -> (i32, i32) {
    %c0_i32 = arith.constant 0 : i32
    %c0_i32_0 = arith.constant 0 : i32
    return %c0_i32, %arg1 : i32, i32
  }
  func.func @transform_2(%arg0: i32, %arg1: i32) -> (i32, i32) {
    %c0_i32 = arith.constant 0 : i32
    %c0_i32_0 = arith.constant 0 : i32
    return %c0_i32, %arg1 : i32, i32
  }
  func.func @transform_3(%arg0: i32, %arg1: i32) -> (i32, i32) {
    %c0_i32 = arith.constant 0 : i32
    return %arg0, %arg1 : i32, i32
  }
  func.func @transform_4(%arg0: i32, %arg1: i32) -> (i32, i32) {
    %c0_i32 = arith.constant 0 : i32
    return %arg0, %arg1 : i32, i32
  }
}

module attributes {stable_mosaic.version = 11 : i64} {
  func.func @_gemm_fullk_kernel(%arg0: i32, %arg1: i32, %arg2: memref<16x108xbf16, #tpu.memory_space<vmem>>, %arg3: memref<108x8xbf16, #tpu.memory_space<vmem>>, %arg4: memref<1x8xf32, #tpu.memory_space<vmem>>, %arg5: memref<16x8xbf16, #tpu.memory_space<vmem>>) attributes {dimension_semantics = [#tpu.dimension_semantics<parallel>, #tpu.dimension_semantics<parallel>], iteration_bounds = array<i64: 1, 1>, scalar_prefetch = 0 : i64, scratch_operands = 0 : i64, tpu.core_type = #tpu.core_type<tc>, window_params = [{transform_indices = @transform_0, window_bounds = array<i64: 16, 108>}, {transform_indices = @transform_1, window_bounds = array<i64: 108, 8>}, {transform_indices = @transform_2, window_bounds = array<i64: 1, 8>}, {transform_indices = @transform_3, window_bounds = array<i64: 16, 8>}]} {
    %c0 = arith.constant 0 : index
    %c0_0 = arith.constant 0 : index
    %0 = vector.load %arg2[%c0, %c0_0] : memref<16x108xbf16, #tpu.memory_space<vmem>>, vector<16x108xbf16>
    %c0_1 = arith.constant 0 : index
    %c0_2 = arith.constant 0 : index
    %1 = vector.load %arg3[%c0_1, %c0_2] : memref<108x8xbf16, #tpu.memory_space<vmem>>, vector<108x8xbf16>
    %cst = arith.constant dense<0.000000e+00> : vector<16x8xf32>
    %2 = tpu.matmul %0, %1, %cst {dimension_numbers = #tpu.dot_dimension_numbers<[1], [0], [0], [1], [0, 0, 1, 1], [], []>} : vector<16x108xbf16>, vector<108x8xbf16>, vector<16x8xf32> -> vector<16x8xf32>
    %c0_3 = arith.constant 0 : index
    %c0_4 = arith.constant 0 : index
    %3 = vector.load %arg4[%c0_3, %c0_4] : memref<1x8xf32, #tpu.memory_space<vmem>>, vector<1x8xf32>
    %4 = vector.broadcast %3 : vector<1x8xf32> to vector<16x8xf32>
    %5 = arith.addf %2, %4 : vector<16x8xf32>
    %cst_5 = arith.constant 0.000000e+00 : f32
    %6 = vector.broadcast %cst_5 : f32 to vector<16x8xf32>
    %7 = arith.maximumf %5, %6 : vector<16x8xf32>
    %8 = arith.truncf %7 : vector<16x8xf32> to vector<16x8xbf16>
    %c0_6 = arith.constant 0 : index
    %c0_7 = arith.constant 0 : index
    %9 = vector.load %arg5[%c0_6, %c0_7] : memref<16x8xbf16, #tpu.memory_space<vmem>>, vector<16x8xbf16>
    tpu.vector_store %arg5[%c0_6, %c0_7], %8 {strides = array<i32>} : memref<16x8xbf16, #tpu.memory_space<vmem>>, vector<16x8xbf16>,
    return
  }
  func.func @transform_0(%arg0: i32, %arg1: i32) -> (i32, i32) {
    %c0_i32 = arith.constant 0 : i32
    %c0_i32_0 = arith.constant 0 : i32
    return %arg0, %c0_i32 : i32, i32
  }
  func.func @transform_1(%arg0: i32, %arg1: i32) -> (i32, i32) {
    %c0_i32 = arith.constant 0 : i32
    %c0_i32_0 = arith.constant 0 : i32
    return %c0_i32, %arg1 : i32, i32
  }
  func.func @transform_2(%arg0: i32, %arg1: i32) -> (i32, i32) {
    %c0_i32 = arith.constant 0 : i32
    %c0_i32_0 = arith.constant 0 : i32
    return %c0_i32, %arg1 : i32, i32
  }
  func.func @transform_3(%arg0: i32, %arg1: i32) -> (i32, i32) {
    %c0_i32 = arith.constant 0 : i32
    return %arg0, %arg1 : i32, i32
  }
}

module attributes {stable_mosaic.version = 11 : i64} {
  func.func @_gemm_fullk_kernel(%arg0: i32, %arg1: i32, %arg2: memref<16x4xbf16, #tpu.memory_space<vmem>>, %arg3: memref<4x8xbf16, #tpu.memory_space<vmem>>, %arg4: memref<1x8xf32, #tpu.memory_space<vmem>>, %arg5: memref<16x8xbf16, #tpu.memory_space<vmem>>) attributes {dimension_semantics = [#tpu.dimension_semantics<parallel>, #tpu.dimension_semantics<parallel>], iteration_bounds = array<i64: 1, 1>, scalar_prefetch = 0 : i64, scratch_operands = 0 : i64, tpu.core_type = #tpu.core_type<tc>, window_params = [{transform_indices = @transform_0, window_bounds = array<i64: 16, 4>}, {transform_indices = @transform_1, window_bounds = array<i64: 4, 8>}, {transform_indices = @transform_2, window_bounds = array<i64: 1, 8>}, {transform_indices = @transform_3, window_bounds = array<i64: 16, 8>}]} {
    %c0 = arith.constant 0 : index
    %c0_0 = arith.constant 0 : index
    %0 = vector.load %arg2[%c0, %c0_0] : memref<16x4xbf16, #tpu.memory_space<vmem>>, vector<16x4xbf16>
    %c0_1 = arith.constant 0 : index
    %c0_2 = arith.constant 0 : index
    %1 = vector.load %arg3[%c0_1, %c0_2] : memref<4x8xbf16, #tpu.memory_space<vmem>>, vector<4x8xbf16>
    %cst = arith.constant dense<0.000000e+00> : vector<16x8xf32>
    %2 = tpu.matmul %0, %1, %cst {dimension_numbers = #tpu.dot_dimension_numbers<[1], [0], [0], [1], [0, 0, 1, 1], [], []>} : vector<16x4xbf16>, vector<4x8xbf16>, vector<16x8xf32> -> vector<16x8xf32>
    %c0_3 = arith.constant 0 : index
    %c0_4 = arith.constant 0 : index
    %3 = vector.load %arg4[%c0_3, %c0_4] : memref<1x8xf32, #tpu.memory_space<vmem>>, vector<1x8xf32>
    %4 = vector.broadcast %3 : vector<1x8xf32> to vector<16x8xf32>
    %5 = arith.addf %2, %4 : vector<16x8xf32>
    %6 = arith.truncf %5 : vector<16x8xf32> to vector<16x8xbf16>
    %c0_5 = arith.constant 0 : index
    %c0_6 = arith.constant 0 : index
    %7 = vector.load %arg5[%c0_5, %c0_6] : memref<16x8xbf16, #tpu.memory_space<vmem>>, vector<16x8xbf16>
    tpu.vector_store %arg5[%c0_5, %c0_6], %6 {strides = array<i32>} : memref<16x8xbf16, #tpu.memory_space<vmem>>, vector<16x8xbf16>,
    return
  }
  func.func @transform_0(%arg0: i32, %arg1: i32) -> (i32, i32) {
    %c0_i32 = arith.constant 0 : i32
    %c0_i32_0 = arith.constant 0 : i32
    return %arg0, %c0_i32 : i32, i32
  }
  func.func @transform_1(%arg0: i32, %arg1: i32) -> (i32, i32) {
    %c0_i32 = arith.constant 0 : i32
    %c0_i32_0 = arith.constant 0 : i32
    return %c0_i32, %arg1 : i32, i32
  }
  func.func @transform_2(%arg0: i32, %arg1: i32) -> (i32, i32) {
    %c0_i32 = arith.constant 0 : i32
    %c0_i32_0 = arith.constant 0 : i32
    return %c0_i32, %arg1 : i32, i32
  }
  func.func @transform_3(%arg0: i32, %arg1: i32) -> (i32, i32) {
    %c0_i32 = arith.constant 0 : i32
    return %arg0, %arg1 : i32, i32
  }
}

module attributes {stable_mosaic.version = 11 : i64} {
  func.func @_gemm_fullk_kernel(%arg0: i32, %arg1: i32, %arg2: memref<16x216xbf16, #tpu.memory_space<vmem>>, %arg3: memref<216x8xbf16, #tpu.memory_space<vmem>>, %arg4: memref<1x8xf32, #tpu.memory_space<vmem>>, %arg5: memref<16x8xbf16, #tpu.memory_space<vmem>>, %arg6: memref<16x8xbf16, #tpu.memory_space<vmem>>) attributes {dimension_semantics = [#tpu.dimension_semantics<parallel>, #tpu.dimension_semantics<parallel>], iteration_bounds = array<i64: 1, 1>, scalar_prefetch = 0 : i64, scratch_operands = 0 : i64, tpu.core_type = #tpu.core_type<tc>, window_params = [{transform_indices = @transform_0, window_bounds = array<i64: 16, 216>}, {transform_indices = @transform_1, window_bounds = array<i64: 216, 8>}, {transform_indices = @transform_2, window_bounds = array<i64: 1, 8>}, {transform_indices = @transform_3, window_bounds = array<i64: 16, 8>}, {transform_indices = @transform_4, window_bounds = array<i64: 16, 8>}]} {
    %c0 = arith.constant 0 : index
    %c0_0 = arith.constant 0 : index
    %0 = vector.load %arg2[%c0, %c0_0] : memref<16x216xbf16, #tpu.memory_space<vmem>>, vector<16x216xbf16>
    %c0_1 = arith.constant 0 : index
    %c0_2 = arith.constant 0 : index
    %1 = vector.load %arg3[%c0_1, %c0_2] : memref<216x8xbf16, #tpu.memory_space<vmem>>, vector<216x8xbf16>
    %cst = arith.constant dense<0.000000e+00> : vector<16x8xf32>
    %2 = tpu.matmul %0, %1, %cst {dimension_numbers = #tpu.dot_dimension_numbers<[1], [0], [0], [1], [0, 0, 1, 1], [], []>} : vector<16x216xbf16>, vector<216x8xbf16>, vector<16x8xf32> -> vector<16x8xf32>
    %c0_3 = arith.constant 0 : index
    %c0_4 = arith.constant 0 : index
    %3 = vector.load %arg4[%c0_3, %c0_4] : memref<1x8xf32, #tpu.memory_space<vmem>>, vector<1x8xf32>
    %4 = vector.broadcast %3 : vector<1x8xf32> to vector<16x8xf32>
    %5 = arith.addf %2, %4 : vector<16x8xf32>
    %c0_5 = arith.constant 0 : index
    %c0_6 = arith.constant 0 : index
    %6 = vector.load %arg5[%c0_5, %c0_6] : memref<16x8xbf16, #tpu.memory_space<vmem>>, vector<16x8xbf16>
    %7 = arith.extf %6 : vector<16x8xbf16> to vector<16x8xf32>
    %8 = arith.addf %5, %7 : vector<16x8xf32>
    %cst_7 = arith.constant 0.000000e+00 : f32
    %9 = vector.broadcast %cst_7 : f32 to vector<16x8xf32>
    %10 = arith.maximumf %8, %9 : vector<16x8xf32>
    %11 = arith.truncf %10 : vector<16x8xf32> to vector<16x8xbf16>
    %c0_8 = arith.constant 0 : index
    %c0_9 = arith.constant 0 : index
    %12 = vector.load %arg6[%c0_8, %c0_9] : memref<16x8xbf16, #tpu.memory_space<vmem>>, vector<16x8xbf16>
    tpu.vector_store %arg6[%c0_8, %c0_9], %11 {strides = array<i32>} : memref<16x8xbf16, #tpu.memory_space<vmem>>, vector<16x8xbf16>,
    return
  }
  func.func @transform_0(%arg0: i32, %arg1: i32) -> (i32, i32) {
    %c0_i32 = arith.constant 0 : i32
    %c0_i32_0 = arith.constant 0 : i32
    return %arg0, %c0_i32 : i32, i32
  }
  func.func @transform_1(%arg0: i32, %arg1: i32) -> (i32, i32) {
    %c0_i32 = arith.constant 0 : i32
    %c0_i32_0 = arith.constant 0 : i32
    return %c0_i32, %arg1 : i32, i32
  }
  func.func @transform_2(%arg0: i32, %arg1: i32) -> (i32, i32) {
    %c0_i32 = arith.constant 0 : i32
    %c0_i32_0 = arith.constant 0 : i32
    return %c0_i32, %arg1 : i32, i32
  }
  func.func @transform_3(%arg0: i32, %arg1: i32) -> (i32, i32) {
    %c0_i32 = arith.constant 0 : i32
    return %arg0, %arg1 : i32, i32
  }
  func.func @transform_4(%arg0: i32, %arg1: i32) -> (i32, i32) {
    %c0_i32 = arith.constant 0 : i32
    return %arg0, %arg1 : i32, i32
  }
}

module attributes {stable_mosaic.version = 11 : i64} {
  func.func @_gemm_fullk_kernel(%arg0: i32, %arg1: i32, %arg2: memref<8x216xbf16, #tpu.memory_space<vmem>>, %arg3: memref<216x16xbf16, #tpu.memory_space<vmem>>, %arg4: memref<1x16xf32, #tpu.memory_space<vmem>>, %arg5: memref<8x16xbf16, #tpu.memory_space<vmem>>) attributes {dimension_semantics = [#tpu.dimension_semantics<parallel>, #tpu.dimension_semantics<parallel>], iteration_bounds = array<i64: 1, 1>, scalar_prefetch = 0 : i64, scratch_operands = 0 : i64, tpu.core_type = #tpu.core_type<tc>, window_params = [{transform_indices = @transform_0, window_bounds = array<i64: 8, 216>}, {transform_indices = @transform_1, window_bounds = array<i64: 216, 16>}, {transform_indices = @transform_2, window_bounds = array<i64: 1, 16>}, {transform_indices = @transform_3, window_bounds = array<i64: 8, 16>}]} {
    %c0 = arith.constant 0 : index
    %c0_0 = arith.constant 0 : index
    %0 = vector.load %arg2[%c0, %c0_0] : memref<8x216xbf16, #tpu.memory_space<vmem>>, vector<8x216xbf16>
    %c0_1 = arith.constant 0 : index
    %c0_2 = arith.constant 0 : index
    %1 = vector.load %arg3[%c0_1, %c0_2] : memref<216x16xbf16, #tpu.memory_space<vmem>>, vector<216x16xbf16>
    %cst = arith.constant dense<0.000000e+00> : vector<8x16xf32>
    %2 = tpu.matmul %0, %1, %cst {dimension_numbers = #tpu.dot_dimension_numbers<[1], [0], [0], [1], [0, 0, 1, 1], [], []>} : vector<8x216xbf16>, vector<216x16xbf16>, vector<8x16xf32> -> vector<8x16xf32>
    %c0_3 = arith.constant 0 : index
    %c0_4 = arith.constant 0 : index
    %3 = vector.load %arg4[%c0_3, %c0_4] : memref<1x16xf32, #tpu.memory_space<vmem>>, vector<1x16xf32>
    %4 = vector.broadcast %3 : vector<1x16xf32> to vector<8x16xf32>
    %5 = arith.addf %2, %4 : vector<8x16xf32>
    %cst_5 = arith.constant 0.000000e+00 : f32
    %6 = vector.broadcast %cst_5 : f32 to vector<8x16xf32>
    %7 = arith.maximumf %5, %6 : vector<8x16xf32>
    %8 = arith.truncf %7 : vector<8x16xf32> to vector<8x16xbf16>
    %c0_6 = arith.constant 0 : index
    %c0_7 = arith.constant 0 : index
    %9 = vector.load %arg5[%c0_6, %c0_7] : memref<8x16xbf16, #tpu.memory_space<vmem>>, vector<8x16xbf16>
    tpu.vector_store %arg5[%c0_6, %c0_7], %8 {strides = array<i32>} : memref<8x16xbf16, #tpu.memory_space<vmem>>, vector<8x16xbf16>,
    return
  }
  func.func @transform_0(%arg0: i32, %arg1: i32) -> (i32, i32) {
    %c0_i32 = arith.constant 0 : i32
    %c0_i32_0 = arith.constant 0 : i32
    return %arg0, %c0_i32 : i32, i32
  }
  func.func @transform_1(%arg0: i32, %arg1: i32) -> (i32, i32) {
    %c0_i32 = arith.constant 0 : i32
    %c0_i32_0 = arith.constant 0 : i32
    return %c0_i32, %arg1 : i32, i32
  }
  func.func @transform_2(%arg0: i32, %arg1: i32) -> (i32, i32) {
    %c0_i32 = arith.constant 0 : i32
    %c0_i32_0 = arith.constant 0 : i32
    return %c0_i32, %arg1 : i32, i32
  }
  func.func @transform_3(%arg0: i32, %arg1: i32) -> (i32, i32) {
    %c0_i32 = arith.constant 0 : i32
    return %arg0, %arg1 : i32, i32
  }
}

module attributes {stable_mosaic.version = 11 : i64} {
  func.func @_gemm_fullk_kernel(%arg0: i32, %arg1: i32, %arg2: memref<8x8xbf16, #tpu.memory_space<vmem>>, %arg3: memref<8x16xbf16, #tpu.memory_space<vmem>>, %arg4: memref<1x16xf32, #tpu.memory_space<vmem>>, %arg5: memref<8x16xbf16, #tpu.memory_space<vmem>>) attributes {dimension_semantics = [#tpu.dimension_semantics<parallel>, #tpu.dimension_semantics<parallel>], iteration_bounds = array<i64: 1, 1>, scalar_prefetch = 0 : i64, scratch_operands = 0 : i64, tpu.core_type = #tpu.core_type<tc>, window_params = [{transform_indices = @transform_0, window_bounds = array<i64: 8, 8>}, {transform_indices = @transform_1, window_bounds = array<i64: 8, 16>}, {transform_indices = @transform_2, window_bounds = array<i64: 1, 16>}, {transform_indices = @transform_3, window_bounds = array<i64: 8, 16>}]} {
    %c0 = arith.constant 0 : index
    %c0_0 = arith.constant 0 : index
    %0 = vector.load %arg2[%c0, %c0_0] : memref<8x8xbf16, #tpu.memory_space<vmem>>, vector<8x8xbf16>
    %c0_1 = arith.constant 0 : index
    %c0_2 = arith.constant 0 : index
    %1 = vector.load %arg3[%c0_1, %c0_2] : memref<8x16xbf16, #tpu.memory_space<vmem>>, vector<8x16xbf16>
    %cst = arith.constant dense<0.000000e+00> : vector<8x16xf32>
    %2 = tpu.matmul %0, %1, %cst {dimension_numbers = #tpu.dot_dimension_numbers<[1], [0], [0], [1], [0, 0, 1, 1], [], []>} : vector<8x8xbf16>, vector<8x16xbf16>, vector<8x16xf32> -> vector<8x16xf32>
    %c0_3 = arith.constant 0 : index
    %c0_4 = arith.constant 0 : index
    %3 = vector.load %arg4[%c0_3, %c0_4] : memref<1x16xf32, #tpu.memory_space<vmem>>, vector<1x16xf32>
    %4 = vector.broadcast %3 : vector<1x16xf32> to vector<8x16xf32>
    %5 = arith.addf %2, %4 : vector<8x16xf32>
    %6 = arith.truncf %5 : vector<8x16xf32> to vector<8x16xbf16>
    %c0_5 = arith.constant 0 : index
    %c0_6 = arith.constant 0 : index
    %7 = vector.load %arg5[%c0_5, %c0_6] : memref<8x16xbf16, #tpu.memory_space<vmem>>, vector<8x16xbf16>
    tpu.vector_store %arg5[%c0_5, %c0_6], %6 {strides = array<i32>} : memref<8x16xbf16, #tpu.memory_space<vmem>>, vector<8x16xbf16>,
    return
  }
  func.func @transform_0(%arg0: i32, %arg1: i32) -> (i32, i32) {
    %c0_i32 = arith.constant 0 : i32
    %c0_i32_0 = arith.constant 0 : i32
    return %arg0, %c0_i32 : i32, i32
  }
  func.func @transform_1(%arg0: i32, %arg1: i32) -> (i32, i32) {
    %c0_i32 = arith.constant 0 : i32
    %c0_i32_0 = arith.constant 0 : i32
    return %c0_i32, %arg1 : i32, i32
  }
  func.func @transform_2(%arg0: i32, %arg1: i32) -> (i32, i32) {
    %c0_i32 = arith.constant 0 : i32
    %c0_i32_0 = arith.constant 0 : i32
    return %c0_i32, %arg1 : i32, i32
  }
  func.func @transform_3(%arg0: i32, %arg1: i32) -> (i32, i32) {
    %c0_i32 = arith.constant 0 : i32
    return %arg0, %arg1 : i32, i32
  }
}

module attributes {stable_mosaic.version = 11 : i64} {
  func.func @_gemm_fullk_kernel(%arg0: i32, %arg1: i32, %arg2: memref<8x432xbf16, #tpu.memory_space<vmem>>, %arg3: memref<432x16xbf16, #tpu.memory_space<vmem>>, %arg4: memref<1x16xf32, #tpu.memory_space<vmem>>, %arg5: memref<8x16xbf16, #tpu.memory_space<vmem>>, %arg6: memref<8x16xbf16, #tpu.memory_space<vmem>>) attributes {dimension_semantics = [#tpu.dimension_semantics<parallel>, #tpu.dimension_semantics<parallel>], iteration_bounds = array<i64: 1, 1>, scalar_prefetch = 0 : i64, scratch_operands = 0 : i64, tpu.core_type = #tpu.core_type<tc>, window_params = [{transform_indices = @transform_0, window_bounds = array<i64: 8, 432>}, {transform_indices = @transform_1, window_bounds = array<i64: 432, 16>}, {transform_indices = @transform_2, window_bounds = array<i64: 1, 16>}, {transform_indices = @transform_3, window_bounds = array<i64: 8, 16>}, {transform_indices = @transform_4, window_bounds = array<i64: 8, 16>}]} {
    %c0 = arith.constant 0 : index
    %c0_0 = arith.constant 0 : index
    %0 = vector.load %arg2[%c0, %c0_0] : memref<8x432xbf16, #tpu.memory_space<vmem>>, vector<8x432xbf16>
    %c0_1 = arith.constant 0 : index
    %c0_2 = arith.constant 0 : index
    %1 = vector.load %arg3[%c0_1, %c0_2] : memref<432x16xbf16, #tpu.memory_space<vmem>>, vector<432x16xbf16>
    %cst = arith.constant dense<0.000000e+00> : vector<8x16xf32>
    %2 = tpu.matmul %0, %1, %cst {dimension_numbers = #tpu.dot_dimension_numbers<[1], [0], [0], [1], [0, 0, 1, 1], [], []>} : vector<8x432xbf16>, vector<432x16xbf16>, vector<8x16xf32> -> vector<8x16xf32>
    %c0_3 = arith.constant 0 : index
    %c0_4 = arith.constant 0 : index
    %3 = vector.load %arg4[%c0_3, %c0_4] : memref<1x16xf32, #tpu.memory_space<vmem>>, vector<1x16xf32>
    %4 = vector.broadcast %3 : vector<1x16xf32> to vector<8x16xf32>
    %5 = arith.addf %2, %4 : vector<8x16xf32>
    %c0_5 = arith.constant 0 : index
    %c0_6 = arith.constant 0 : index
    %6 = vector.load %arg5[%c0_5, %c0_6] : memref<8x16xbf16, #tpu.memory_space<vmem>>, vector<8x16xbf16>
    %7 = arith.extf %6 : vector<8x16xbf16> to vector<8x16xf32>
    %8 = arith.addf %5, %7 : vector<8x16xf32>
    %cst_7 = arith.constant 0.000000e+00 : f32
    %9 = vector.broadcast %cst_7 : f32 to vector<8x16xf32>
    %10 = arith.maximumf %8, %9 : vector<8x16xf32>
    %11 = arith.truncf %10 : vector<8x16xf32> to vector<8x16xbf16>
    %c0_8 = arith.constant 0 : index
    %c0_9 = arith.constant 0 : index
    %12 = vector.load %arg6[%c0_8, %c0_9] : memref<8x16xbf16, #tpu.memory_space<vmem>>, vector<8x16xbf16>
    tpu.vector_store %arg6[%c0_8, %c0_9], %11 {strides = array<i32>} : memref<8x16xbf16, #tpu.memory_space<vmem>>, vector<8x16xbf16>,
    return
  }
  func.func @transform_0(%arg0: i32, %arg1: i32) -> (i32, i32) {
    %c0_i32 = arith.constant 0 : i32
    %c0_i32_0 = arith.constant 0 : i32
    return %arg0, %c0_i32 : i32, i32
  }
  func.func @transform_1(%arg0: i32, %arg1: i32) -> (i32, i32) {
    %c0_i32 = arith.constant 0 : i32
    %c0_i32_0 = arith.constant 0 : i32
    return %c0_i32, %arg1 : i32, i32
  }
  func.func @transform_2(%arg0: i32, %arg1: i32) -> (i32, i32) {
    %c0_i32 = arith.constant 0 : i32
    %c0_i32_0 = arith.constant 0 : i32
    return %c0_i32, %arg1 : i32, i32
  }
  func.func @transform_3(%arg0: i32, %arg1: i32) -> (i32, i32) {
    %c0_i32 = arith.constant 0 : i32
    return %arg0, %arg1 : i32, i32
  }
  func.func @transform_4(%arg0: i32, %arg1: i32) -> (i32, i32) {
    %c0_i32 = arith.constant 0 : i32
    return %arg0, %arg1 : i32, i32
  }
}

module attributes {stable_mosaic.version = 11 : i64} {
  func.func @_gemm_fullk_kernel(%arg0: i32, %arg1: i32, %arg2: memref<8x432xbf16, #tpu.memory_space<vmem>>, %arg3: memref<432x32xbf16, #tpu.memory_space<vmem>>, %arg4: memref<1x32xf32, #tpu.memory_space<vmem>>, %arg5: memref<8x32xbf16, #tpu.memory_space<vmem>>) attributes {dimension_semantics = [#tpu.dimension_semantics<parallel>, #tpu.dimension_semantics<parallel>], iteration_bounds = array<i64: 1, 1>, scalar_prefetch = 0 : i64, scratch_operands = 0 : i64, tpu.core_type = #tpu.core_type<tc>, window_params = [{transform_indices = @transform_0, window_bounds = array<i64: 8, 432>}, {transform_indices = @transform_1, window_bounds = array<i64: 432, 32>}, {transform_indices = @transform_2, window_bounds = array<i64: 1, 32>}, {transform_indices = @transform_3, window_bounds = array<i64: 8, 32>}]} {
    %c0 = arith.constant 0 : index
    %c0_0 = arith.constant 0 : index
    %0 = vector.load %arg2[%c0, %c0_0] : memref<8x432xbf16, #tpu.memory_space<vmem>>, vector<8x432xbf16>
    %c0_1 = arith.constant 0 : index
    %c0_2 = arith.constant 0 : index
    %1 = vector.load %arg3[%c0_1, %c0_2] : memref<432x32xbf16, #tpu.memory_space<vmem>>, vector<432x32xbf16>
    %cst = arith.constant dense<0.000000e+00> : vector<8x32xf32>
    %2 = tpu.matmul %0, %1, %cst {dimension_numbers = #tpu.dot_dimension_numbers<[1], [0], [0], [1], [0, 0, 1, 1], [], []>} : vector<8x432xbf16>, vector<432x32xbf16>, vector<8x32xf32> -> vector<8x32xf32>
    %c0_3 = arith.constant 0 : index
    %c0_4 = arith.constant 0 : index
    %3 = vector.load %arg4[%c0_3, %c0_4] : memref<1x32xf32, #tpu.memory_space<vmem>>, vector<1x32xf32>
    %4 = vector.broadcast %3 : vector<1x32xf32> to vector<8x32xf32>
    %5 = arith.addf %2, %4 : vector<8x32xf32>
    %cst_5 = arith.constant 0.000000e+00 : f32
    %6 = vector.broadcast %cst_5 : f32 to vector<8x32xf32>
    %7 = arith.maximumf %5, %6 : vector<8x32xf32>
    %8 = arith.truncf %7 : vector<8x32xf32> to vector<8x32xbf16>
    %c0_6 = arith.constant 0 : index
    %c0_7 = arith.constant 0 : index
    %9 = vector.load %arg5[%c0_6, %c0_7] : memref<8x32xbf16, #tpu.memory_space<vmem>>, vector<8x32xbf16>
    tpu.vector_store %arg5[%c0_6, %c0_7], %8 {strides = array<i32>} : memref<8x32xbf16, #tpu.memory_space<vmem>>, vector<8x32xbf16>,
    return
  }
  func.func @transform_0(%arg0: i32, %arg1: i32) -> (i32, i32) {
    %c0_i32 = arith.constant 0 : i32
    %c0_i32_0 = arith.constant 0 : i32
    return %arg0, %c0_i32 : i32, i32
  }
  func.func @transform_1(%arg0: i32, %arg1: i32) -> (i32, i32) {
    %c0_i32 = arith.constant 0 : i32
    %c0_i32_0 = arith.constant 0 : i32
    return %c0_i32, %arg1 : i32, i32
  }
  func.func @transform_2(%arg0: i32, %arg1: i32) -> (i32, i32) {
    %c0_i32 = arith.constant 0 : i32
    %c0_i32_0 = arith.constant 0 : i32
    return %c0_i32, %arg1 : i32, i32
  }
  func.func @transform_3(%arg0: i32, %arg1: i32) -> (i32, i32) {
    %c0_i32 = arith.constant 0 : i32
    return %arg0, %arg1 : i32, i32
  }
}

module attributes {stable_mosaic.version = 11 : i64} {
  func.func @_gemm_fullk_kernel(%arg0: i32, %arg1: i32, %arg2: memref<8x16xbf16, #tpu.memory_space<vmem>>, %arg3: memref<16x32xbf16, #tpu.memory_space<vmem>>, %arg4: memref<1x32xf32, #tpu.memory_space<vmem>>, %arg5: memref<8x32xbf16, #tpu.memory_space<vmem>>) attributes {dimension_semantics = [#tpu.dimension_semantics<parallel>, #tpu.dimension_semantics<parallel>], iteration_bounds = array<i64: 1, 1>, scalar_prefetch = 0 : i64, scratch_operands = 0 : i64, tpu.core_type = #tpu.core_type<tc>, window_params = [{transform_indices = @transform_0, window_bounds = array<i64: 8, 16>}, {transform_indices = @transform_1, window_bounds = array<i64: 16, 32>}, {transform_indices = @transform_2, window_bounds = array<i64: 1, 32>}, {transform_indices = @transform_3, window_bounds = array<i64: 8, 32>}]} {
    %c0 = arith.constant 0 : index
    %c0_0 = arith.constant 0 : index
    %0 = vector.load %arg2[%c0, %c0_0] : memref<8x16xbf16, #tpu.memory_space<vmem>>, vector<8x16xbf16>
    %c0_1 = arith.constant 0 : index
    %c0_2 = arith.constant 0 : index
    %1 = vector.load %arg3[%c0_1, %c0_2] : memref<16x32xbf16, #tpu.memory_space<vmem>>, vector<16x32xbf16>
    %cst = arith.constant dense<0.000000e+00> : vector<8x32xf32>
    %2 = tpu.matmul %0, %1, %cst {dimension_numbers = #tpu.dot_dimension_numbers<[1], [0], [0], [1], [0, 0, 1, 1], [], []>} : vector<8x16xbf16>, vector<16x32xbf16>, vector<8x32xf32> -> vector<8x32xf32>
    %c0_3 = arith.constant 0 : index
    %c0_4 = arith.constant 0 : index
    %3 = vector.load %arg4[%c0_3, %c0_4] : memref<1x32xf32, #tpu.memory_space<vmem>>, vector<1x32xf32>
    %4 = vector.broadcast %3 : vector<1x32xf32> to vector<8x32xf32>
    %5 = arith.addf %2, %4 : vector<8x32xf32>
    %6 = arith.truncf %5 : vector<8x32xf32> to vector<8x32xbf16>
    %c0_5 = arith.constant 0 : index
    %c0_6 = arith.constant 0 : index
    %7 = vector.load %arg5[%c0_5, %c0_6] : memref<8x32xbf16, #tpu.memory_space<vmem>>, vector<8x32xbf16>
    tpu.vector_store %arg5[%c0_5, %c0_6], %6 {strides = array<i32>} : memref<8x32xbf16, #tpu.memory_space<vmem>>, vector<8x32xbf16>,
    return
  }
  func.func @transform_0(%arg0: i32, %arg1: i32) -> (i32, i32) {
    %c0_i32 = arith.constant 0 : i32
    %c0_i32_0 = arith.constant 0 : i32
    return %arg0, %c0_i32 : i32, i32
  }
  func.func @transform_1(%arg0: i32, %arg1: i32) -> (i32, i32) {
    %c0_i32 = arith.constant 0 : i32
    %c0_i32_0 = arith.constant 0 : i32
    return %c0_i32, %arg1 : i32, i32
  }
  func.func @transform_2(%arg0: i32, %arg1: i32) -> (i32, i32) {
    %c0_i32 = arith.constant 0 : i32
    %c0_i32_0 = arith.constant 0 : i32
    return %c0_i32, %arg1 : i32, i32
  }
  func.func @transform_3(%arg0: i32, %arg1: i32) -> (i32, i32) {
    %c0_i32 = arith.constant 0 : i32
    return %arg0, %arg1 : i32, i32
  }
}

module attributes {stable_mosaic.version = 11 : i64} {
  func.func @_gemm_fullk_kernel(%arg0: i32, %arg1: i32, %arg2: memref<8x864xbf16, #tpu.memory_space<vmem>>, %arg3: memref<864x32xbf16, #tpu.memory_space<vmem>>, %arg4: memref<1x32xf32, #tpu.memory_space<vmem>>, %arg5: memref<8x32xbf16, #tpu.memory_space<vmem>>, %arg6: memref<8x32xbf16, #tpu.memory_space<vmem>>) attributes {dimension_semantics = [#tpu.dimension_semantics<parallel>, #tpu.dimension_semantics<parallel>], iteration_bounds = array<i64: 1, 1>, scalar_prefetch = 0 : i64, scratch_operands = 0 : i64, tpu.core_type = #tpu.core_type<tc>, window_params = [{transform_indices = @transform_0, window_bounds = array<i64: 8, 864>}, {transform_indices = @transform_1, window_bounds = array<i64: 864, 32>}, {transform_indices = @transform_2, window_bounds = array<i64: 1, 32>}, {transform_indices = @transform_3, window_bounds = array<i64: 8, 32>}, {transform_indices = @transform_4, window_bounds = array<i64: 8, 32>}]} {
    %c0 = arith.constant 0 : index
    %c0_0 = arith.constant 0 : index
    %0 = vector.load %arg2[%c0, %c0_0] : memref<8x864xbf16, #tpu.memory_space<vmem>>, vector<8x864xbf16>
    %c0_1 = arith.constant 0 : index
    %c0_2 = arith.constant 0 : index
    %1 = vector.load %arg3[%c0_1, %c0_2] : memref<864x32xbf16, #tpu.memory_space<vmem>>, vector<864x32xbf16>
    %cst = arith.constant dense<0.000000e+00> : vector<8x32xf32>
    %2 = tpu.matmul %0, %1, %cst {dimension_numbers = #tpu.dot_dimension_numbers<[1], [0], [0], [1], [0, 0, 1, 1], [], []>} : vector<8x864xbf16>, vector<864x32xbf16>, vector<8x32xf32> -> vector<8x32xf32>
    %c0_3 = arith.constant 0 : index
    %c0_4 = arith.constant 0 : index
    %3 = vector.load %arg4[%c0_3, %c0_4] : memref<1x32xf32, #tpu.memory_space<vmem>>, vector<1x32xf32>
    %4 = vector.broadcast %3 : vector<1x32xf32> to vector<8x32xf32>
    %5 = arith.addf %2, %4 : vector<8x32xf32>
    %c0_5 = arith.constant 0 : index
    %c0_6 = arith.constant 0 : index
    %6 = vector.load %arg5[%c0_5, %c0_6] : memref<8x32xbf16, #tpu.memory_space<vmem>>, vector<8x32xbf16>
    %7 = arith.extf %6 : vector<8x32xbf16> to vector<8x32xf32>
    %8 = arith.addf %5, %7 : vector<8x32xf32>
    %cst_7 = arith.constant 0.000000e+00 : f32
    %9 = vector.broadcast %cst_7 : f32 to vector<8x32xf32>
    %10 = arith.maximumf %8, %9 : vector<8x32xf32>
    %11 = arith.truncf %10 : vector<8x32xf32> to vector<8x32xbf16>
    %c0_8 = arith.constant 0 : index
    %c0_9 = arith.constant 0 : index
    %12 = vector.load %arg6[%c0_8, %c0_9] : memref<8x32xbf16, #tpu.memory_space<vmem>>, vector<8x32xbf16>
    tpu.vector_store %arg6[%c0_8, %c0_9], %11 {strides = array<i32>} : memref<8x32xbf16, #tpu.memory_space<vmem>>, vector<8x32xbf16>,
    return
  }
  func.func @transform_0(%arg0: i32, %arg1: i32) -> (i32, i32) {
    %c0_i32 = arith.constant 0 : i32
    %c0_i32_0 = arith.constant 0 : i32
    return %arg0, %c0_i32 : i32, i32
  }
  func.func @transform_1(%arg0: i32, %arg1: i32) -> (i32, i32) {
    %c0_i32 = arith.constant 0 : i32
    %c0_i32_0 = arith.constant 0 : i32
    return %c0_i32, %arg1 : i32, i32
  }
  func.func @transform_2(%arg0: i32, %arg1: i32) -> (i32, i32) {
    %c0_i32 = arith.constant 0 : i32
    %c0_i32_0 = arith.constant 0 : i32
    return %c0_i32, %arg1 : i32, i32
  }
  func.func @transform_3(%arg0: i32, %arg1: i32) -> (i32, i32) {
    %c0_i32 = arith.constant 0 : i32
    return %arg0, %arg1 : i32, i32
  }
  func.func @transform_4(%arg0: i32, %arg1: i32) -> (i32, i32) {
    %c0_i32 = arith.constant 0 : i32
    return %arg0, %arg1 : i32, i32
  }
}

</mosaic_0001>

<bundles_post_ra>
// kernel: _lambda_.12
= control target key start
LH: loop header
LB: loop body
LE: loop exit
PB: predicated region body
PF: predicated region fallthrough
CT: control target
= control target key end

     0   :  { %s2644_s12 = smov 0   ;;  %s2646_s13 = smov 0   ;;  %s3316_s0 = inlined_call_operand.vmem [shape: bf16[1024,343], index: 0, kind: input, shape index: {}]   ;;  %s3317_s1 = inlined_call_operand.vmem [shape: bf16[343,4], index: 1, kind: input, shape index: {}]   ;;  %s3318_s2 = inlined_call_operand.vmem [shape: f32[1,4], index: 2, kind: input, shape index: {}]   ;;  %s3319_s3 = inlined_call_operand.vmem [shape: bf16[1024,4], index: 3, kind: output, shape index: {}]  }
   0x1   :  { %s2648_s14 = smov 0  }
   0x2 LB: > { %s25_s15 = sadd.s32 1, %s2617_s13  ;;  %p1925_p0 = scmp.ge.s32.totalorder %s2621_s14, 1  ;;  %s2621_s14 = sphi %s2648_s14, %s13_s14   ;;  %s2617_s13 = sphi %s2646_s13, %s3321_s13   ;;  %s2613_s12 = sphi %s2644_s12, %s3320_s12  }
   0x3   : > { %p27_p1 = scmp.ge.s32.totalorder %s25_s15, 2  ;;  %p170_p2 = scmp.lt.s32.totalorder %s2621_s14, 3 }
   0x5   : > { %s3323_s15 = smov (%p27_p1, %s25_s15), 0  ;;  %p171_p3 = pnand %p1925_p0, %p170_p2 }
   0x6   : > { %s1926_s28 = sshll.u32 (!%p171_p3), %s2613_s12, 6 }
   0x7   : > { %174 = sbr.rel (%p171_p3) target bundleno = 573 (0x23d), region = 32  ;;  %p206_p4 = scmp.lt.s32.totalorder (!%p171_p3), %s1926_s28, 127 }
   0xc   : > { %v2535_v0 = vld [vmem:[%s3317_s1 + $0x38] sm:$0xff]  ;;  %vm1110_vm0 = vcmask 1042432   ;;  %vm1111_vm1 = vcmask 1043456   ;;  %v399_v2 = vld [vmem:[%s3317_s1 + $0xa8] sm:$0xf]  ;;  %v2623_v3 = vmov 65535  }
   0xd   : > { %v2670_v1 = vld [vmem:[%s3317_s1 + $0x78] sm:$0xff]  ;;  %v1112_v4 = vsel %vm1110_vm0, 4294967295, %v2623_v3  ;;  %1117 = vmatpush.bf16.msra.mxu0 %v2535_v0  ;;  %2549 = vmatpush.bf16.msra.mxu3 %v2535_v0  ;;  %v2534_v5 = vld [vmem:[%s3317_s1 + $0x30] sm:$0xff]  ;;  %v969_v6 = vunpack.c.l.b16 %v399_v2  ;;  %v2533_v11 = vld [vmem:[%s3317_s1 + $0x28] sm:$0xff]  ;;  %s3325_s28 = smov (!%p206_p4, %s1926_s28), 127  ;;  %vm1013_vm2 = vcmask 711680  }
   0xe   : > { %1286 = vmatpush.bf16.msra.mxu1 %v2670_v1  ;;  %v1113_v7 = vsel %vm1111_vm1, %v1112_v4, 0  ;;  %v2682_v8 = vld [vmem:[%s3317_s1 + $0x70] sm:$0xff]  ;;  %v2694_v12 = vld [vmem:[%s3317_s1 + $0x68] sm:$0xff]  ;;  %v2700_v13 = vld [vmem:[%s3317_s1 + $0xa0] sm:$0xff]  ;;  %s2571_s21 = smul.u32 12, %s3325_s28  ;;  %s1929_s20 = sshll.u32 %s3325_s28, 2 }
   0xf   : > { %v991_v9 = vpack.c.b16 %v969_v6, %v969_v6  ;;  %v2532_v14 = vld [vmem:[%s3317_s1 + $0x20] sm:$0xff]  ;;  %v2715_v16 = vld [vmem:[%s3317_s1 + $0x98] sm:$0xff]  ;;  %v2730_v19 = vld [vmem:[%s3317_s1 + $0x90] sm:$0xff]  ;;  %s2872_s23 = scalar_lea.vmem %s3319_s3, %s1929_s20  ;;  %vm1752_vm3 = vcmask 27648  }
  0x10   : > { %v2709_v15 = vld [vmem:[%s3317_s1 + $0x60] sm:$0xff]  ;;  %v2531_v17 = vld [vmem:[%s3317_s1 + $0x18] sm:$0xff]  ;;  %v2530_v20 = vld [vmem:[%s3317_s1 + $0x10] sm:$0xff]  ;;  %s2748_s4 = scalar_lea.vmem %s3316_s0, %s2571_s21 }
  0x11   : > { %1118 = vmatpush.bf16.msra.mxu0 %v2534_v5  ;;  %2550 = vmatpush.bf16.msra.mxu3 %v2534_v5  ;;  %v2684_v10 = vand.u32 %v1113_v7, %v991_v9  ;;  %v2539_v18 = vld [vmem:[%s3317_s1 + $0x58] sm:$0xff]  ;;  %v2538_v21 = vld [vmem:[%s3317_s1 + $0x50] sm:$0xff]  ;;  %v2743_v22 = vld [vmem:[%s3317_s1 + $0x88] sm:$0xff] }
  0x12   : > { %1287 = vmatpush.bf16.msra.mxu1 %v2682_v8  ;;  %v2529_v23 = vld [vmem:[%s3317_s1 + $0x8] sm:$0xff]  ;;  %v2760_v25 = vld [vmem:[%s3317_s1 + $0x80] sm:$0xff]  ;;  %v2434_v27 = vld [vmem:[%s2748_s4 + $0x10] sm:$0xf0] }
  0x13   : > { %1457 = vmatpush.bf16.msra.mxu2 %v2684_v10  ;;  %v2537_v24 = vld [vmem:[%s3317_s1 + $0x48] sm:$0xff]  ;;  %v2528_v28 = vld [vmem:[%s3317_s1] sm:$0xff]  ;;  %v1934_v36 = vld [vmem:[%s2748_s4 + $0xc] sm:$0xf0] }
  0x14   : > { %v1940_v26 = vld [vmem:[%s2748_s4 + $0x8] sm:$0xf]  ;;  %v1932_v29 = vld [vmem:[%s2748_s4] sm:$0xf]  ;;  %v2433_v30 = vld [vmem:[%s2748_s4 + $0x8] sm:$0xf0] }
  0x15   : > { %1119 = vmatpush.bf16.msra.mxu0 %v2533_v11  ;;  %2551 = vmatpush.bf16.msra.mxu3 %v2533_v11  ;;  %v2220_v31 = vld [vmem:[%s2748_s4 + $0x240] sm:$0xf]  ;;  %v2505_v32 = vld [vmem:[%s2748_s4 + $0x248] sm:$0xf0]  ;;  %v1941_v33 = vor.u32 %v2434_v27, %v1940_v26  ;;  %v2432_v35 = vld [vmem:[%s2748_s4 + $0x4] sm:$0xf]  ;;  %v1933_v37 = vor.u32 %v2433_v30, %v1932_v29 }
  0x16   : > { %1288 = vmatpush.bf16.msra.mxu1 %v2694_v12  ;;  %v2536_v34 = vld [vmem:[%s3317_s1 + $0x40] sm:$0xff]  ;;  %v2221_v38 = vor.u32 %v2505_v32, %v2220_v31  ;;  %v1937_v39 = vor.u32 %v2432_v35, %v1934_v36  ;;  %v2437_v41 = vld [vmem:[%s2748_s4 + $0x28] sm:$0xf0]  ;;  %v1944_v42 = vld [vmem:[%s2748_s4 + $0x18] sm:$0xf] }
  0x17   : > { %1458 = vmatpush.bf16.msra.mxu2 %v2700_v13  ;;  %v1952_v40 = vld [vmem:[%s2748_s4 + $0x20] sm:$0xf]  ;;  %v2436_v43 = vld [vmem:[%s2748_s4 + $0x20] sm:$0xf0]  ;;  %v2232_v44 = vld [vmem:[%s2748_s4 + $0x258] sm:$0xf] }
  0x18   : > { %v2508_v45 = vld [vmem:[%s2748_s4 + $0x260] sm:$0xf0]  ;;  %v1953_v46 = vor.u32 %v2437_v41, %v1952_v40  ;;  %v2435_v47 = vld [vmem:[%s2748_s4 + $0x1c] sm:$0xf]  ;;  %v1946_v48 = vld [vmem:[%s2748_s4 + $0x24] sm:$0xf0]  ;;  %v1945_v49 = vor.u32 %v2436_v43, %v1944_v42 }
  0x19   : > { %1120 = vmatpush.bf16.msra.mxu0 %v2532_v14  ;;  %2552 = vmatpush.bf16.msra.mxu3 %v2532_v14  ;;  %v2233_v50 = vor.u32 %v2508_v45, %v2232_v44  ;;  %v1949_v51 = vor.u32 %v2435_v47, %v1946_v48  ;;  %v1964_v52 = vld [vmem:[%s2748_s4 + $0x38] sm:$0xf]  ;;  %v2440_v53 = vld [vmem:[%s2748_s4 + $0x40] sm:$0xf0]  ;;  %v1956_v54 = vld [vmem:[%s2748_s4 + $0x30] sm:$0xf] }
  0x1a   : > { %1289 = vmatpush.bf16.msra.mxu1 %v2709_v15  ;;  %v2439_v55 = vld [vmem:[%s2748_s4 + $0x38] sm:$0xf0]  ;;  %v2244_v56 = vld [vmem:[%s2748_s4 + $0x270] sm:$0xf]  ;;  %v1965_v58 = vor.u32 %v2440_v53, %v1964_v52  ;;  %v2438_v59 = vld [vmem:[%s2748_s4 + $0x34] sm:$0xf] }
  0x1b   : > { %1459 = vmatpush.bf16.msra.mxu2 %v2715_v16  ;;  %v2511_v57 = vld [vmem:[%s2748_s4 + $0x278] sm:$0xf0]  ;;  %v1958_v60 = vld [vmem:[%s2748_s4 + $0x3c] sm:$0xf0]  ;;  %v1957_v61 = vor.u32 %v2439_v55, %v1956_v54  ;;  %v1976_v0 = vld [vmem:[%s2748_s4 + $0x50] sm:$0xf] }
  0x1c   : > { %v2245_v62 = vor.u32 %v2511_v57, %v2244_v56  ;;  %v1961_v63 = vor.u32 %v2438_v59, %v1958_v60  ;;  %v1968_v2 = vld [vmem:[%s2748_s4 + $0x48] sm:$0xf]  ;;  %v2442_v3 = vld [vmem:[%s2748_s4 + $0x50] sm:$0xf0]  ;;  %v2441_v7 = vld [vmem:[%s2748_s4 + $0x4c] sm:$0xf] }
  0x1d   : > { %1121 = vmatpush.bf16.msra.mxu0 %v2531_v17  ;;  %2553 = vmatpush.bf16.msra.mxu3 %v2531_v17  ;;  %v2256_v4 = vld [vmem:[%s2748_s4 + $0x288] sm:$0xf]  ;;  %v2514_v5 = vld [vmem:[%s2748_s4 + $0x290] sm:$0xf0]  ;;  %v1969_v9 = vor.u32 %v2442_v3, %v1968_v2  ;;  %v1980_v14 = vld [vmem:[%s2748_s4 + $0x60] sm:$0xf] }
  0x1e   : > { %1290 = vmatpush.bf16.msra.mxu1 %v2539_v18  ;;  %v2517_v17 = vld [vmem:[%s2748_s4 + $0x2a8] sm:$0xf0]  ;;  %v1992_v26 = vld [vmem:[%s2748_s4 + $0x78] sm:$0xf]  ;;  %v2448_v27 = vld [vmem:[%s2748_s4 + $0x80] sm:$0xf0] }
  0x1f   : > { %1460 = vmatpush.bf16.msra.mxu2 %v2730_v19  ;;  %v2520_v29 = vld [vmem:[%s2748_s4 + $0x2c0] sm:$0xf0]  ;;  %v2447_v31 = vld [vmem:[%s2748_s4 + $0x7c] sm:$0xf]  ;;  %v1994_v32 = vld [vmem:[%s2748_s4 + $0x84] sm:$0xf0] }
  0x20   : > { %v1997_v35 = vor.u32 %v2447_v31, %v1994_v32  ;;  %v2012_v36 = vld [vmem:[%s2748_s4 + $0x98] sm:$0xf]  ;;  %v2292_v40 = vld [vmem:[%s2748_s4 + $0x2d0] sm:$0xf]  ;;  %v2523_v41 = vld [vmem:[%s2748_s4 + $0x2d8] sm:$0xf0] }
  0x21   : > { %1122 = vmatpush.bf16.msra.mxu0 %v2530_v20  ;;  %2554 = vmatpush.bf16.msra.mxu3 %v2530_v20  ;;  %v1982_v20 = vld [vmem:[%s2748_s4 + $0x6c] sm:$0xf0]  ;;  %v2450_v43 = vld [vmem:[%s2748_s4 + $0x94] sm:$0xf]  ;;  %v2006_v44 = vld [vmem:[%s2748_s4 + $0x9c] sm:$0xf0] }
  0x22   : > { %1291 = vmatpush.bf16.msra.mxu1 %v2538_v21  ;;  %v2009_v47 = vor.u32 %v2450_v43, %v2006_v44  ;;  %v2024_v48 = vld [vmem:[%s2748_s4 + $0xb0] sm:$0xf]  ;;  %v2304_v52 = vld [vmem:[%s2748_s4 + $0x2e8] sm:$0xf]  ;;  %v2526_v53 = vld [vmem:[%s2748_s4 + $0x2f0] sm:$0xf0] }
  0x23   : > { %1461 = vmatpush.bf16.msra.mxu2 %v2743_v22  ;;  %v2453_v55 = vld [vmem:[%s2748_s4 + $0xac] sm:$0xf]  ;;  %v2018_v56 = vld [vmem:[%s2748_s4 + $0xb4] sm:$0xf0]  ;;  %v2036_v60 = vld [vmem:[%s2748_s4 + $0xc8] sm:$0xf] }
  0x24   : > { %v2021_v59 = vor.u32 %v2453_v55, %v2018_v56  ;;  %v2860_v3 = vld [vmem:[%s3318_s2] ss:$0 sm:$0xff]  ;;  %v2459_v31 = vld [vmem:[%s2748_s4 + $0xdc] sm:$0xf]  ;;  %v2042_v32 = vld [vmem:[%s2748_s4 + $0xe4] sm:$0xf0] }
  0x25   : > { %1123 = vmatpush.bf16.msra.mxu0 %v2529_v23  ;;  %2555 = vmatpush.bf16.msra.mxu3 %v2529_v23  ;;  %v2463_v56 = vld [vmem:[%s2748_s4 + $0xf8] sm:$0xf0] }
  0x26   : > { %1292 = vmatpush.bf16.msra.mxu1 %v2537_v24 }
  0x27   : > { %1462 = vmatpush.bf16.msra.mxu2 %v2760_v25 }
  0x29   : > { %1124 = vmatpush.bf16.msra.mxu0 %v2528_v28  ;;  %2556 = vmatpush.bf16.msra.mxu3 %v2528_v28  ;;  %v2280_v28 = vld [vmem:[%s2748_s4 + $0x2b8] sm:$0xf] }
  0x2a   : > { %2398 = vmatmul.msk.bf16.vlgmr.msra.gmra.mxu2 %vm1013_vm2, %v1941_v33  ;;  %1293 = vmatpush.bf16.msra.mxu1 %v2536_v34  ;;  %v1993_v33 = vor.u32 %v2448_v27, %v1992_v26  ;;  %v2460_v26 = vld [vmem:[%s2748_s4 + $0xe0] sm:$0xf0]  ;;  %v2507_v27 = vld [vmem:[%s2748_s4 + $0x25c] sm:$0xf] }
  0x2c   : > { %1125 = vmatmul.bf16.vlgmr.msra.gmra.mxu0 %v1933_v37  ;;  %1245 = vmatmul.bf16.vlgmr.msra.gmra.mxu3 %v2221_v38  ;;  %v2452_v37 = vld [vmem:[%s2748_s4 + $0xa0] sm:$0xf0]  ;;  %v2004_v38 = vld [vmem:[%s2748_s4 + $0x90] sm:$0xf] }
  0x2d   : > { %2557 = vmatpush.bf16.msrb.mxu3 %v2670_v1  ;;  %1294 = vmatmul.bf16.vlgmr.msra.gmra.mxu1 %v1937_v39  ;;  %v2443_v1 = vld [vmem:[%s2748_s4 + $0x58] sm:$0xf0]  ;;  %v2013_v42 = vor.u32 %v2452_v37, %v2012_v36 }
  0x2e   : > { %v1977_v6 = vor.u32 %v2443_v1, %v1976_v0  ;;  %v2451_v39 = vld [vmem:[%s2748_s4 + $0x98] sm:$0xf0]  ;;  %v2504_v0 = vld [vmem:[%s2748_s4 + $0x244] sm:$0xf]  ;;  %v2222_v1 = vld [vmem:[%s2748_s4 + $0x24c] sm:$0xf0] }
  0x2f   : > { %v2005_v45 = vor.u32 %v2451_v39, %v2004_v38  ;;  %v2045_v38 = vor.u32 %v2459_v31, %v2042_v32 }
  0x31   : > { %2558 = vmatpush.bf16.msrb.mxu3 %v2682_v8  ;;  %v1970_v8 = vld [vmem:[%s2748_s4 + $0x54] sm:$0xf0] }
  0x32   : > { %v1973_v11 = vor.u32 %v2441_v7, %v1970_v8  ;;  %v2225_v7 = vor.u32 %v2504_v0, %v2222_v1 }
  0x35   : > { %2559 = vmatpush.bf16.msrb.mxu3 %v2694_v12  ;;  %v1988_v12 = vld [vmem:[%s2748_s4 + $0x68] sm:$0xf] }
  0x39   : > { %2560 = vmatpush.bf16.msrb.mxu3 %v2709_v15  ;;  %v2445_v15 = vld [vmem:[%s2748_s4 + $0x68] sm:$0xf0] }
  0x3a   : > { %2399 = vmatmul.msk.bf16.gmra.mxu2 %vm1013_vm2, %v1953_v46  ;;  %v2293_v46 = vor.u32 %v2523_v41, %v2292_v40 }
  0x3c   : > { %1130 = vmatmul.bf16.gmra.mxu0 %v1945_v49  ;;  %1250 = vmatmul.bf16.gmra.mxu3 %v2233_v50  ;;  %v2455_v49 = vld [vmem:[%s2748_s4 + $0xb8] sm:$0xf0]  ;;  %v2016_v50 = vld [vmem:[%s2748_s4 + $0xa8] sm:$0xf] }
  0x3d   : > { %2561 = vmatpush.bf16.msrb.mxu3 %v2539_v18  ;;  %1299 = vmatmul.bf16.gmra.mxu1 %v1949_v51  ;;  %v2454_v51 = vld [vmem:[%s2748_s4 + $0xb0] sm:$0xf0]  ;;  %v2025_v54 = vor.u32 %v2455_v49, %v2024_v48 }
  0x3e   : > { %v2017_v57 = vor.u32 %v2454_v51, %v2016_v50  ;;  %v2060_v51 = vld [vmem:[%s2748_s4 + $0xf8] sm:$0xf] }
  0x41   : > { %2562 = vmatpush.bf16.msrb.mxu3 %v2538_v21  ;;  %v1981_v21 = vor.u32 %v2445_v15, %v1980_v14 }
  0x45   : > { %2563 = vmatpush.bf16.msrb.mxu3 %v2537_v24  ;;  %v2000_v24 = vld [vmem:[%s2748_s4 + $0x80] sm:$0xf] }
  0x49   : > { %2564 = vmatpush.bf16.msrb.mxu3 %v2536_v34  ;;  %v2281_v34 = vor.u32 %v2520_v29, %v2280_v28  ;;  %v2234_v28 = vld [vmem:[%s2748_s4 + $0x264] sm:$0xf0] }
  0x4a   : > { %2400 = vmatmul.msk.bf16.gmra.mxu2 %vm1013_vm2, %v1965_v58  ;;  %v2305_v58 = vor.u32 %v2526_v53, %v2304_v52  ;;  %v2237_v36 = vor.u32 %v2507_v27, %v2234_v28  ;;  %v2464_v52 = vld [vmem:[%s2748_s4 + $0x100] sm:$0xf0] }
  0x4c   : > { %1135 = vmatmul.bf16.gmra.mxu0 %v1957_v61  ;;  %1255 = vmatmul.bf16.gmra.mxu3 %v2245_v62  ;;  %v2458_v61 = vld [vmem:[%s2748_s4 + $0xd0] sm:$0xf0]  ;;  %v2028_v62 = vld [vmem:[%s2748_s4 + $0xc0] sm:$0xf] }
  0x4d   : > { %2565 = vmatpush.bf16.msra.mxu3 %v2684_v10  ;;  %1304 = vmatmul.bf16.gmra.mxu1 %v1961_v63  ;;  %v2257_v10 = vor.u32 %v2514_v5, %v2256_v4  ;;  %v2457_v63 = vld [vmem:[%s2748_s4 + $0xc8] sm:$0xf0]  ;;  %v2037_v2 = vor.u32 %v2458_v61, %v2036_v60  ;;  %v2456_v4 = vld [vmem:[%s2748_s4 + $0xc4] sm:$0xf]  ;;  %v2030_v5 = vld [vmem:[%s2748_s4 + $0xcc] sm:$0xf0]  ;;  %v2061_v60 = vor.u32 %v2464_v52, %v2060_v51 }
  0x4e   : > { %v2462_v61 = vld [vmem:[%s2748_s4 + $0xf4] sm:$0xf]  ;;  %v2084_v51 = vld [vmem:[%s2748_s4 + $0x128] sm:$0xf] }
  0x4f   : > { %v2470_v52 = vld [vmem:[%s2748_s4 + $0x130] sm:$0xf0] }
  0x51   : > { %2566 = vmatpush.bf16.msra.mxu3 %v2700_v13  ;;  %v2446_v13 = vld [vmem:[%s2748_s4 + $0x70] sm:$0xf0] }
  0x52   : > { %v1989_v18 = vor.u32 %v2446_v13, %v1988_v12 }
  0x55   : > { %2567 = vmatpush.bf16.msra.mxu3 %v2715_v16  ;;  %v2268_v16 = vld [vmem:[%s2748_s4 + $0x2a0] sm:$0xf] }
  0x59   : > { %2568 = vmatpush.bf16.msra.mxu3 %v2730_v19  ;;  %v2444_v19 = vld [vmem:[%s2748_s4 + $0x64] sm:$0xf] }
  0x5a   : > { %2401 = vmatmul.msk.bf16.gmra.mxu2 %vm1013_vm2, %v1977_v6  ;;  %v1985_v23 = vor.u32 %v2444_v19, %v1982_v20  ;;  %v2029_v6 = vor.u32 %v2457_v63, %v2028_v62  ;;  %v2054_v62 = vld [vmem:[%s2748_s4 + $0xfc] sm:$0xf0] }
  0x5c   : > { %1140 = vmatmul.bf16.gmra.mxu0 %v1969_v9  ;;  %1260 = vmatmul.bf16.gmra.mxu3 %v2257_v10  ;;  %v2033_v9 = vor.u32 %v2456_v4, %v2030_v5  ;;  %v2057_v5 = vor.u32 %v2462_v61, %v2054_v62  ;;  %v2468_v61 = vld [vmem:[%s2748_s4 + $0x124] sm:$0xf]  ;;  %v2078_v62 = vld [vmem:[%s2748_s4 + $0x12c] sm:$0xf0] }
  0x5d   : > { %2569 = vmatpush.bf16.msra.mxu3 %v2743_v22  ;;  %1309 = vmatmul.bf16.gmra.mxu1 %v1973_v11  ;;  %v2269_v22 = vor.u32 %v2517_v17, %v2268_v16 }
  0x61   : > { %2570 = vmatpush.bf16.msra.mxu3 %v2760_v25  ;;  %v2449_v25 = vld [vmem:[%s2748_s4 + $0x88] sm:$0xf0] }
  0x62   : > { %v2001_v30 = vor.u32 %v2449_v25, %v2000_v24  ;;  %v2040_v24 = vld [vmem:[%s2748_s4 + $0xd8] sm:$0xf] }
  0x6a   : > { %2402 = vmatmul.msk.bf16.gmra.mxu2 %vm1013_vm2, %v1989_v18 }
  0x6c   : > { %1145 = vmatmul.bf16.gmra.mxu0 %v1981_v21  ;;  %1265 = vmatmul.bf16.gmra.mxu3 %v2269_v22  ;;  %v2048_v21 = vld [vmem:[%s2748_s4 + $0xe0] sm:$0xf]  ;;  %v2461_v22 = vld [vmem:[%s2748_s4 + $0xe8] sm:$0xf0] }
  0x6d   : > { %1314 = vmatmul.bf16.gmra.mxu1 %v1985_v23 }
  0x7a   : > { %2403 = vmatmul.msk.bf16.gmra.mxu2 %vm1013_vm2, %v2001_v30  ;;  %v2049_v30 = vor.u32 %v2461_v22, %v2048_v21  ;;  %v2064_v22 = vld [vmem:[%s2748_s4 + $0x108] sm:$0xf] }
  0x7c   : > { %1150 = vmatmul.bf16.gmra.mxu0 %v1993_v33  ;;  %1270 = vmatmul.bf16.gmra.mxu3 %v2281_v34 }
  0x7d   : > { %1319 = vmatmul.bf16.gmra.mxu1 %v1997_v35  ;;  %v2041_v35 = vor.u32 %v2460_v26, %v2040_v24  ;;  %v2466_v24 = vld [vmem:[%s2748_s4 + $0x110] sm:$0xf0]  ;;  %v2258_v26 = vld [vmem:[%s2748_s4 + $0x294] sm:$0xf0] }
  0x8a   : > { %2404 = vmatmul.msk.bf16.gmra.mxu2 %vm1013_vm2, %v2013_v42 }
  0x8c   : > { %1155 = vmatmul.bf16.gmra.mxu0 %v2005_v45  ;;  %1275 = vmatmul.bf16.gmra.mxu3 %v2293_v46 }
  0x8d   : > { %1324 = vmatmul.bf16.gmra.mxu1 %v2009_v47 }
  0x9a   : > { %2405 = vmatmul.msk.bf16.gmra.mxu2 %vm1013_vm2, %v2025_v54  ;;  %v2052_v54 = vld [vmem:[%s2748_s4 + $0xf0] sm:$0xf] }
  0x9b   : > { %v2053_v1 = vor.u32 %v2463_v56, %v2052_v54  ;;  %v2076_v54 = vld [vmem:[%s2748_s4 + $0x120] sm:$0xf]  ;;  %v2469_v56 = vld [vmem:[%s2748_s4 + $0x128] sm:$0xf0] }
  0x9c   : > { %1160 = vmatmul.bf16.gmra.mxu0 %v2017_v57  ;;  %1280 = vmatmul.bf16.gmra.mxu3 %v2305_v58  ;;  %v2510_v57 = vld [vmem:[%s2748_s4 + $0x274] sm:$0xf]  ;;  %v2246_v58 = vld [vmem:[%s2748_s4 + $0x27c] sm:$0xf0] }
  0x9d   : > { %1329 = vmatmul.bf16.gmra.mxu1 %v2021_v59 }
  0xa9   : > { %v1126_v8 = vpop.f32.mrf.mxu0 }
  0xaa   : > { %2406 = vmatmul.msk.bf16.gmra.mxu2 %vm1013_vm2, %v2037_v2  ;;  %v1127_v10 = vadd.f32 %v2860_v3, %v1126_v8  ;;  %v1295_v11 = vpop.f32.mrf.mxu1  ;;  %v2249_v2 = vor.u32 %v2510_v57, %v2246_v58  ;;  %v2516_v57 = vld [vmem:[%s2748_s4 + $0x2a4] sm:$0xf]  ;;  %v2270_v58 = vld [vmem:[%s2748_s4 + $0x2ac] sm:$0xf0] }
  0xac   : > { %v1296_v12 = vadd.f32 %v1295_v11, %v1127_v10  ;;  %1165 = vmatmul.bf16.gmra.mxu0 %v2029_v6  ;;  %1414 = vmatmul.bf16.vlgmr.msrb.gmra.mxu3 %v2225_v7 }
  0xad   : > { %v1464_v13 = vpop.f32.mrf.mxu2  ;;  %1334 = vmatmul.bf16.gmra.mxu1 %v2033_v9 }
  0xae   : > { %v1465_v14 = vadd.f32 %v1464_v13, %v1296_v12 }
  0xaf   : > { %v2867_v15 = vpop.f32.mrf.mxu3 }
  0xb0   : > { %v1624_v16 = vmax.f32 %v1465_v14, 0.0 }
  0xb1   : > { %v1128_v17 = vpop.f32.mrf.mxu0 }
  0xb2   : > { %v1688_v18 = vpack.c.bf16 %v1624_v16, %v1624_v16  ;;  %v1129_v19 = vadd.f32 %v2860_v3, %v1128_v17  ;;  %v1297_v20 = vpop.f32.mrf.mxu1 }
  0xb4   : > { %1753 = vst.msk [vmem:[%s2872_s23] sm:$0xf] %vm1752_vm3, %v1688_v18  ;;  %v1298_v23 = vadd.f32 %v1297_v20, %v1129_v19  ;;  %v2072_v19 = vld [vmem:[%s2748_s4 + $0x110] sm:$0xf]  ;;  %v2467_v20 = vld [vmem:[%s2748_s4 + $0x118] sm:$0xf0] }
  0xb5   : > { %v1466_v25 = vpop.f32.mrf.mxu2  ;;  %v2073_v28 = vor.u32 %v2467_v20, %v2072_v19 }
  0xb6   : > { %v1467_v29 = vadd.f32 %v1466_v25, %v1298_v23  ;;  %v2513_v25 = vld [vmem:[%s2748_s4 + $0x28c] sm:$0xf] }
  0xb7   : > { %v2885_v33 = vpop.f32.mrf.mxu3 }
  0xb8   : > { %v1625_v34 = vmax.f32 %v1467_v29, 0.0  ;;  %v2465_v29 = vld [vmem:[%s2748_s4 + $0x10c] sm:$0xf] }
  0xb9   : > { %v1131_v37 = vpop.f32.mrf.mxu0 }
  0xba   : > { %v1689_v39 = vpack.c.bf16 %v1625_v34, %v1625_v34  ;;  %2407 = vmatmul.msk.bf16.gmra.mxu2 %vm1013_vm2, %v2049_v30  ;;  %v1132_v40 = vadd.f32 %v2860_v3, %v1131_v37  ;;  %v1300_v41 = vpop.f32.mrf.mxu1  ;;  %v2066_v30 = vld [vmem:[%s2748_s4 + $0x114] sm:$0xf0]  ;;  %v2065_v34 = vor.u32 %v2466_v24, %v2064_v22  ;;  %v2473_v22 = vld [vmem:[%s2748_s4 + $0x148] sm:$0xf0] }
  0xbb   : > { %v2069_v37 = vor.u32 %v2465_v29, %v2066_v30  ;;  %v2088_v24 = vld [vmem:[%s2748_s4 + $0x138] sm:$0xf] }
  0xbc   : > { %1754 = vst.msk [vmem:[%s2872_s23 + $0x4] sm:$0xf] %vm1752_vm3, %v1689_v39  ;;  %v1301_v42 = vadd.f32 %v1300_v41, %v1132_v40  ;;  %1170 = vmatmul.bf16.gmra.mxu0 %v2041_v35  ;;  %1419 = vmatmul.bf16.gmra.mxu3 %v2237_v36  ;;  %v2261_v35 = vor.u32 %v2513_v25, %v2258_v26  ;;  %v2472_v26 = vld [vmem:[%s2748_s4 + $0x140] sm:$0xf0] }
  0xbd   : > { %v1469_v43 = vpop.f32.mrf.mxu2  ;;  %1339 = vmatmul.bf16.gmra.mxu1 %v2045_v38 }
  0xbe   : > { %v1470_v44 = vadd.f32 %v1469_v43, %v1301_v42 }
  0xbf   : > { %v2891_v45 = vpop.f32.mrf.mxu3 }
  0xc0   : > { %v1626_v46 = vmax.f32 %v1470_v44, 0.0 }
  0xc1   : > { %v1133_v47 = vpop.f32.mrf.mxu0 }
  0xc2   : > { %v1690_v48 = vpack.c.bf16 %v1626_v46, %v1626_v46  ;;  %v1134_v49 = vadd.f32 %v2860_v3, %v1133_v47  ;;  %v1302_v50 = vpop.f32.mrf.mxu1 }
  0xc4   : > { %1755 = vst.msk [vmem:[%s2872_s23 + $0x8] sm:$0xf] %vm1752_vm3, %v1690_v48  ;;  %v1303_v53 = vadd.f32 %v1302_v50, %v1134_v49 }
  0xc5   : > { %v1471_v55 = vpop.f32.mrf.mxu2 }
  0xc6   : > { %v1472_v59 = vadd.f32 %v1471_v55, %v1303_v53 }
  0xc7   : > { %v2904_v63 = vpop.f32.mrf.mxu3 }
  0xc8   : > { %v1627_v0 = vmax.f32 %v1472_v59, 0.0 }
  0xc9   : > { %v1136_v4 = vpop.f32.mrf.mxu0 }
  0xca   : > { %v1691_v6 = vpack.c.bf16 %v1627_v0, %v1627_v0  ;;  %2408 = vmatmul.msk.bf16.gmra.mxu2 %vm1013_vm2, %v2061_v60  ;;  %v1137_v7 = vadd.f32 %v2860_v3, %v1136_v4  ;;  %v1305_v8 = vpop.f32.mrf.mxu1  ;;  %v2085_v60 = vor.u32 %v2470_v52, %v2084_v51  ;;  %v2273_v4 = vor.u32 %v2516_v57, %v2270_v58  ;;  %v2100_v58 = vld [vmem:[%s2748_s4 + $0x150] sm:$0xf] }
  0xcc   : > { %1756 = vst.msk [vmem:[%s2872_s23 + $0xc] sm:$0xf] %vm1752_vm3, %v1691_v6  ;;  %v1306_v9 = vadd.f32 %v1305_v8, %v1137_v7  ;;  %1175 = vmatmul.bf16.gmra.mxu0 %v2053_v1  ;;  %1424 = vmatmul.bf16.gmra.mxu3 %v2249_v2  ;;  %v2077_v2 = vor.u32 %v2469_v56, %v2076_v54  ;;  %v2476_v56 = vld [vmem:[%s2748_s4 + $0x160] sm:$0xf0] }
  0xcd   : > { %v1474_v10 = vpop.f32.mrf.mxu2  ;;  %1344 = vmatmul.bf16.gmra.mxu1 %v2057_v5  ;;  %v2081_v6 = vor.u32 %v2468_v61, %v2078_v62  ;;  %v2522_v61 = vld [vmem:[%s2748_s4 + $0x2d4] sm:$0xf]  ;;  %v2294_v62 = vld [vmem:[%s2748_s4 + $0x2dc] sm:$0xf0] }
  0xce   : > { %v1475_v11 = vadd.f32 %v1474_v10, %v1306_v9 }
  0xcf   : > { %v2910_v12 = vpop.f32.mrf.mxu3 }
  0xd0   : > { %v1628_v13 = vmax.f32 %v1475_v11, 0.0 }
  0xd1   : > { %v1138_v14 = vpop.f32.mrf.mxu0 }
  0xd2   : > { %v1692_v16 = vpack.c.bf16 %v1628_v13, %v1628_v13  ;;  %v1139_v17 = vadd.f32 %v2860_v3, %v1138_v14  ;;  %v1307_v18 = vpop.f32.mrf.mxu1 }
  0xd4   : > { %1757 = vst.msk [vmem:[%s2872_s23 + $0x10] sm:$0xf] %vm1752_vm3, %v1692_v16  ;;  %v1308_v21 = vadd.f32 %v1307_v18, %v1139_v17 }
  0xd5   : > { %v1476_v23 = vpop.f32.mrf.mxu2 }
  0xd6   : > { %v1477_v27 = vadd.f32 %v1476_v23, %v1308_v21  ;;  %v2096_v21 = vld [vmem:[%s2748_s4 + $0x140] sm:$0xf] }
  0xd7   : > { %v2923_v31 = vpop.f32.mrf.mxu3  ;;  %v2097_v30 = vor.u32 %v2473_v22, %v2096_v21 }
  0xd8   : > { %v1629_v32 = vmax.f32 %v1477_v27, 0.0  ;;  %v2519_v27 = vld [vmem:[%s2748_s4 + $0x2bc] sm:$0xf] }
  0xd9   : > { %v1141_v36 = vpop.f32.mrf.mxu0 }
  0xda   : > { %v1693_v38 = vpack.c.bf16 %v1629_v32, %v1629_v32  ;;  %2409 = vmatmul.msk.bf16.gmra.mxu2 %vm1013_vm2, %v2073_v28  ;;  %v1142_v39 = vadd.f32 %v2860_v3, %v1141_v36  ;;  %v1310_v40 = vpop.f32.mrf.mxu1  ;;  %v2282_v28 = vld [vmem:[%s2748_s4 + $0x2c4] sm:$0xf0]  ;;  %v2471_v32 = vld [vmem:[%s2748_s4 + $0x13c] sm:$0xf] }
  0xdc   : > { %1758 = vst.msk [vmem:[%s2872_s23 + $0x14] sm:$0xf] %vm1752_vm3, %v1693_v38  ;;  %v1311_v41 = vadd.f32 %v1310_v40, %v1142_v39  ;;  %1180 = vmatmul.bf16.gmra.mxu0 %v2065_v34  ;;  %1429 = vmatmul.bf16.gmra.mxu3 %v2261_v35  ;;  %v2090_v34 = vld [vmem:[%s2748_s4 + $0x144] sm:$0xf0]  ;;  %v2285_v38 = vor.u32 %v2519_v27, %v2282_v28  ;;  %v2120_v27 = vld [vmem:[%s2748_s4 + $0x170] sm:$0xf] }
  0xdd   : > { %v1479_v42 = vpop.f32.mrf.mxu2  ;;  %1349 = vmatmul.bf16.gmra.mxu1 %v2069_v37  ;;  %v2089_v37 = vor.u32 %v2472_v26, %v2088_v24  ;;  %v2093_v40 = vor.u32 %v2471_v32, %v2090_v34  ;;  %v2479_v28 = vld [vmem:[%s2748_s4 + $0x178] sm:$0xf0]  ;;  %v2478_v34 = vld [vmem:[%s2748_s4 + $0x170] sm:$0xf0] }
  0xde   : > { %v1480_v43 = vadd.f32 %v1479_v42, %v1311_v41 }
  0xdf   : > { %v2929_v44 = vpop.f32.mrf.mxu3 }
  0xe0   : > { %v1630_v46 = vmax.f32 %v1480_v43, 0.0 }
  0xe1   : > { %v1143_v47 = vpop.f32.mrf.mxu0 }
  0xe2   : > { %v1694_v48 = vpack.c.bf16 %v1630_v46, %v1630_v46  ;;  %v1144_v49 = vadd.f32 %v2860_v3, %v1143_v47  ;;  %v1312_v50 = vpop.f32.mrf.mxu1 }
  0xe4   : > { %1759 = vst.msk [vmem:[%s2872_s23 + $0x18] sm:$0xf] %vm1752_vm3, %v1694_v48  ;;  %v1313_v53 = vadd.f32 %v1312_v50, %v1144_v49 }
  0xe5   : > { %v1481_v55 = vpop.f32.mrf.mxu2 }
  0xe6   : > { %v1482_v59 = vadd.f32 %v1481_v55, %v1313_v53  ;;  %v2108_v55 = vld [vmem:[%s2748_s4 + $0x158] sm:$0xf] }
  0xe7   : > { %v2942_v0 = vpop.f32.mrf.mxu3 }
  0xe8   : > { %v1631_v1 = vmax.f32 %v1482_v59, 0.0 }
  0xe9   : > { %v1146_v5 = vpop.f32.mrf.mxu0 }
  0xea   : > { %v1695_v7 = vpack.c.bf16 %v1631_v1, %v1631_v1  ;;  %2410 = vmatmul.msk.bf16.gmra.mxu2 %vm1013_vm2, %v2085_v60  ;;  %v1147_v8 = vadd.f32 %v2860_v3, %v1146_v5  ;;  %v1315_v9 = vpop.f32.mrf.mxu1  ;;  %v2475_v60 = vld [vmem:[%s2748_s4 + $0x158] sm:$0xf0]  ;;  %v2102_v5 = vld [vmem:[%s2748_s4 + $0x15c] sm:$0xf0] }
  0xec   : > { %1760 = vst.msk [vmem:[%s2872_s23 + $0x1c] sm:$0xf] %vm1752_vm3, %v1695_v7  ;;  %v1316_v10 = vadd.f32 %v1315_v9, %v1147_v8  ;;  %1185 = vmatmul.bf16.gmra.mxu0 %v2077_v2  ;;  %1434 = vmatmul.bf16.gmra.mxu3 %v2273_v4  ;;  %v2109_v2 = vor.u32 %v2476_v56, %v2108_v55  ;;  %v2474_v4 = vld [vmem:[%s2748_s4 + $0x154] sm:$0xf] }
  0xed   : > { %v1484_v11 = vpop.f32.mrf.mxu2  ;;  %1354 = vmatmul.bf16.gmra.mxu1 %v2081_v6  ;;  %v2101_v8 = vor.u32 %v2475_v60, %v2100_v58  ;;  %v2297_v9 = vor.u32 %v2522_v61, %v2294_v62 }
  0xee   : > { %v1485_v13 = vadd.f32 %v1484_v11, %v1316_v10  ;;  %v2105_v11 = vor.u32 %v2474_v4, %v2102_v5  ;;  %v2124_v5 = vld [vmem:[%s2748_s4 + $0x180] sm:$0xf] }
  0xef   : > { %v2948_v14 = vpop.f32.mrf.mxu3 }
  0xf0   : > { %v1632_v16 = vmax.f32 %v1485_v13, 0.0 }
  0xf1   : > { %v1148_v17 = vpop.f32.mrf.mxu0 }
  0xf2   : > { %v1696_v18 = vpack.c.bf16 %v1632_v16, %v1632_v16  ;;  %v1149_v19 = vadd.f32 %v2860_v3, %v1148_v17  ;;  %v1317_v20 = vpop.f32.mrf.mxu1 }
  0xf4   : > { %1761 = vst.msk [vmem:[%s2872_s23 + $0x20] sm:$0xf] %vm1752_vm3, %v1696_v18  ;;  %v1318_v23 = vadd.f32 %v1317_v20, %v1149_v19 }
  0xf5   : > { %v1486_v25 = vpop.f32.mrf.mxu2 }
  0xf6   : > { %v1487_v29 = vadd.f32 %v1486_v25, %v1318_v23 }
  0xf7   : > { %v2961_v35 = vpop.f32.mrf.mxu3 }
  0xf8   : > { %v1633_v36 = vmax.f32 %v1487_v29, 0.0 }
  0xf9   : > { %v1151_v39 = vpop.f32.mrf.mxu0 }
  0xfa   : > { %v1697_v41 = vpack.c.bf16 %v1633_v36, %v1633_v36  ;;  %2411 = vmatmul.msk.bf16.gmra.mxu2 %vm1013_vm2, %v2097_v30  ;;  %v1152_v42 = vadd.f32 %v2860_v3, %v1151_v39  ;;  %v1320_v43 = vpop.f32.mrf.mxu1  ;;  %v2112_v30 = vld [vmem:[%s2748_s4 + $0x168] sm:$0xf]  ;;  %v2525_v36 = vld [vmem:[%s2748_s4 + $0x2ec] sm:$0xf]  ;;  %v2121_v39 = vor.u32 %v2479_v28, %v2120_v27 }
  0xfc   : > { %1762 = vst.msk [vmem:[%s2872_s23 + $0x24] sm:$0xf] %vm1752_vm3, %v1697_v41  ;;  %v1321_v46 = vadd.f32 %v1320_v43, %v1152_v42  ;;  %1190 = vmatmul.bf16.gmra.mxu0 %v2089_v37  ;;  %1439 = vmatmul.bf16.gmra.mxu3 %v2285_v38  ;;  %v2306_v37 = vld [vmem:[%s2748_s4 + $0x2f4] sm:$0xf0] }
  0xfd   : > { %v1489_v47 = vpop.f32.mrf.mxu2  ;;  %1359 = vmatmul.bf16.gmra.mxu1 %v2093_v40  ;;  %v2477_v40 = vld [vmem:[%s2748_s4 + $0x16c] sm:$0xf]  ;;  %v2114_v41 = vld [vmem:[%s2748_s4 + $0x174] sm:$0xf0] }
  0xfe   : > { %v1490_v48 = vadd.f32 %v1489_v47, %v1321_v46  ;;  %v2113_v46 = vor.u32 %v2478_v34, %v2112_v30  ;;  %v2309_v47 = vor.u32 %v2525_v36, %v2306_v37  ;;  %v1247_v30 = vadd.f32 %v2860_v3, %v2867_v15  ;;  %v2136_v15 = vld [vmem:[%s2748_s4 + $0x198] sm:$0xf] }
  0xff   : > { %v2967_v49 = vpop.f32.mrf.mxu3 }
 0x100   : > { %v1634_v50 = vmax.f32 %v1490_v48, 0.0 }
 0x101   : > { %v1153_v51 = vpop.f32.mrf.mxu0 }
 0x102   : > { %v1698_v52 = vpack.c.bf16 %v1634_v50, %v1634_v50  ;;  %v1154_v53 = vadd.f32 %v2860_v3, %v1153_v51  ;;  %v1322_v54 = vpop.f32.mrf.mxu1  ;;  %v2117_v50 = vor.u32 %v2477_v40, %v2114_v41 }
 0x104   : > { %1763 = vst.msk [vmem:[%s2872_s23 + $0x28] sm:$0xf] %vm1752_vm3, %v1698_v52  ;;  %v1323_v57 = vadd.f32 %v1322_v54, %v1154_v53 }
 0x105   : > { %v1491_v59 = vpop.f32.mrf.mxu2 }
 0x106   : > { %v1492_v1 = vadd.f32 %v1491_v59, %v1323_v57 }
 0x107   : > { %v2980_v6 = vpop.f32.mrf.mxu3 }
 0x108   : > { %v1635_v7 = vmax.f32 %v1492_v1, 0.0  ;;  %v2132_v1 = vld [vmem:[%s2748_s4 + $0x188] sm:$0xf] }
 0x109   : > { %v1156_v10 = vpop.f32.mrf.mxu0 }
 0x10a   : > { %v1699_v13 = vpack.c.bf16 %v1635_v7, %v1635_v7  ;;  %2412 = vmatmul.msk.bf16.gmra.mxu2 %vm1013_vm2, %v2109_v2  ;;  %v1157_v16 = vadd.f32 %v2860_v3, %v1156_v10  ;;  %v1325_v17 = vpop.f32.mrf.mxu1  ;;  %v2482_v2 = vld [vmem:[%s2748_s4 + $0x190] sm:$0xf0]  ;;  %v2509_v10 = vld [vmem:[%s2748_s4 + $0x268] sm:$0xf0] }
 0x10c   : > { %1764 = vst.msk [vmem:[%s2872_s23 + $0x2c] sm:$0xf] %vm1752_vm3, %v1699_v13  ;;  %v1326_v18 = vadd.f32 %v1325_v17, %v1157_v16  ;;  %1195 = vmatmul.bf16.gmra.mxu0 %v2101_v8  ;;  %1444 = vmatmul.bf16.gmra.mxu3 %v2297_v9  ;;  %v2481_v8 = vld [vmem:[%s2748_s4 + $0x188] sm:$0xf0]  ;;  %v2240_v9 = vld [vmem:[%s2748_s4 + $0x260] sm:$0xf]  ;;  %v2133_v13 = vor.u32 %v2482_v2, %v2132_v1 }
 0x10d   : > { %v1494_v19 = vpop.f32.mrf.mxu2  ;;  %1364 = vmatmul.bf16.gmra.mxu1 %v2105_v11  ;;  %v2480_v16 = vld [vmem:[%s2748_s4 + $0x184] sm:$0xf]  ;;  %v2126_v17 = vld [vmem:[%s2748_s4 + $0x18c] sm:$0xf0] }
 0x10e   : > { %v1495_v20 = vadd.f32 %v1494_v19, %v1326_v18 }
 0x10f   : > { %v2986_v21 = vpop.f32.mrf.mxu3 }
 0x110   : > { %v1636_v22 = vmax.f32 %v1495_v20, 0.0  ;;  %v2125_v20 = vor.u32 %v2481_v8, %v2124_v5 }
 0x111   : > { %v1158_v23 = vpop.f32.mrf.mxu0 }
 0x112   : > { %v1700_v24 = vpack.c.bf16 %v1636_v22, %v1636_v22  ;;  %v1159_v25 = vadd.f32 %v2860_v3, %v1158_v23  ;;  %v1327_v26 = vpop.f32.mrf.mxu1  ;;  %v2241_v22 = vor.u32 %v2509_v10, %v2240_v9  ;;  %v1252_v10 = vadd.f32 %v2860_v3, %v2891_v45  ;;  %v2148_v45 = vld [vmem:[%s2748_s4 + $0x1b0] sm:$0xf] }
 0x114   : > { %1765 = vst.msk [vmem:[%s2872_s23 + $0x30] sm:$0xf] %vm1752_vm3, %v1700_v24  ;;  %v1328_v29 = vadd.f32 %v1327_v26, %v1159_v25  ;;  %v2129_v24 = vor.u32 %v2480_v16, %v2126_v17 }
 0x115   : > { %v1496_v32 = vpop.f32.mrf.mxu2 }
 0x116   : > { %v1497_v38 = vadd.f32 %v1496_v32, %v1328_v29 }
 0x117   : > { %v2999_v42 = vpop.f32.mrf.mxu3 }
 0x118   : > { %v1637_v43 = vmax.f32 %v1497_v38, 0.0 }
 0x119   : > { %v1161_v48 = vpop.f32.mrf.mxu0 }
 0x11a   : > { %v1701_v51 = vpack.c.bf16 %v1637_v43, %v1637_v43  ;;  %2413 = vmatmul.msk.bf16.gmra.mxu2 %vm1013_vm2, %v2121_v39  ;;  %v1162_v52 = vadd.f32 %v2860_v3, %v1161_v48  ;;  %v1330_v53 = vpop.f32.mrf.mxu1  ;;  %v2144_v43 = vld [vmem:[%s2748_s4 + $0x1a0] sm:$0xf] }
 0x11c   : > { %1766 = vst.msk [vmem:[%s2872_s23 + $0x34] sm:$0xf] %vm1752_vm3, %v1701_v51  ;;  %v1331_v54 = vadd.f32 %v1330_v53, %v1162_v52  ;;  %1200 = vmatmul.bf16.gmra.mxu0 %v2113_v46  ;;  %1449 = vmatmul.bf16.gmra.mxu3 %v2309_v47  ;;  %v2485_v46 = vld [vmem:[%s2748_s4 + $0x1a8] sm:$0xf0]  ;;  %v2252_v51 = vld [vmem:[%s2748_s4 + $0x278] sm:$0xf]  ;;  %v1249_v53 = vadd.f32 %v2860_v3, %v2885_v33 }
 0x11d   : > { %v1499_v55 = vpop.f32.mrf.mxu2  ;;  %1369 = vmatmul.bf16.gmra.mxu1 %v2117_v50  ;;  %v2484_v50 = vld [vmem:[%s2748_s4 + $0x1a0] sm:$0xf0] }
 0x11e   : > { %v1500_v56 = vadd.f32 %v1499_v55, %v1331_v54  ;;  %v2512_v52 = vld [vmem:[%s2748_s4 + $0x280] sm:$0xf0]  ;;  %v2145_v55 = vor.u32 %v2485_v46, %v2144_v43 }
 0x11f   : > { %v3005_v57 = vpop.f32.mrf.mxu3  ;;  %v2253_v1 = vor.u32 %v2512_v52, %v2252_v51 }
 0x120   : > { %v1638_v58 = vmax.f32 %v1500_v56, 0.0  ;;  %v2483_v56 = vld [vmem:[%s2748_s4 + $0x19c] sm:$0xf] }
 0x121   : > { %v1163_v59 = vpop.f32.mrf.mxu0 }
 0x122   : > { %v1702_v60 = vpack.c.bf16 %v1638_v58, %v1638_v58  ;;  %v1164_v61 = vadd.f32 %v2860_v3, %v1163_v59  ;;  %v1332_v62 = vpop.f32.mrf.mxu1  ;;  %v2138_v58 = vld [vmem:[%s2748_s4 + $0x1a4] sm:$0xf0] }
 0x124   : > { %1767 = vst.msk [vmem:[%s2872_s23 + $0x38] sm:$0xf] %vm1752_vm3, %v1702_v60  ;;  %v1333_v4 = vadd.f32 %v1332_v62, %v1164_v61  ;;  %v2137_v62 = vor.u32 %v2484_v50, %v2136_v15 }
 0x125   : > { %v1501_v7 = vpop.f32.mrf.mxu2 }
 0x126   : > { %v1502_v11 = vadd.f32 %v1501_v7, %v1333_v4  ;;  %v2141_v4 = vor.u32 %v2483_v56, %v2138_v58 }
 0x127   : > { %v3018_v18 = vpop.f32.mrf.mxu3 }
 0x128   : > { %v1639_v19 = vmax.f32 %v1502_v11, 0.0 }
 0x129   : > { %v1166_v23 = vpop.f32.mrf.mxu0 }
 0x12a   : > { %v1703_v25 = vpack.c.bf16 %v1639_v19, %v1639_v19  ;;  %2414 = vmatmul.msk.bf16.gmra.mxu2 %vm1013_vm2, %v2133_v13  ;;  %v1167_v26 = vadd.f32 %v2860_v3, %v1166_v23  ;;  %v1335_v27 = vpop.f32.mrf.mxu1 }
 0x12c   : > { %1768 = vst.msk [vmem:[%s2872_s23 + $0x3c] sm:$0xf] %vm1752_vm3, %v1703_v25  ;;  %v1336_v28 = vadd.f32 %v1335_v27, %v1167_v26  ;;  %1205 = vmatmul.bf16.gmra.mxu0 %v2125_v20  ;;  %2423 = vmatmul.msk.bf16.vlgmr.msra.gmra.mxu3 %vm1013_vm2, %v2241_v22  ;;  %v2488_v25 = vld [vmem:[%s2748_s4 + $0x1c0] sm:$0xf0] }
 0x12d   : > { %v1504_v29 = vpop.f32.mrf.mxu2  ;;  %1374 = vmatmul.bf16.gmra.mxu1 %v2129_v24  ;;  %v2156_v24 = vld [vmem:[%s2748_s4 + $0x1b8] sm:$0xf] }
 0x12e   : > { %v1505_v32 = vadd.f32 %v1504_v29, %v1336_v28  ;;  %v2487_v28 = vld [vmem:[%s2748_s4 + $0x1b8] sm:$0xf0]  ;;  %v2264_v29 = vld [vmem:[%s2748_s4 + $0x290] sm:$0xf] }
 0x12f   : > { %v1415_v34 = vpop.f32.mrf.mxu3  ;;  %v2149_v46 = vor.u32 %v2487_v28, %v2148_v45 }
 0x130   : > { %v1640_v36 = vmax.f32 %v1505_v32, 0.0  ;;  %v3027_v37 = vadd.f32 %v1415_v34, %v1247_v30  ;;  %v2515_v30 = vld [vmem:[%s2748_s4 + $0x298] sm:$0xf0]  ;;  %v1254_v32 = vadd.f32 %v2860_v3, %v2904_v63 }
 0x131   : > { %v1168_v38 = vpop.f32.mrf.mxu0 }
 0x132   : > { %v1704_v39 = vpack.c.bf16 %v1640_v36, %v1640_v36  ;;  %v1169_v40 = vadd.f32 %v2860_v3, %v1168_v38  ;;  %v1337_v41 = vpop.f32.mrf.mxu1  ;;  %v2157_v36 = vor.u32 %v2488_v25, %v2156_v24  ;;  %v2486_v38 = vld [vmem:[%s2748_s4 + $0x1b4] sm:$0xf] }
 0x134   : > { %1769 = vst.msk [vmem:[%s2872_s23 + $0x40] sm:$0xf] %vm1752_vm3, %v1704_v39  ;;  %v1338_v47 = vadd.f32 %v1337_v41, %v1169_v40  ;;  %v2150_v39 = vld [vmem:[%s2748_s4 + $0x1bc] sm:$0xf0] }
 0x135   : > { %v1506_v48 = vpop.f32.mrf.mxu2 }
 0x136   : > { %v1507_v54 = vadd.f32 %v1506_v48, %v1338_v47  ;;  %v2265_v47 = vor.u32 %v2515_v30, %v2264_v29  ;;  %v2153_v48 = vor.u32 %v2486_v38, %v2150_v39 }
 0x137   : > { %v1417_v59 = vpop.f32.mrf.mxu3 }
 0x138   : > { %v1641_v60 = vmax.f32 %v1507_v54, 0.0  ;;  %v3042_v61 = vadd.f32 %v1417_v59, %v1249_v53  ;;  %v1257_v54 = vadd.f32 %v2860_v3, %v2910_v12  ;;  %v2160_v12 = vld [vmem:[%s2748_s4 + $0x1c8] sm:$0xf] }
 0x139   : > { %v1171_v2 = vpop.f32.mrf.mxu0 }
 0x13a   : > { %v1705_v5 = vpack.c.bf16 %v1641_v60, %v1641_v60  ;;  %2415 = vmatmul.msk.bf16.gmra.mxu2 %vm1013_vm2, %v2145_v55  ;;  %v1172_v7 = vadd.f32 %v2860_v3, %v1171_v2  ;;  %v1340_v8 = vpop.f32.mrf.mxu1 }
 0x13c   : > { %1770 = vst.msk [vmem:[%s2872_s23 + $0x44] sm:$0xf] %vm1752_vm3, %v1705_v5  ;;  %v1341_v33 = vadd.f32 %v1340_v8, %v1172_v7  ;;  %1210 = vmatmul.bf16.gmra.mxu0 %v2137_v62  ;;  %2424 = vmatmul.msk.bf16.gmra.mxu3 %vm1013_vm2, %v2253_v1  ;;  %v2491_v5 = vld [vmem:[%s2748_s4 + $0x1d8] sm:$0xf0] }
 0x13d   : > { %v1509_v9 = vpop.f32.mrf.mxu2  ;;  %1379 = vmatmul.bf16.gmra.mxu1 %v2141_v4  ;;  %v2168_v4 = vld [vmem:[%s2748_s4 + $0x1d0] sm:$0xf] }
 0x13e   : > { %v1510_v11 = vadd.f32 %v1509_v9, %v1341_v33  ;;  %v2490_v33 = vld [vmem:[%s2748_s4 + $0x1d0] sm:$0xf0]  ;;  %v2276_v9 = vld [vmem:[%s2748_s4 + $0x2a8] sm:$0xf] }
 0x13f   : > { %v1420_v13 = vpop.f32.mrf.mxu3  ;;  %v2161_v25 = vor.u32 %v2490_v33, %v2160_v12 }
 0x140   : > { %v1642_v16 = vmax.f32 %v1510_v11, 0.0  ;;  %v3051_v17 = vadd.f32 %v1420_v13, %v1252_v10  ;;  %v2518_v10 = vld [vmem:[%s2748_s4 + $0x2b0] sm:$0xf0]  ;;  %v1259_v11 = vadd.f32 %v2860_v3, %v2923_v31 }
 0x141   : > { %v1173_v19 = vpop.f32.mrf.mxu0 }
 0x142   : > { %v1706_v20 = vpack.c.bf16 %v1642_v16, %v1642_v16  ;;  %v1174_v22 = vadd.f32 %v2860_v3, %v1173_v19  ;;  %v1342_v23 = vpop.f32.mrf.mxu1  ;;  %v2169_v16 = vor.u32 %v2491_v5, %v2168_v4  ;;  %v2489_v19 = vld [vmem:[%s2748_s4 + $0x1cc] sm:$0xf] }
 0x144   : > { %1771 = vst.msk [vmem:[%s2872_s23 + $0x48] sm:$0xf] %vm1752_vm3, %v1706_v20  ;;  %v1343_v26 = vadd.f32 %v1342_v23, %v1174_v22  ;;  %v2162_v20 = vld [vmem:[%s2748_s4 + $0x1d4] sm:$0xf0] }
 0x145   : > { %v1511_v27 = vpop.f32.mrf.mxu2 }
 0x146   : > { %v1512_v34 = vadd.f32 %v1511_v27, %v1343_v26  ;;  %v2277_v26 = vor.u32 %v2518_v10, %v2276_v9  ;;  %v2165_v27 = vor.u32 %v2489_v19, %v2162_v20 }
 0x147   : > { %v1422_v40 = vpop.f32.mrf.mxu3 }
 0x148   : > { %v1643_v41 = vmax.f32 %v1512_v34, 0.0  ;;  %v3066_v43 = vadd.f32 %v1422_v40, %v1254_v32  ;;  %v1262_v34 = vadd.f32 %v2860_v3, %v2929_v44  ;;  %v2172_v44 = vld [vmem:[%s2748_s4 + $0x1e0] sm:$0xf] }
 0x149   : > { %v1176_v15 = vpop.f32.mrf.mxu0 }
 0x14a   : > { %v1707_v50 = vpack.c.bf16 %v1643_v41, %v1643_v41  ;;  %2416 = vmatmul.msk.bf16.gmra.mxu2 %vm1013_vm2, %v2157_v36  ;;  %v1177_v51 = vadd.f32 %v2860_v3, %v1176_v15  ;;  %v1345_v52 = vpop.f32.mrf.mxu1 }
 0x14c   : > { %1772 = vst.msk [vmem:[%s2872_s23 + $0x4c] sm:$0xf] %vm1752_vm3, %v1707_v50  ;;  %v1346_v63 = vadd.f32 %v1345_v52, %v1177_v51  ;;  %1215 = vmatmul.bf16.gmra.mxu0 %v2149_v46  ;;  %2425 = vmatmul.msk.bf16.gmra.mxu3 %vm1013_vm2, %v2265_v47  ;;  %v2494_v50 = vld [vmem:[%s2748_s4 + $0x1f0] sm:$0xf0] }
 0x14d   : > { %v1514_v53 = vpop.f32.mrf.mxu2  ;;  %1384 = vmatmul.bf16.gmra.mxu1 %v2153_v48  ;;  %v2180_v48 = vld [vmem:[%s2748_s4 + $0x1e8] sm:$0xf] }
 0x14e   : > { %v1515_v55 = vadd.f32 %v1514_v53, %v1346_v63  ;;  %v2493_v63 = vld [vmem:[%s2748_s4 + $0x1e8] sm:$0xf0]  ;;  %v2288_v53 = vld [vmem:[%s2748_s4 + $0x2c0] sm:$0xf] }
 0x14f   : > { %v1425_v56 = vpop.f32.mrf.mxu3  ;;  %v2173_v5 = vor.u32 %v2493_v63, %v2172_v44 }
 0x150   : > { %v1644_v58 = vmax.f32 %v1515_v55, 0.0  ;;  %v3075_v59 = vadd.f32 %v1425_v56, %v1257_v54  ;;  %v2521_v54 = vld [vmem:[%s2748_s4 + $0x2c8] sm:$0xf0]  ;;  %v1264_v55 = vadd.f32 %v2860_v3, %v2942_v0 }
 0x151   : > { %v1178_v60 = vpop.f32.mrf.mxu0 }
 0x152   : > { %v1708_v62 = vpack.c.bf16 %v1644_v58, %v1644_v58  ;;  %v1179_v1 = vadd.f32 %v2860_v3, %v1178_v60  ;;  %v1347_v2 = vpop.f32.mrf.mxu1  ;;  %v2181_v58 = vor.u32 %v2494_v50, %v2180_v48  ;;  %v2492_v60 = vld [vmem:[%s2748_s4 + $0x1e4] sm:$0xf] }
 0x154   : > { %1773 = vst.msk [vmem:[%s2872_s23 + $0x50] sm:$0xf] %vm1752_vm3, %v1708_v62  ;;  %v1348_v7 = vadd.f32 %v1347_v2, %v1179_v1  ;;  %v2174_v62 = vld [vmem:[%s2748_s4 + $0x1ec] sm:$0xf0] }
 0x155   : > { %v1516_v8 = vpop.f32.mrf.mxu2 }
 0x156   : > { %v1517_v13 = vadd.f32 %v1516_v8, %v1348_v7  ;;  %v2289_v7 = vor.u32 %v2521_v54, %v2288_v53  ;;  %v2177_v8 = vor.u32 %v2492_v60, %v2174_v62 }
 0x157   : > { %v1427_v22 = vpop.f32.mrf.mxu3 }
 0x158   : > { %v1645_v23 = vmax.f32 %v1517_v13, 0.0  ;;  %v3090_v24 = vadd.f32 %v1427_v22, %v1259_v11  ;;  %v1267_v13 = vadd.f32 %v2860_v3, %v2948_v14  ;;  %v2184_v14 = vld [vmem:[%s2748_s4 + $0x1f8] sm:$0xf] }
 0x159   : > { %v1181_v45 = vpop.f32.mrf.mxu0 }
 0x15a   : > { %v1709_v28 = vpack.c.bf16 %v1645_v23, %v1645_v23  ;;  %2417 = vmatmul.msk.bf16.gmra.mxu2 %vm1013_vm2, %v2169_v16  ;;  %v1182_v29 = vadd.f32 %v2860_v3, %v1181_v45  ;;  %v1350_v30 = vpop.f32.mrf.mxu1 }
 0x15c   : > { %1774 = vst.msk [vmem:[%s2872_s23 + $0x54] sm:$0xf] %vm1752_vm3, %v1709_v28  ;;  %v1351_v31 = vadd.f32 %v1350_v30, %v1182_v29  ;;  %1220 = vmatmul.bf16.gmra.mxu0 %v2161_v25  ;;  %2426 = vmatmul.msk.bf16.gmra.mxu3 %vm1013_vm2, %v2277_v26  ;;  %v2497_v28 = vld [vmem:[%s2748_s4 + $0x208] sm:$0xf0] }
 0x15d   : > { %v1519_v32 = vpop.f32.mrf.mxu2  ;;  %1389 = vmatmul.bf16.gmra.mxu1 %v2165_v27  ;;  %v2192_v27 = vld [vmem:[%s2748_s4 + $0x200] sm:$0xf] }
 0x15e   : > { %v1520_v36 = vadd.f32 %v1519_v32, %v1351_v31  ;;  %v2496_v31 = vld [vmem:[%s2748_s4 + $0x200] sm:$0xf0]  ;;  %v2300_v32 = vld [vmem:[%s2748_s4 + $0x2d8] sm:$0xf] }
 0x15f   : > { %v1430_v38 = vpop.f32.mrf.mxu3  ;;  %v2185_v50 = vor.u32 %v2496_v31, %v2184_v14 }
 0x160   : > { %v1646_v39 = vmax.f32 %v1520_v36, 0.0  ;;  %v3099_v40 = vadd.f32 %v1430_v38, %v1262_v34  ;;  %v2524_v34 = vld [vmem:[%s2748_s4 + $0x2e0] sm:$0xf0]  ;;  %v1269_v36 = vadd.f32 %v2860_v3, %v2961_v35 }
 0x161   : > { %v1183_v41 = vpop.f32.mrf.mxu0 }
 0x162   : > { %v1710_v46 = vpack.c.bf16 %v1646_v39, %v1646_v39  ;;  %v1184_v47 = vadd.f32 %v2860_v3, %v1183_v41  ;;  %v1352_v15 = vpop.f32.mrf.mxu1  ;;  %v2193_v39 = vor.u32 %v2497_v28, %v2192_v27  ;;  %v2495_v41 = vld [vmem:[%s2748_s4 + $0x1fc] sm:$0xf] }
 0x164   : > { %1775 = vst.msk [vmem:[%s2872_s23 + $0x58] sm:$0xf] %vm1752_vm3, %v1710_v46  ;;  %v1353_v51 = vadd.f32 %v1352_v15, %v1184_v47  ;;  %v2186_v46 = vld [vmem:[%s2748_s4 + $0x204] sm:$0xf0] }
 0x165   : > { %v1521_v52 = vpop.f32.mrf.mxu2 }
 0x166   : > { %v1522_v56 = vadd.f32 %v1521_v52, %v1353_v51  ;;  %v2301_v51 = vor.u32 %v2524_v34, %v2300_v32  ;;  %v2189_v52 = vor.u32 %v2495_v41, %v2186_v46 }
 0x167   : > { %v1432_v1 = vpop.f32.mrf.mxu3 }
 0x168   : > { %v1647_v2 = vmax.f32 %v1522_v56, 0.0  ;;  %v3114_v4 = vadd.f32 %v1432_v1, %v1264_v55  ;;  %v1272_v56 = vadd.f32 %v2860_v3, %v2967_v49  ;;  %v2204_v49 = vld [vmem:[%s2748_s4 + $0x218] sm:$0xf] }
 0x169   : > { %v1186_v12 = vpop.f32.mrf.mxu0 }
 0x16a   : > { %v1711_v33 = vpack.c.bf16 %v1647_v2, %v1647_v2  ;;  %2418 = vmatmul.msk.bf16.gmra.mxu2 %vm1013_vm2, %v2181_v58  ;;  %v1187_v9 = vadd.f32 %v2860_v3, %v1186_v12  ;;  %v1355_v10 = vpop.f32.mrf.mxu1 }
 0x16c   : > { %1776 = vst.msk [vmem:[%s2872_s23 + $0x5c] sm:$0xf] %vm1752_vm3, %v1711_v33  ;;  %v1356_v0 = vadd.f32 %v1355_v10, %v1187_v9  ;;  %1225 = vmatmul.bf16.gmra.mxu0 %v2173_v5  ;;  %2427 = vmatmul.msk.bf16.gmra.mxu3 %vm1013_vm2, %v2289_v7  ;;  %v3152_v7 = vld [vmem:[%s3318_s2] ss:$0 sm:$0xff]  ;;  %v2196_v9 = vld [vmem:[%s2748_s4 + $0x210] sm:$0xf] }
 0x16d   : > { %v1524_v11 = vpop.f32.mrf.mxu2  ;;  %1394 = vmatmul.bf16.gmra.mxu1 %v2177_v8  ;;  %v2500_v8 = vld [vmem:[%s2748_s4 + $0x220] sm:$0xf0] }
 0x16e   : > { %v1525_v16 = vadd.f32 %v1524_v11, %v1356_v0  ;;  %v2499_v0 = vld [vmem:[%s2748_s4 + $0x218] sm:$0xf0]  ;;  %v2312_v11 = vld [vmem:[%s2748_s4 + $0x2f0] sm:$0xf] }
 0x16f   : > { %v1435_v19 = vpop.f32.mrf.mxu3  ;;  %v2197_v28 = vor.u32 %v2499_v0, %v2196_v9 }
 0x170   : > { %v1648_v20 = vmax.f32 %v1525_v16, 0.0  ;;  %v3123_v22 = vadd.f32 %v1435_v19, %v1267_v13  ;;  %v2527_v13 = vld [vmem:[%s2748_s4 + $0x2f8] sm:$0xf0]  ;;  %v1274_v16 = vadd.f32 %v3152_v7, %v2980_v6 }
 0x171   : > { %v1188_v23 = vpop.f32.mrf.mxu0 }
 0x172   : > { %v1712_v25 = vpack.c.bf16 %v1648_v20, %v1648_v20  ;;  %v1189_v26 = vadd.f32 %v2860_v3, %v1188_v23  ;;  %v1357_v45 = vpop.f32.mrf.mxu1  ;;  %v2205_v20 = vor.u32 %v2500_v8, %v2204_v49  ;;  %v2498_v23 = vld [vmem:[%s2748_s4 + $0x214] sm:$0xf] }
 0x174   : > { %1777 = vst.msk [vmem:[%s2872_s23 + $0x60] sm:$0xf] %vm1752_vm3, %v1712_v25  ;;  %v1358_v29 = vadd.f32 %v1357_v45, %v1189_v26  ;;  %v2198_v25 = vld [vmem:[%s2748_s4 + $0x21c] sm:$0xf0] }
 0x175   : > { %v1526_v30 = vpop.f32.mrf.mxu2 }
 0x176   : > { %v1527_v38 = vadd.f32 %v1526_v30, %v1358_v29  ;;  %v2313_v29 = vor.u32 %v2527_v13, %v2312_v11  ;;  %v2201_v30 = vor.u32 %v2498_v23, %v2198_v25  ;;  %v1282_v11 = vadd.f32 %v3152_v7, %v3005_v57 }
 0x177   : > { %v1437_v47 = vpop.f32.mrf.mxu3  ;;  %v1284_v57 = vadd.f32 %v3152_v7, %v3018_v18 }
 0x178   : > { %v1649_v15 = vmax.f32 %v1527_v38, 0.0  ;;  %v3138_v48 = vadd.f32 %v1437_v47, %v1269_v36  ;;  %v1277_v38 = vadd.f32 %v3152_v7, %v2986_v21  ;;  %v2502_v21 = vld [vmem:[%s2748_s4 + $0x230] sm:$0xf0] }
 0x179   : > { %v1191_v44 = vpop.f32.mrf.mxu0 }
 0x17a   : > { %v1713_v63 = vpack.c.bf16 %v1649_v15, %v1649_v15  ;;  %2419 = vmatmul.msk.bf16.gmra.mxu2 %vm1013_vm2, %v2193_v39  ;;  %v1192_v53 = vadd.f32 %v2860_v3, %v1191_v44  ;;  %v1360_v54 = vpop.f32.mrf.mxu1 }
 0x17c   : > { %1778 = vst.msk [vmem:[%s2872_s23 + $0x64] sm:$0xf] %vm1752_vm3, %v1713_v63  ;;  %v1361_v35 = vadd.f32 %v1360_v54, %v1192_v53  ;;  %1230 = vmatmul.bf16.gmra.mxu0 %v2185_v50  ;;  %2428 = vmatmul.msk.bf16.gmra.mxu3 %vm1013_vm2, %v2301_v51  ;;  %v2503_v63 = vld [vmem:[%s2748_s4 + $0x238] sm:$0xf0] }
 0x17d   : > { %v1529_v55 = vpop.f32.mrf.mxu2  ;;  %1399 = vmatmul.bf16.gmra.mxu1 %v2189_v52  ;;  %v2216_v52 = vld [vmem:[%s2748_s4 + $0x230] sm:$0xf] }
 0x17e   : > { %v1530_v58 = vadd.f32 %v1529_v55, %v1361_v35  ;;  %v2208_v35 = vld [vmem:[%s2748_s4 + $0x228] sm:$0xf]  ;;  %v1279_v55 = vadd.f32 %v3152_v7, %v2999_v42 }
 0x17f   : > { %v1440_v60 = vpop.f32.mrf.mxu3 }
 0x180   : > { %v1650_v62 = vmax.f32 %v1530_v58, 0.0  ;;  %v3147_v1 = vadd.f32 %v1440_v60, %v1272_v56  ;;  %v2217_v58 = vor.u32 %v2503_v63, %v2216_v52  ;;  %v2501_v60 = vld [vmem:[%s2748_s4 + $0x22c] sm:$0xf] }
 0x181   : > { %v1193_v2 = vpop.f32.mrf.mxu0 }
 0x182   : > { %v1714_v5 = vpack.c.bf16 %v1650_v62, %v1650_v62  ;;  %v1194_v12 = vadd.f32 %v3152_v7, %v1193_v2  ;;  %v1362_v3 = vpop.f32.mrf.mxu1  ;;  %v2210_v62 = vld [vmem:[%s2748_s4 + $0x234] sm:$0xf0] }
 0x183   : > { %v2213_v8 = vor.u32 %v2501_v60, %v2210_v62 }
 0x184   : > { %1779 = vst.msk [vmem:[%s2872_s23 + $0x68] sm:$0xf] %vm1752_vm3, %v1714_v5  ;;  %v1363_v33 = vadd.f32 %v1362_v3, %v1194_v12  ;;  %v2209_v3 = vor.u32 %v2502_v21, %v2208_v35 }
 0x185   : > { %v1531_v10 = vpop.f32.mrf.mxu2 }
 0x186   : > { %v1532_v19 = vadd.f32 %v1531_v10, %v1363_v33 }
 0x187   : > { %v1442_v26 = vpop.f32.mrf.mxu3 }
 0x188   : > { %v1651_v45 = vmax.f32 %v1532_v19, 0.0  ;;  %v3167_v27 = vadd.f32 %v1442_v26, %v1274_v16 }
 0x189   : > { %v1196_v14 = vpop.f32.mrf.mxu0 }
 0x18a   : > { %v1715_v31 = vpack.c.bf16 %v1651_v45, %v1651_v45  ;;  %2420 = vmatmul.msk.bf16.gmra.mxu2 %vm1013_vm2, %v2205_v20  ;;  %v1197_v32 = vadd.f32 %v3152_v7, %v1196_v14  ;;  %v1365_v34 = vpop.f32.mrf.mxu1 }
 0x18c   : > { %1780 = vst.msk [vmem:[%s2872_s23 + $0x6c] sm:$0xf] %vm1752_vm3, %v1715_v31  ;;  %v1366_v6 = vadd.f32 %v1365_v34, %v1197_v32  ;;  %1235 = vmatmul.bf16.gmra.mxu0 %v2197_v28  ;;  %2429 = vmatmul.msk.bf16.gmra.mxu3 %vm1013_vm2, %v2313_v29  ;;  %v2228_v28 = vld [vmem:[%s2748_s4 + $0x248] sm:$0xf]  ;;  %v2506_v29 = vld [vmem:[%s2748_s4 + $0x250] sm:$0xf0] }
 0x18d   : > { %v1534_v36 = vpop.f32.mrf.mxu2  ;;  %1404 = vmatmul.bf16.gmra.mxu1 %v2201_v30  ;;  %v2229_v32 = vor.u32 %v2506_v29, %v2228_v28 }
 0x18e   : > { %v1535_v39 = vadd.f32 %v1534_v36, %v1366_v6 }
 0x18f   : > { %v1445_v41 = vpop.f32.mrf.mxu3 }
 0x190   : > { %v1652_v46 = vmax.f32 %v1535_v39, 0.0  ;;  %v3176_v47 = vadd.f32 %v1445_v41, %v1277_v38 }
 0x191   : > { %v1198_v15 = vpop.f32.mrf.mxu0 }
 0x192   : > { %v1716_v50 = vpack.c.bf16 %v1652_v46, %v1652_v46  ;;  %v1199_v51 = vadd.f32 %v3152_v7, %v1198_v15  ;;  %v1367_v44 = vpop.f32.mrf.mxu1 }
 0x194   : > { %1781 = vst.msk [vmem:[%s2872_s23 + $0x70] sm:$0xf] %vm1752_vm3, %v1716_v50  ;;  %v1368_v53 = vadd.f32 %v1367_v44, %v1199_v51 }
 0x195   : > { %v1536_v54 = vpop.f32.mrf.mxu2 }
 0x196   : > { %v1537_v56 = vadd.f32 %v1536_v54, %v1368_v53 }
 0x197   : > { %v1447_v2 = vpop.f32.mrf.mxu3 }
 0x198   : > { %v1653_v5 = vmax.f32 %v1537_v56, 0.0  ;;  %v3189_v12 = vadd.f32 %v1447_v2, %v1279_v55 }
 0x199   : > { %v1201_v49 = vpop.f32.mrf.mxu0 }
 0x19a   : > { %v1717_v33 = vpack.c.bf16 %v1653_v5, %v1653_v5  ;;  %2421 = vmatmul.msk.bf16.gmra.mxu2 %vm1013_vm2, %v2217_v58  ;;  %v1202_v9 = vadd.f32 %v3152_v7, %v1201_v49  ;;  %v1370_v10 = vpop.f32.mrf.mxu1 }
 0x19c   : > { %1782 = vst.msk [vmem:[%s2872_s23 + $0x74] sm:$0xf] %vm1752_vm3, %v1717_v33  ;;  %v1371_v42 = vadd.f32 %v1370_v10, %v1202_v9  ;;  %1240 = vmatmul.bf16.gmra.mxu0 %v2209_v3 }
 0x19d   : > { %v1539_v0 = vpop.f32.mrf.mxu2  ;;  %1409 = vmatmul.bf16.gmra.mxu1 %v2213_v8 }
 0x19e   : > { %v1540_v13 = vadd.f32 %v1539_v0, %v1371_v42 }
 0x19f   : > { %v1450_v16 = vpop.f32.mrf.mxu3 }
 0x1a0   : > { %v1654_v19 = vmax.f32 %v1540_v13, 0.0  ;;  %v3197_v20 = vadd.f32 %v1450_v16, %v1282_v11 }
 0x1a1   : > { %v1203_v23 = vpop.f32.mrf.mxu0 }
 0x1a2   : > { %v1718_v25 = vpack.c.bf16 %v1654_v19, %v1654_v19  ;;  %v1204_v26 = vadd.f32 %v3152_v7, %v1203_v23  ;;  %v1372_v45 = vpop.f32.mrf.mxu1 }
 0x1a4   : > { %1783 = vst.msk [vmem:[%s2872_s23 + $0x78] sm:$0xf] %vm1752_vm3, %v1718_v25  ;;  %v1373_v14 = vadd.f32 %v1372_v45, %v1204_v26 }
 0x1a5   : > { %v1541_v30 = vpop.f32.mrf.mxu2 }
 0x1a6   : > { %v1542_v31 = vadd.f32 %v1541_v30, %v1373_v14 }
 0x1a7   : > { %v1452_v34 = vpop.f32.mrf.mxu3 }
 0x1a8   : > { %v1655_v6 = vmax.f32 %v1542_v31, 0.0  ;;  %v3206_v36 = vadd.f32 %v1452_v34, %v1284_v57 }
 0x1a9   : > { %v1206_v38 = vpop.f32.mrf.mxu0 }
 0x1aa   : > { %v1719_v39 = vpack.c.bf16 %v1655_v6, %v1655_v6  ;;  %2422 = vmatmul.msk.bf16.gmra.mxu2 %vm1013_vm2, %v2229_v32  ;;  %v1207_v41 = vadd.f32 %v3152_v7, %v1206_v38  ;;  %v1375_v46 = vpop.f32.mrf.mxu1 }
 0x1ac   : > { %1784 = vst.msk [vmem:[%s2872_s23 + $0x7c] sm:$0xf] %vm1752_vm3, %v1719_v39  ;;  %v1376_v15 = vadd.f32 %v1375_v46, %v1207_v41 }
 0x1ad   : > { %v1544_v50 = vpop.f32.mrf.mxu2 }
 0x1ae   : > { %v1545_v18 = vadd.f32 %v1544_v50, %v1376_v15 }
 0x1af   : > { %v1589_v51 = vpop.f32.mrf.mxu3 }
 0x1b0   : > { %v1656_v44 = vmax.f32 %v1545_v18, 0.0  ;;  %v1590_v52 = vadd.f32 %v1589_v51, %v3051_v17 }
 0x1b1   : > { %v1208_v63 = vpop.f32.mrf.mxu0 }
 0x1b2   : > { %v1720_v53 = vpack.c.bf16 %v1656_v44, %v1656_v44  ;;  %v1674_v54 = vmax.f32 %v1590_v52, 0.0  ;;  %v1209_v35 = vadd.f32 %v3152_v7, %v1208_v63  ;;  %v1377_v21 = vpop.f32.mrf.mxu1 }
 0x1b4   : > { %1785 = vst.msk [vmem:[%s2872_s23 + $0x80] sm:$0xf] %vm1752_vm3, %v1720_v53  ;;  %v1738_v55 = vpack.c.bf16 %v1674_v54, %v1674_v54  ;;  %v1378_v56 = vadd.f32 %v1377_v21, %v1209_v35 }
 0x1b5   : > { %v1546_v58 = vpop.f32.mrf.mxu2 }
 0x1b6   : > { %1803 = vst.msk [vmem:[%s2872_s23 + $0xc8] sm:$0xf] %vm1752_vm3, %v1738_v55  ;;  %v1547_v60 = vadd.f32 %v1546_v58, %v1378_v56 }
 0x1b7   : > { %v1591_v62 = vpop.f32.mrf.mxu3 }
 0x1b8   : > { %v1657_v2 = vmax.f32 %v1547_v60, 0.0  ;;  %v1592_v17 = vadd.f32 %v1591_v62, %v3066_v43 }
 0x1b9   : > { %v1211_v5 = vpop.f32.mrf.mxu0 }
 0x1ba   : > { %v1721_v3 = vpack.c.bf16 %v1657_v2, %v1657_v2  ;;  %v1675_v49 = vmax.f32 %v1592_v17, 0.0  ;;  %v1212_v8 = vadd.f32 %v3152_v7, %v1211_v5  ;;  %v1380_v33 = vpop.f32.mrf.mxu1 }
 0x1bc   : > { %1786 = vst.msk [vmem:[%s2872_s23 + $0x84] sm:$0xf] %vm1752_vm3, %v1721_v3  ;;  %v1739_v9 = vpack.c.bf16 %v1675_v49, %v1675_v49  ;;  %v1381_v10 = vadd.f32 %v1380_v33, %v1212_v8 }
 0x1bd   : > { %v1549_v42 = vpop.f32.mrf.mxu2 }
 0x1be   : > { %1804 = vst.msk [vmem:[%s2872_s23 + $0xcc] sm:$0xf] %vm1752_vm3, %v1739_v9  ;;  %v1550_v0 = vadd.f32 %v1549_v42, %v1381_v10 }
 0x1bf   : > { %v1594_v11 = vpop.f32.mrf.mxu3 }
 0x1c0   : > { %v1658_v13 = vmax.f32 %v1550_v0, 0.0  ;;  %v1595_v43 = vadd.f32 %v1594_v11, %v3075_v59 }
 0x1c1   : > { %v1213_v16 = vpop.f32.mrf.mxu0 }
 0x1c2   : > { %v1722_v19 = vpack.c.bf16 %v1658_v13, %v1658_v13  ;;  %v1676_v23 = vmax.f32 %v1595_v43, 0.0  ;;  %v1214_v25 = vadd.f32 %v3152_v7, %v1213_v16  ;;  %v1382_v26 = vpop.f32.mrf.mxu1 }
 0x1c4   : > { %1787 = vst.msk [vmem:[%s2872_s23 + $0x88] sm:$0xf] %vm1752_vm3, %v1722_v19  ;;  %v1740_v45 = vpack.c.bf16 %v1676_v23, %v1676_v23  ;;  %v1383_v28 = vadd.f32 %v1382_v26, %v1214_v25 }
 0x1c5   : > { %v1551_v29 = vpop.f32.mrf.mxu2 }
 0x1c6   : > { %1805 = vst.msk [vmem:[%s2872_s23 + $0xd0] sm:$0xf] %vm1752_vm3, %v1740_v45  ;;  %v1552_v14 = vadd.f32 %v1551_v29, %v1383_v28 }
 0x1c7   : > { %v1596_v30 = vpop.f32.mrf.mxu3 }
 0x1c8   : > { %v1659_v57 = vmax.f32 %v1552_v14, 0.0  ;;  %v1597_v59 = vadd.f32 %v1596_v30, %v3090_v24 }
 0x1c9   : > { %v1216_v31 = vpop.f32.mrf.mxu0 }
 0x1ca   : > { %v1723_v32 = vpack.c.bf16 %v1659_v57, %v1659_v57  ;;  %v1677_v34 = vmax.f32 %v1597_v59, 0.0  ;;  %v1217_v6 = vadd.f32 %v3152_v7, %v1216_v31  ;;  %v1385_v38 = vpop.f32.mrf.mxu1 }
 0x1cc   : > { %1788 = vst.msk [vmem:[%s2872_s23 + $0x8c] sm:$0xf] %vm1752_vm3, %v1723_v32  ;;  %v1741_v39 = vpack.c.bf16 %v1677_v34, %v1677_v34  ;;  %v1386_v41 = vadd.f32 %v1385_v38, %v1217_v6 }
 0x1cd   : > { %v1554_v46 = vpop.f32.mrf.mxu2 }
 0x1ce   : > { %1806 = vst.msk [vmem:[%s2872_s23 + $0xd4] sm:$0xf] %vm1752_vm3, %v1741_v39  ;;  %v1555_v15 = vadd.f32 %v1554_v46, %v1386_v41 }
 0x1cf   : > { %v1599_v50 = vpop.f32.mrf.mxu3 }
 0x1d0   : > { %v1660_v18 = vmax.f32 %v1555_v15, 0.0  ;;  %v1600_v24 = vadd.f32 %v1599_v50, %v3099_v40 }
 0x1d1   : > { %v1218_v51 = vpop.f32.mrf.mxu0 }
 0x1d2   : > { %v1724_v44 = vpack.c.bf16 %v1660_v18, %v1660_v18  ;;  %v1678_v52 = vmax.f32 %v1600_v24, 0.0  ;;  %v1219_v63 = vadd.f32 %v3152_v7, %v1218_v51  ;;  %v1387_v53 = vpop.f32.mrf.mxu1 }
 0x1d4   : > { %1789 = vst.msk [vmem:[%s2872_s23 + $0x90] sm:$0xf] %vm1752_vm3, %v1724_v44  ;;  %v1742_v54 = vpack.c.bf16 %v1678_v52, %v1678_v52  ;;  %v1388_v35 = vadd.f32 %v1387_v53, %v1219_v63 }
 0x1d5   : > { %v1556_v21 = vpop.f32.mrf.mxu2 }
 0x1d6   : > { %1807 = vst.msk [vmem:[%s2872_s23 + $0xd8] sm:$0xf] %vm1752_vm3, %v1742_v54  ;;  %v1557_v55 = vadd.f32 %v1556_v21, %v1388_v35 }
 0x1d7   : > { %v1601_v56 = vpop.f32.mrf.mxu3 }
 0x1d8   : > { %v1661_v58 = vmax.f32 %v1557_v55, 0.0  ;;  %v1602_v40 = vadd.f32 %v1601_v56, %v3114_v4 }
 0x1d9   : > { %v1221_v60 = vpop.f32.mrf.mxu0 }
 0x1da   : > { %v1725_v62 = vpack.c.bf16 %v1661_v58, %v1661_v58  ;;  %v1679_v2 = vmax.f32 %v1602_v40, 0.0  ;;  %v1222_v17 = vadd.f32 %v3152_v7, %v1221_v60  ;;  %v1390_v5 = vpop.f32.mrf.mxu1 }
 0x1dc   : > { %1790 = vst.msk [vmem:[%s2872_s23 + $0x94] sm:$0xf] %vm1752_vm3, %v1725_v62  ;;  %v1743_v3 = vpack.c.bf16 %v1679_v2, %v1679_v2  ;;  %v1391_v49 = vadd.f32 %v1390_v5, %v1222_v17 }
 0x1dd   : > { %v1559_v8 = vpop.f32.mrf.mxu2 }
 0x1de   : > { %1808 = vst.msk [vmem:[%s2872_s23 + $0xdc] sm:$0xf] %vm1752_vm3, %v1743_v3  ;;  %v1560_v33 = vadd.f32 %v1559_v8, %v1391_v49 }
 0x1df   : > { %v1604_v9 = vpop.f32.mrf.mxu3 }
 0x1e0   : > { %v1662_v10 = vmax.f32 %v1560_v33, 0.0  ;;  %v1605_v4 = vadd.f32 %v1604_v9, %v3123_v22 }
 0x1e1   : > { %v1223_v42 = vpop.f32.mrf.mxu0 }
 0x1e2   : > { %v1726_v0 = vpack.c.bf16 %v1662_v10, %v1662_v10  ;;  %v1680_v11 = vmax.f32 %v1605_v4, 0.0  ;;  %v1224_v13 = vadd.f32 %v3152_v7, %v1223_v42  ;;  %v1392_v43 = vpop.f32.mrf.mxu1 }
 0x1e4   : > { %1791 = vst.msk [vmem:[%s2872_s23 + $0x98] sm:$0xf] %vm1752_vm3, %v1726_v0  ;;  %v1744_v16 = vpack.c.bf16 %v1680_v11, %v1680_v11  ;;  %v1393_v19 = vadd.f32 %v1392_v43, %v1224_v13 }
 0x1e5   : > { %v1561_v23 = vpop.f32.mrf.mxu2 }
 0x1e6   : > { %1809 = vst.msk [vmem:[%s2872_s23 + $0xe0] sm:$0xf] %vm1752_vm3, %v1744_v16  ;;  %v1562_v25 = vadd.f32 %v1561_v23, %v1393_v19 }
 0x1e7   : > { %v1606_v26 = vpop.f32.mrf.mxu3 }
 0x1e8   : > { %v1663_v45 = vmax.f32 %v1562_v25, 0.0  ;;  %v1607_v22 = vadd.f32 %v1606_v26, %v3138_v48 }
 0x1e9   : > { %v1226_v28 = vpop.f32.mrf.mxu0 }
 0x1ea   : > { %v1727_v29 = vpack.c.bf16 %v1663_v45, %v1663_v45  ;;  %v1681_v14 = vmax.f32 %v1607_v22, 0.0  ;;  %v1227_v30 = vadd.f32 %v3152_v7, %v1226_v28  ;;  %v1395_v57 = vpop.f32.mrf.mxu1 }
 0x1ec   : > { %1792 = vst.msk [vmem:[%s2872_s23 + $0x9c] sm:$0xf] %vm1752_vm3, %v1727_v29  ;;  %v1745_v59 = vpack.c.bf16 %v1681_v14, %v1681_v14  ;;  %v1396_v31 = vadd.f32 %v1395_v57, %v1227_v30 }
 0x1ed   : > { %v1564_v32 = vpop.f32.mrf.mxu2 }
 0x1ee   : > { %1810 = vst.msk [vmem:[%s2872_s23 + $0xe4] sm:$0xf] %vm1752_vm3, %v1745_v59  ;;  %v1565_v34 = vadd.f32 %v1564_v32, %v1396_v31 }
 0x1ef   : > { %v1609_v6 = vpop.f32.mrf.mxu3 }
 0x1f0   : > { %v1664_v38 = vmax.f32 %v1565_v34, 0.0  ;;  %v1610_v48 = vadd.f32 %v1609_v6, %v3147_v1 }
 0x1f1   : > { %v1228_v39 = vpop.f32.mrf.mxu0 }
 0x1f2   : > { %v1728_v41 = vpack.c.bf16 %v1664_v38, %v1664_v38  ;;  %v1682_v46 = vmax.f32 %v1610_v48, 0.0  ;;  %v1229_v15 = vadd.f32 %v3152_v7, %v1228_v39  ;;  %v1397_v50 = vpop.f32.mrf.mxu1 }
 0x1f4   : > { %1793 = vst.msk [vmem:[%s2872_s23 + $0xa0] sm:$0xf] %vm1752_vm3, %v1728_v41  ;;  %v1746_v18 = vpack.c.bf16 %v1682_v46, %v1682_v46  ;;  %v1398_v24 = vadd.f32 %v1397_v50, %v1229_v15 }
 0x1f5   : > { %v1566_v51 = vpop.f32.mrf.mxu2 }
 0x1f6   : > { %1811 = vst.msk [vmem:[%s2872_s23 + $0xe8] sm:$0xf] %vm1752_vm3, %v1746_v18  ;;  %v1567_v44 = vadd.f32 %v1566_v51, %v1398_v24 }
 0x1f7   : > { %v1611_v52 = vpop.f32.mrf.mxu3 }
 0x1f8   : > { %v1665_v63 = vmax.f32 %v1567_v44, 0.0  ;;  %v1612_v1 = vadd.f32 %v1611_v52, %v3167_v27 }
 0x1f9   : > { %v1231_v53 = vpop.f32.mrf.mxu0 }
 0x1fa   : > { %v1729_v54 = vpack.c.bf16 %v1665_v63, %v1665_v63  ;;  %v1683_v35 = vmax.f32 %v1612_v1, 0.0  ;;  %v1232_v21 = vadd.f32 %v3152_v7, %v1231_v53  ;;  %v1400_v55 = vpop.f32.mrf.mxu1 }
 0x1fc   : > { %1794 = vst.msk [vmem:[%s2872_s23 + $0xa4] sm:$0xf] %vm1752_vm3, %v1729_v54  ;;  %v1747_v56 = vpack.c.bf16 %v1683_v35, %v1683_v35  ;;  %v1401_v58 = vadd.f32 %v1400_v55, %v1232_v21 }
 0x1fd   : > { %v1569_v40 = vpop.f32.mrf.mxu2 }
 0x1fe   : > { %1812 = vst.msk [vmem:[%s2872_s23 + $0xec] sm:$0xf] %vm1752_vm3, %v1747_v56  ;;  %v1570_v60 = vadd.f32 %v1569_v40, %v1401_v58 }
 0x1ff   : > { %v1614_v62 = vpop.f32.mrf.mxu3 }
 0x200   : > { %v1666_v2 = vmax.f32 %v1570_v60, 0.0  ;;  %v1615_v27 = vadd.f32 %v1614_v62, %v3176_v47 }
 0x201   : > { %v1233_v17 = vpop.f32.mrf.mxu0 }
 0x202   : > { %v1730_v5 = vpack.c.bf16 %v1666_v2, %v1666_v2  ;;  %v1684_v3 = vmax.f32 %v1615_v27, 0.0  ;;  %v1234_v49 = vadd.f32 %v3152_v7, %v1233_v17  ;;  %v1402_v8 = vpop.f32.mrf.mxu1 }
 0x204   : > { %1795 = vst.msk [vmem:[%s2872_s23 + $0xa8] sm:$0xf] %vm1752_vm3, %v1730_v5  ;;  %v1748_v33 = vpack.c.bf16 %v1684_v3, %v1684_v3  ;;  %v1403_v9 = vadd.f32 %v1402_v8, %v1234_v49 }
 0x205   : > { %v1571_v10 = vpop.f32.mrf.mxu2 }
 0x206   : > { %1813 = vst.msk [vmem:[%s2872_s23 + $0xf0] sm:$0xf] %vm1752_vm3, %v1748_v33  ;;  %v1572_v4 = vadd.f32 %v1571_v10, %v1403_v9 }
 0x207   : > { %v1616_v42 = vpop.f32.mrf.mxu3 }
 0x208   : > { %v1667_v0 = vmax.f32 %v1572_v4, 0.0  ;;  %v1617_v47 = vadd.f32 %v1616_v42, %v3189_v12 }
 0x209   : > { %v1236_v11 = vpop.f32.mrf.mxu0 }
 0x20a   : > { %v1731_v13 = vpack.c.bf16 %v1667_v0, %v1667_v0  ;;  %v1685_v43 = vmax.f32 %v1617_v47, 0.0  ;;  %v1237_v16 = vadd.f32 %v3152_v7, %v1236_v11  ;;  %v1405_v19 = vpop.f32.mrf.mxu1 }
 0x20c   : > { %1796 = vst.msk [vmem:[%s2872_s23 + $0xac] sm:$0xf] %vm1752_vm3, %v1731_v13  ;;  %v1749_v23 = vpack.c.bf16 %v1685_v43, %v1685_v43  ;;  %v1406_v25 = vadd.f32 %v1405_v19, %v1237_v16 }
 0x20d   : > { %v1574_v26 = vpop.f32.mrf.mxu2 }
 0x20e   : > { %1814 = vst.msk [vmem:[%s2872_s23 + $0xf4] sm:$0xf] %vm1752_vm3, %v1749_v23  ;;  %v1575_v45 = vadd.f32 %v1574_v26, %v1406_v25 }
 0x20f   : > { %v1619_v22 = vpop.f32.mrf.mxu3 }
 0x210   : > { %v1668_v28 = vmax.f32 %v1575_v45, 0.0  ;;  %v1620_v12 = vadd.f32 %v1619_v22, %v3197_v20 }
 0x211   : > { %v1238_v29 = vpop.f32.mrf.mxu0 }
 0x212   : > { %v1732_v14 = vpack.c.bf16 %v1668_v28, %v1668_v28  ;;  %v1686_v30 = vmax.f32 %v1620_v12, 0.0  ;;  %v1239_v57 = vadd.f32 %v3152_v7, %v1238_v29  ;;  %v1407_v59 = vpop.f32.mrf.mxu1 }
 0x214   : > { %1797 = vst.msk [vmem:[%s2872_s23 + $0xb0] sm:$0xf] %vm1752_vm3, %v1732_v14  ;;  %v1750_v31 = vpack.c.bf16 %v1686_v30, %v1686_v30  ;;  %v1408_v32 = vadd.f32 %v1407_v59, %v1239_v57 }
 0x215   : > { %v1576_v34 = vpop.f32.mrf.mxu2 }
 0x216   : > { %1815 = vst.msk [vmem:[%s2872_s23 + $0xf8] sm:$0xf] %vm1752_vm3, %v1750_v31  ;;  %v1577_v6 = vadd.f32 %v1576_v34, %v1408_v32 }
 0x217   : > { %v1621_v38 = vpop.f32.mrf.mxu3 }
 0x218   : > { %v1669_v48 = vmax.f32 %v1577_v6, 0.0  ;;  %v1622_v20 = vadd.f32 %v1621_v38, %v3206_v36 }
 0x219   : > { %v1241_v39 = vpop.f32.mrf.mxu0 }
 0x21a   : > { %v1733_v41 = vpack.c.bf16 %v1669_v48, %v1669_v48  ;;  %v1687_v46 = vmax.f32 %v1622_v20, 0.0  ;;  %v1242_v15 = vadd.f32 %v3152_v7, %v1241_v39  ;;  %v1410_v50 = vpop.f32.mrf.mxu1 }
 0x21c   : > { %1798 = vst.msk [vmem:[%s2872_s23 + $0xb4] sm:$0xf] %vm1752_vm3, %v1733_v41  ;;  %v1751_v18 = vpack.c.bf16 %v1687_v46, %v1687_v46  ;;  %v1411_v24 = vadd.f32 %v1410_v50, %v1242_v15 }
 0x21d   : > { %v1579_v51 = vpop.f32.mrf.mxu2 }
 0x21e   : > { %1816 = vst.msk [vmem:[%s2872_s23 + $0xfc] sm:$0xf] %vm1752_vm3, %v1751_v18  ;;  %v1580_v44 = vadd.f32 %v1579_v51, %v1411_v24 }
 0x220   : > { %v1670_v52 = vmax.f32 %v1580_v44, 0.0 }
 0x221   : > { %v1243_v63 = vpop.f32.mrf.mxu0 }
 0x222   : > { %v1734_v36 = vpack.c.bf16 %v1670_v52, %v1670_v52  ;;  %v1244_v1 = vadd.f32 %v3152_v7, %v1243_v63  ;;  %v1412_v53 = vpop.f32.mrf.mxu1 }
 0x224   : > { %1799 = vst.msk [vmem:[%s2872_s23 + $0xb8] sm:$0xf] %vm1752_vm3, %v1734_v36  ;;  %v1413_v54 = vadd.f32 %v1412_v53, %v1244_v1 }
 0x225   : > { %v1581_v35 = vpop.f32.mrf.mxu2 }
 0x226   : > { %v1582_v21 = vadd.f32 %v1581_v35, %v1413_v54 }
 0x228   : > { %v1671_v55 = vmax.f32 %v1582_v21, 0.0 }
 0x22a   : > { %v1735_v56 = vpack.c.bf16 %v1671_v55, %v1671_v55 }
 0x22c   : > { %1800 = vst.msk [vmem:[%s2872_s23 + $0xbc] sm:$0xf] %vm1752_vm3, %v1735_v56 }
 0x22d   : > { %v1584_v58 = vpop.f32.mrf.mxu2 }
 0x22e   : > { %v1585_v40 = vadd.f32 %v1584_v58, %v3027_v37 }
 0x230   : > { %v1672_v60 = vmax.f32 %v1585_v40, 0.0 }
 0x232   : > { %v1736_v62 = vpack.c.bf16 %v1672_v60, %v1672_v60 }
 0x234   : > { %1801 = vst.msk [vmem:[%s2872_s23 + $0xc0] sm:$0xf] %vm1752_vm3, %v1736_v62 }
 0x235   : > { %v1586_v2 = vpop.f32.mrf.mxu2 }
 0x236   : > { %v1587_v7 = vadd.f32 %v1586_v2, %v3042_v61 }
 0x238   : > { %v1673_v27 = vmax.f32 %v1587_v7, 0.0 }
 0x23a   : > { %v1737_v17 = vpack.c.bf16 %v1673_v27, %v1673_v27 }
 0x23c   : > { %1802 = vst.msk [vmem:[%s2872_s23 + $0xc4] sm:$0xf] %vm1752_vm3, %v1737_v17 }
 0x23d PF: > { %s13_s14 = sadd.s32 1, %s2621_s14   ;;  %s3320_s12 = smov %s2617_s13 }
 0x23e   : > { %p10_p5 = scmp.ge.s32.totalorder %s13_s14, 4   ;;  %s3321_s13 = smov %s3323_s15 }
 0x240   :  { %12 = sbr.rel (!%p10_p5) target bundleno = 2 (0x2), region = 68 }

// kernel: _lambda_.13
= control target key start
LH: loop header
LB: loop body
LE: loop exit
PB: predicated region body
PF: predicated region fallthrough
CT: control target
= control target key end

     0   :  { %s648_s12 = smov 0   ;;  %s650_s13 = smov 0   ;;  %s732_s0 = inlined_call_operand.vmem [shape: bf16[128,108], index: 0, kind: input, shape index: {}]   ;;  %s733_s1 = inlined_call_operand.vmem [shape: bf16[108,4], index: 1, kind: input, shape index: {}]   ;;  %s734_s2 = inlined_call_operand.vmem [shape: f32[1,4], index: 2, kind: input, shape index: {}]   ;;  %s735_s3 = inlined_call_operand.vmem [shape: bf16[128,4], index: 3, kind: output, shape index: {}]  }
   0x1   :  { %s652_s14 = smov 0  }
   0x2 LB: > { %s25_s15 = sadd.s32 1, %s622_s13  ;;  %p492_p0 = scmp.ge.s32.totalorder %s626_s14, 1  ;;  %s626_s14 = sphi %s652_s14, %s13_s14   ;;  %s622_s13 = sphi %s650_s13, %s737_s13   ;;  %s618_s12 = sphi %s648_s12, %s736_s12  }
   0x3   : > { %p27_p1 = scmp.ge.s32.totalorder %s25_s15, 2  ;;  %p169_p2 = scmp.lt.s32.totalorder %s626_s14, 3 }
   0x5   : > { %s739_s15 = smov (%p27_p1, %s25_s15), 0  ;;  %p170_p3 = pnand %p492_p0, %p169_p2 }
   0x6   : > { %s493_s24 = sshll.u32 (!%p170_p3), %s618_s12, 3 }
   0x7   : > { %173 = sbr.rel (%p170_p3) target bundleno = 192 (0xc0), region = 32  ;;  %p204_p4 = scmp.lt.s32.totalorder (!%p170_p3), %s493_s24, 15 }
   0xc   : > { %v539_v0 = vld [vmem:[%s733_s1 + $0x30] sm:$0xf]  ;;  %v557_v1 = vld [vmem:[%s733_s1 + $0x30] sm:$0x30]  ;;  %vm326_vm0 = vcmask 1045504   ;;  %v556_v4 = vld [vmem:[%s733_s1 + $0x28] sm:$0xff] }
   0xd   : > { %v540_v2 = vor.u32 %v557_v1, %v539_v0  ;;  %v555_v5 = vld [vmem:[%s733_s1 + $0x20] sm:$0xff]  ;;  %v554_v6 = vld [vmem:[%s733_s1 + $0x18] sm:$0xff]  ;;  %v553_v7 = vld [vmem:[%s733_s1 + $0x10] sm:$0xff]  ;;  %s741_s24 = smov (!%p204_p4, %s493_s24), 15  ;;  %vm313_vm1 = vcmask 883712   ;;  %vm375_vm2 = vcmask 27648  }
   0xe   : > { %v552_v8 = vld [vmem:[%s733_s1 + $0x8] sm:$0xff]  ;;  %s494_s4 = sshll.u32 %s741_s24, 2  ;;  %v551_v9 = vld [vmem:[%s733_s1] sm:$0xff] }
   0xf   : > { %v328_v3 = vsel %vm326_vm0, %v540_v2, 0  ;;  %s207_s9 = scalar_lea.vmem %s732_s0, %s494_s4  ;;  %v603_v14 = vld [vmem:[%s734_s2] ss:$0 sm:$0xff]  ;;  %s705_s17 = scalar_lea.vmem %s735_s3, %s494_s4 }
  0x10   : > { %331 = vmatpush.bf16.msra.mxu0 %v328_v3  ;;  %558 = vmatpush.bf16.msra.mxu1 %v328_v3  ;;  %v547_v10 = vld [vmem:[%s207_s9] sm:$0xff]  ;;  %v548_v11 = vld [vmem:[%s207_s9 + $0x8] sm:$0xff]  ;;  %v549_v12 = vld [vmem:[%s207_s9 + $0x10] sm:$0xff] }
  0x11   : > { %559 = vmatpush.bf16.msra.mxu2 %v328_v3  ;;  %560 = vmatpush.bf16.msra.mxu3 %v328_v3  ;;  %v550_v13 = vld [vmem:[%s207_s9 + $0x18] sm:$0xff] }
  0x14   : > { %332 = vmatpush.bf16.msra.mxu0 %v556_v4  ;;  %561 = vmatpush.bf16.msra.mxu1 %v556_v4 }
  0x15   : > { %562 = vmatpush.bf16.msra.mxu2 %v556_v4  ;;  %563 = vmatpush.bf16.msra.mxu3 %v556_v4 }
  0x18   : > { %333 = vmatpush.bf16.msra.mxu0 %v555_v5  ;;  %564 = vmatpush.bf16.msra.mxu1 %v555_v5 }
  0x19   : > { %565 = vmatpush.bf16.msra.mxu2 %v555_v5  ;;  %566 = vmatpush.bf16.msra.mxu3 %v555_v5 }
  0x1c   : > { %334 = vmatpush.bf16.msra.mxu0 %v554_v6  ;;  %567 = vmatpush.bf16.msra.mxu1 %v554_v6 }
  0x1d   : > { %568 = vmatpush.bf16.msra.mxu2 %v554_v6  ;;  %569 = vmatpush.bf16.msra.mxu3 %v554_v6 }
  0x20   : > { %335 = vmatpush.bf16.msra.mxu0 %v553_v7  ;;  %570 = vmatpush.bf16.msra.mxu1 %v553_v7 }
  0x21   : > { %571 = vmatpush.bf16.msra.mxu2 %v553_v7  ;;  %572 = vmatpush.bf16.msra.mxu3 %v553_v7 }
  0x24   : > { %336 = vmatpush.bf16.msra.mxu0 %v552_v8  ;;  %573 = vmatpush.bf16.msra.mxu1 %v552_v8 }
  0x25   : > { %574 = vmatpush.bf16.msra.mxu2 %v552_v8  ;;  %575 = vmatpush.bf16.msra.mxu3 %v552_v8 }
  0x28   : > { %337 = vmatpush.bf16.msra.mxu0 %v551_v9  ;;  %576 = vmatpush.bf16.msra.mxu1 %v551_v9 }
  0x29   : > { %577 = vmatpush.bf16.msra.mxu2 %v551_v9  ;;  %578 = vmatpush.bf16.msra.mxu3 %v551_v9 }
  0x2b   : > { %541 = vmatmul.msk.bf16.vlgmr.msra.gmra.mxu0 %vm313_vm1, %v547_v10  ;;  %542 = vmatmul.msk.bf16.vlgmr.msra.gmra.mxu1 %vm313_vm1, %v548_v11 }
  0x2c   : > { %543 = vmatmul.msk.bf16.vlgmr.msra.gmra.mxu2 %vm313_vm1, %v549_v12  ;;  %544 = vmatmul.msk.bf16.vlgmr.msra.gmra.mxu3 %vm313_vm1, %v550_v13 }
  0xa8   : > { %v339_v15 = vpop.f32.mrf.mxu0  ;;  %v344_v16 = vpop.f32.mrf.mxu1 }
  0xa9   : > { %v340_v17 = vadd.f32 %v603_v14, %v339_v15  ;;  %v345_v18 = vadd.f32 %v603_v14, %v344_v16 }
  0xab   : > { %v359_v19 = vmax.f32 %v340_v17, 0.0  ;;  %v361_v20 = vmax.f32 %v345_v18, 0.0 }
  0xad   : > { %v367_v21 = vpack.c.bf16 %v359_v19, %v359_v19  ;;  %v369_v22 = vpack.c.bf16 %v361_v20, %v361_v20 }
  0xaf   : > { %376 = vst.msk [vmem:[%s705_s17] sm:$0xf] %vm375_vm2, %v367_v21  ;;  %v349_v23 = vpop.f32.mrf.mxu2  ;;  %v354_v24 = vpop.f32.mrf.mxu3 }
  0xb0   : > { %378 = vst.msk [vmem:[%s705_s17 + $0x8] sm:$0xf] %vm375_vm2, %v369_v22  ;;  %v350_v25 = vadd.f32 %v603_v14, %v349_v23  ;;  %v355_v26 = vadd.f32 %v603_v14, %v354_v24  ;;  %v341_v27 = vpop.f32.mrf.mxu0  ;;  %v346_v28 = vpop.f32.mrf.mxu1 }
  0xb1   : > { %v342_v29 = vadd.f32 %v603_v14, %v341_v27  ;;  %v347_v30 = vadd.f32 %v603_v14, %v346_v28 }
  0xb2   : > { %v363_v31 = vmax.f32 %v350_v25, 0.0  ;;  %v365_v32 = vmax.f32 %v355_v26, 0.0 }
  0xb3   : > { %v360_v33 = vmax.f32 %v342_v29, 0.0  ;;  %v362_v34 = vmax.f32 %v347_v30, 0.0 }
  0xb4   : > { %v371_v35 = vpack.c.bf16 %v363_v31, %v363_v31  ;;  %v373_v36 = vpack.c.bf16 %v365_v32, %v365_v32 }
  0xb5   : > { %v368_v37 = vpack.c.bf16 %v360_v33, %v360_v33  ;;  %v370_v38 = vpack.c.bf16 %v362_v34, %v362_v34 }
  0xb6   : > { %380 = vst.msk [vmem:[%s705_s17 + $0x10] sm:$0xf] %vm375_vm2, %v371_v35 }
  0xb7   : > { %382 = vst.msk [vmem:[%s705_s17 + $0x18] sm:$0xf] %vm375_vm2, %v373_v36  ;;  %v351_v39 = vpop.f32.mrf.mxu2  ;;  %v356_v40 = vpop.f32.mrf.mxu3 }
  0xb8   : > { %377 = vst.msk [vmem:[%s705_s17 + $0x4] sm:$0xf] %vm375_vm2, %v368_v37  ;;  %v352_v41 = vadd.f32 %v603_v14, %v351_v39  ;;  %v357_v42 = vadd.f32 %v603_v14, %v356_v40 }
  0xb9   : > { %379 = vst.msk [vmem:[%s705_s17 + $0xc] sm:$0xf] %vm375_vm2, %v370_v38 }
  0xba   : > { %v364_v43 = vmax.f32 %v352_v41, 0.0  ;;  %v366_v44 = vmax.f32 %v357_v42, 0.0 }
  0xbc   : > { %v372_v45 = vpack.c.bf16 %v364_v43, %v364_v43  ;;  %v374_v46 = vpack.c.bf16 %v366_v44, %v366_v44 }
  0xbe   : > { %381 = vst.msk [vmem:[%s705_s17 + $0x14] sm:$0xf] %vm375_vm2, %v372_v45 }
  0xbf   : > { %383 = vst.msk [vmem:[%s705_s17 + $0x1c] sm:$0xf] %vm375_vm2, %v374_v46 }
  0xc0 PF: > { %s13_s14 = sadd.s32 1, %s626_s14   ;;  %s736_s12 = smov %s622_s13 }
  0xc1   : > { %p10_p5 = scmp.ge.s32.totalorder %s13_s14, 4   ;;  %s737_s13 = smov %s739_s15 }
  0xc3   :  { %12 = sbr.rel (!%p10_p5) target bundleno = 2 (0x2), region = 68 }

// kernel: _lambda_.14
= control target key start
LH: loop header
LB: loop body
LE: loop exit
PB: predicated region body
PF: predicated region fallthrough
CT: control target
= control target key end

     0   :  { %s773_s15 = smov 0   ;;  %s775_s16 = smov 0   ;;  %s862_s0 = inlined_call_operand.vmem [shape: bf16[128,108], index: 0, kind: input, shape index: {}]   ;;  %s863_s1 = inlined_call_operand.vmem [shape: bf16[108,4], index: 1, kind: input, shape index: {}]   ;;  %s864_s2 = inlined_call_operand.vmem [shape: f32[1,4], index: 2, kind: input, shape index: {}]   ;;  %s865_s3 = inlined_call_operand.vmem [shape: bf16[128,4], index: 3, kind: input, shape index: {}]   ;;  %s866_s4 = inlined_call_operand.vmem [shape: bf16[128,4], index: 4, kind: output, shape index: {}]  }
   0x1   :  { %s777_s17 = smov 0  }
   0x2 LB: > { %s26_s18 = sadd.s32 1, %s742_s16  ;;  %p591_p0 = scmp.ge.s32.totalorder %s746_s17, 1  ;;  %s746_s17 = sphi %s777_s17, %s14_s17   ;;  %s742_s16 = sphi %s775_s16, %s868_s16   ;;  %s738_s15 = sphi %s773_s15, %s867_s15  }
   0x3   : > { %p28_p1 = scmp.ge.s32.totalorder %s26_s18, 2  ;;  %p210_p2 = scmp.lt.s32.totalorder %s746_s17, 3 }
   0x5   : > { %s870_s18 = smov (%p28_p1, %s26_s18), 0  ;;  %p211_p3 = pnand %p591_p0, %p210_p2 }
   0x6   : > { %s592_s27 = sshll.u32 (!%p211_p3), %s738_s15, 3 }
   0x7   : > { %214 = sbr.rel (%p211_p3) target bundleno = 194 (0xc2), region = 36  ;;  %p255_p4 = scmp.lt.s32.totalorder (!%p211_p3), %s592_s27, 15 }
   0xc   : > { %v640_v0 = vld [vmem:[%s863_s1 + $0x30] sm:$0xf]  ;;  %v658_v1 = vld [vmem:[%s863_s1 + $0x30] sm:$0x30]  ;;  %vm386_vm0 = vcmask 1045504   ;;  %v657_v4 = vld [vmem:[%s863_s1 + $0x28] sm:$0xff] }
   0xd   : > { %v641_v2 = vor.u32 %v658_v1, %v640_v0  ;;  %v656_v5 = vld [vmem:[%s863_s1 + $0x20] sm:$0xff]  ;;  %v655_v6 = vld [vmem:[%s863_s1 + $0x18] sm:$0xff]  ;;  %v654_v7 = vld [vmem:[%s863_s1 + $0x10] sm:$0xff]  ;;  %s872_s27 = smov (!%p255_p4, %s592_s27), 15  ;;  %vm373_vm1 = vcmask 883712   ;;  %vm459_vm2 = vcmask 27648  }
   0xe   : > { %v653_v8 = vld [vmem:[%s863_s1 + $0x8] sm:$0xff]  ;;  %s815_s8 = sshll.u32 %s872_s27, 2  ;;  %v652_v9 = vld [vmem:[%s863_s1] sm:$0xff] }
   0xf   : > { %v388_v3 = vsel %vm386_vm0, %v641_v2, 0  ;;  %s258_s13 = scalar_lea.vmem %s862_s0, %s815_s8  ;;  %s274_s19 = scalar_lea.vmem %s865_s3, %s815_s8  ;;  %v723_v16 = vld [vmem:[%s864_s2] ss:$0 sm:$0xff] }
  0x10   : > { %391 = vmatpush.bf16.msra.mxu0 %v388_v3  ;;  %678 = vmatpush.bf16.msra.mxu1 %v388_v3  ;;  %v648_v10 = vld [vmem:[%s258_s13] sm:$0xff]  ;;  %v649_v11 = vld [vmem:[%s258_s13 + $0x8] sm:$0xff]  ;;  %v650_v12 = vld [vmem:[%s258_s13 + $0x10] sm:$0xff]  ;;  %s835_s24 = scalar_lea.vmem %s866_s4, %s815_s8 }
  0x11   : > { %679 = vmatpush.bf16.msra.mxu2 %v388_v3  ;;  %680 = vmatpush.bf16.msra.mxu3 %v388_v3  ;;  %v651_v13 = vld [vmem:[%s258_s13 + $0x18] sm:$0xff]  ;;  %v660_v14 = vld [vmem:[%s274_s19] sm:$0xff]   ;;  %v675_v15 = vld [vmem:[%s274_s19 + $0x8] sm:$0xff]  }
  0x12   : > { %v661_v17 = vunpack.c.l.bf16 %v660_v14  ;;  %v665_v18 = vunpack.c.l.bf16 %v675_v15  ;;  %v676_v25 = vld [vmem:[%s274_s19 + $0x10] sm:$0xff]   ;;  %v677_v26 = vld [vmem:[%s274_s19 + $0x18] sm:$0xff]   ;;  %v662_v35 = vunpack.c.h.bf16 %v660_v14  ;;  %v666_v36 = vunpack.c.h.bf16 %v675_v15 }
  0x13   : > { %v669_v29 = vunpack.c.l.bf16 %v676_v25  ;;  %v673_v30 = vunpack.c.l.bf16 %v677_v26  ;;  %v670_v53 = vunpack.c.h.bf16 %v676_v25  ;;  %v674_v54 = vunpack.c.h.bf16 %v677_v26 }
  0x14   : > { %392 = vmatpush.bf16.msra.mxu0 %v657_v4  ;;  %681 = vmatpush.bf16.msra.mxu1 %v657_v4 }
  0x15   : > { %682 = vmatpush.bf16.msra.mxu2 %v657_v4  ;;  %683 = vmatpush.bf16.msra.mxu3 %v657_v4 }
  0x18   : > { %393 = vmatpush.bf16.msra.mxu0 %v656_v5  ;;  %684 = vmatpush.bf16.msra.mxu1 %v656_v5 }
  0x19   : > { %685 = vmatpush.bf16.msra.mxu2 %v656_v5  ;;  %686 = vmatpush.bf16.msra.mxu3 %v656_v5 }
  0x1c   : > { %394 = vmatpush.bf16.msra.mxu0 %v655_v6  ;;  %687 = vmatpush.bf16.msra.mxu1 %v655_v6 }
  0x1d   : > { %688 = vmatpush.bf16.msra.mxu2 %v655_v6  ;;  %689 = vmatpush.bf16.msra.mxu3 %v655_v6 }
  0x20   : > { %395 = vmatpush.bf16.msra.mxu0 %v654_v7  ;;  %690 = vmatpush.bf16.msra.mxu1 %v654_v7 }
  0x21   : > { %691 = vmatpush.bf16.msra.mxu2 %v654_v7  ;;  %692 = vmatpush.bf16.msra.mxu3 %v654_v7 }
  0x24   : > { %396 = vmatpush.bf16.msra.mxu0 %v653_v8  ;;  %693 = vmatpush.bf16.msra.mxu1 %v653_v8 }
  0x25   : > { %694 = vmatpush.bf16.msra.mxu2 %v653_v8  ;;  %695 = vmatpush.bf16.msra.mxu3 %v653_v8 }
  0x28   : > { %397 = vmatpush.bf16.msra.mxu0 %v652_v9  ;;  %696 = vmatpush.bf16.msra.mxu1 %v652_v9 }
  0x29   : > { %697 = vmatpush.bf16.msra.mxu2 %v652_v9  ;;  %698 = vmatpush.bf16.msra.mxu3 %v652_v9 }
  0x2b   : > { %642 = vmatmul.msk.bf16.vlgmr.msra.gmra.mxu0 %vm373_vm1, %v648_v10  ;;  %643 = vmatmul.msk.bf16.vlgmr.msra.gmra.mxu1 %vm373_vm1, %v649_v11 }
  0x2c   : > { %644 = vmatmul.msk.bf16.vlgmr.msra.gmra.mxu2 %vm373_vm1, %v650_v12  ;;  %645 = vmatmul.msk.bf16.vlgmr.msra.gmra.mxu3 %vm373_vm1, %v651_v13 }
  0xa8   : > { %v399_v19 = vpop.f32.mrf.mxu0  ;;  %v404_v20 = vpop.f32.mrf.mxu1 }
  0xa9   : > { %v400_v21 = vadd.f32 %v723_v16, %v399_v19  ;;  %v405_v22 = vadd.f32 %v723_v16, %v404_v20 }
  0xab   : > { %v435_v23 = vadd.f32 %v661_v17, %v400_v21  ;;  %v437_v24 = vadd.f32 %v665_v18, %v405_v22 }
  0xad   : > { %v443_v27 = vmax.f32 %v435_v23, 0.0  ;;  %v445_v28 = vmax.f32 %v437_v24, 0.0 }
  0xaf   : > { %v451_v31 = vpack.c.bf16 %v443_v27, %v443_v27  ;;  %v453_v32 = vpack.c.bf16 %v445_v28, %v445_v28  ;;  %v409_v33 = vpop.f32.mrf.mxu2  ;;  %v414_v34 = vpop.f32.mrf.mxu3 }
  0xb0   : > { %v410_v37 = vadd.f32 %v723_v16, %v409_v33  ;;  %v415_v38 = vadd.f32 %v723_v16, %v414_v34  ;;  %v401_v39 = vpop.f32.mrf.mxu0  ;;  %v406_v40 = vpop.f32.mrf.mxu1 }
  0xb1   : > { %460 = vst.msk [vmem:[%s835_s24] sm:$0xf] %vm459_vm2, %v451_v31  ;;  %v402_v41 = vadd.f32 %v723_v16, %v401_v39  ;;  %v407_v42 = vadd.f32 %v723_v16, %v406_v40 }
  0xb2   : > { %462 = vst.msk [vmem:[%s835_s24 + $0x8] sm:$0xf] %vm459_vm2, %v453_v32  ;;  %v439_v43 = vadd.f32 %v669_v29, %v410_v37  ;;  %v441_v44 = vadd.f32 %v673_v30, %v415_v38 }
  0xb3   : > { %v436_v45 = vadd.f32 %v662_v35, %v402_v41  ;;  %v438_v46 = vadd.f32 %v666_v36, %v407_v42 }
  0xb4   : > { %v447_v47 = vmax.f32 %v439_v43, 0.0  ;;  %v449_v48 = vmax.f32 %v441_v44, 0.0 }
  0xb5   : > { %v444_v49 = vmax.f32 %v436_v45, 0.0  ;;  %v446_v50 = vmax.f32 %v438_v46, 0.0 }
  0xb6   : > { %v455_v51 = vpack.c.bf16 %v447_v47, %v447_v47  ;;  %v457_v52 = vpack.c.bf16 %v449_v48, %v449_v48 }
  0xb7   : > { %v452_v55 = vpack.c.bf16 %v444_v49, %v444_v49  ;;  %v454_v56 = vpack.c.bf16 %v446_v50, %v446_v50  ;;  %v411_v57 = vpop.f32.mrf.mxu2  ;;  %v416_v58 = vpop.f32.mrf.mxu3 }
  0xb8   : > { %464 = vst.msk [vmem:[%s835_s24 + $0x10] sm:$0xf] %vm459_vm2, %v455_v51  ;;  %v412_v59 = vadd.f32 %v723_v16, %v411_v57  ;;  %v417_v60 = vadd.f32 %v723_v16, %v416_v58 }
  0xb9   : > { %466 = vst.msk [vmem:[%s835_s24 + $0x18] sm:$0xf] %vm459_vm2, %v457_v52 }
  0xba   : > { %461 = vst.msk [vmem:[%s835_s24 + $0x4] sm:$0xf] %vm459_vm2, %v452_v55  ;;  %v440_v61 = vadd.f32 %v670_v53, %v412_v59  ;;  %v442_v62 = vadd.f32 %v674_v54, %v417_v60 }
  0xbb   : > { %463 = vst.msk [vmem:[%s835_s24 + $0xc] sm:$0xf] %vm459_vm2, %v454_v56 }
  0xbc   : > { %v448_v63 = vmax.f32 %v440_v61, 0.0  ;;  %v450_v0 = vmax.f32 %v442_v62, 0.0 }
  0xbe   : > { %v456_v1 = vpack.c.bf16 %v448_v63, %v448_v63  ;;  %v458_v2 = vpack.c.bf16 %v450_v0, %v450_v0 }
  0xc0   : > { %465 = vst.msk [vmem:[%s835_s24 + $0x14] sm:$0xf] %vm459_vm2, %v456_v1 }
  0xc1   : > { %467 = vst.msk [vmem:[%s835_s24 + $0x1c] sm:$0xf] %vm459_vm2, %v458_v2 }
  0xc2 PF: > { %s14_s17 = sadd.s32 1, %s746_s17   ;;  %s867_s15 = smov %s742_s16 }
  0xc3   : > { %p11_p5 = scmp.ge.s32.totalorder %s14_s17, 4   ;;  %s868_s16 = smov %s870_s18 }
  0xc5   :  { %13 = sbr.rel (!%p11_p5) target bundleno = 2 (0x2), region = 75 }

// kernel: _lambda_.15
= control target key start
LH: loop header
LB: loop body
LE: loop exit
PB: predicated region body
PF: predicated region fallthrough
CT: control target
= control target key end

     0   :  { %vm85_vm0 = vcmask 1045504   ;;  %vm81_vm1 = vcmask 883712   ;;  %vm107_vm2 = vcmask 60416   ;;  %s212_s1 = inlined_call_operand.vmem [shape: bf16[108,8], index: 1, kind: input, shape index: {}]   ;;  %s213_s2 = inlined_call_operand.vmem [shape: f32[1,8], index: 2, kind: input, shape index: {}]   ;;  %s214_s0 = inlined_call_operand.vmem [shape: bf16[16,108], index: 0, kind: input, shape index: {}]   ;;  %s215_s3 = inlined_call_operand.vmem [shape: bf16[16,8], index: 3, kind: output, shape index: {}]  }
   0x1   :  { %v144_v0 = vld [vmem:[%s212_s1 + $0x30] sm:$0xf]  ;;  %v154_v1 = vld [vmem:[%s212_s1 + $0x30] sm:$0x30]  ;;  %v153_v4 = vld [vmem:[%s212_s1 + $0x28] sm:$0xff] }
   0x2   :  { %v145_v2 = vor.u32 %v154_v1, %v144_v0  ;;  %v152_v5 = vld [vmem:[%s212_s1 + $0x20] sm:$0xff]  ;;  %v151_v6 = vld [vmem:[%s212_s1 + $0x18] sm:$0xff]  ;;  %v150_v7 = vld [vmem:[%s212_s1 + $0x10] sm:$0xff] }
   0x3   :  { %v149_v8 = vld [vmem:[%s212_s1 + $0x8] sm:$0xff]  ;;  %v148_v9 = vld [vmem:[%s212_s1] sm:$0xff] }
   0x4   :  { %v87_v3 = vsel %vm85_vm0, %v145_v2, 0  ;;  %v147_v10 = vld [vmem:[%s214_s0] sm:$0xff] }
   0x5   :  { %90 = vmatpush.bf16.msra.mxu0 %v87_v3  ;;  %v155_v11 = vld [vmem:[%s213_s2] ss:$0 sm:$0xff] }
   0x9   :  { %91 = vmatpush.bf16.msra.mxu0 %v153_v4 }
   0xd   :  { %92 = vmatpush.bf16.msra.mxu0 %v152_v5 }
  0x11   :  { %93 = vmatpush.bf16.msra.mxu0 %v151_v6 }
  0x15   :  { %94 = vmatpush.bf16.msra.mxu0 %v150_v7 }
  0x19   :  { %95 = vmatpush.bf16.msra.mxu0 %v149_v8 }
  0x1d   :  { %96 = vmatpush.bf16.msra.mxu0 %v148_v9 }
  0x20   :  { %146 = vmatmul.msk.bf16.vlgmr.msra.gmra.mxu0 %vm81_vm1, %v147_v10 }
  0x9d   :  { %v98_v12 = vpop.f32.mrf.mxu0 }
  0x9e   :  { %v99_v13 = vadd.f32 %v155_v11, %v98_v12 }
  0xa0   :  { %v103_v14 = vmax.f32 %v99_v13, 0.0 }
  0xa2   :  { %v105_v15 = vpack.c.bf16 %v103_v14, %v103_v14 }
  0xa4   :  { %108 = vst.msk [vmem:[%s215_s3] sm:$0xf] %vm107_vm2, %v105_v15 }
  0xa5   :  { %v100_v16 = vpop.f32.mrf.mxu0 }
  0xa6   :  { %v101_v17 = vadd.f32 %v155_v11, %v100_v16 }
  0xa8   :  { %v104_v18 = vmax.f32 %v101_v17, 0.0 }
  0xaa   :  { %v106_v19 = vpack.c.bf16 %v104_v18, %v104_v18 }
  0xac   :  { %109 = vst.msk [vmem:[%s215_s3 + $0x4] sm:$0xf] %vm107_vm2, %v106_v19 }

// kernel: _lambda_.16
= control target key start
LH: loop header
LB: loop body
LE: loop exit
PB: predicated region body
PF: predicated region fallthrough
CT: control target
= control target key end

     0   :  { %vm31_vm0 = vcmask 1041408   ;;  %vm27_vm1 = vcmask 31744   ;;  %vm51_vm2 = vcmask 60416   ;;  %s100_s1 = inlined_call_operand.vmem [shape: bf16[4,8], index: 1, kind: input, shape index: {}]   ;;  %s101_s0 = inlined_call_operand.vmem [shape: bf16[16,4], index: 0, kind: input, shape index: {}]   ;;  %s102_s2 = inlined_call_operand.vmem [shape: f32[1,8], index: 2, kind: input, shape index: {}]   ;;  %s103_s3 = inlined_call_operand.vmem [shape: bf16[16,8], index: 3, kind: output, shape index: {}]  }
   0x1   :  { %v17_v0 = vld [vmem:[%s100_s1] sm:$0x3] }
   0x2   :  { %v33_v1 = vsel %vm31_vm0, %v17_v0, 0  ;;  %v63_v2 = vld [vmem:[%s101_s0] sm:$0xff] }
   0x3   :  { %42 = vmatpush.bf16.msra.mxu0 %v33_v1  ;;  %v64_v3 = vld [vmem:[%s102_s2] ss:$0 sm:$0xff] }
   0x6   :  { %62 = vmatmul.msk.bf16.vlgmr.msra.gmra.mxu0 %vm27_vm1, %v63_v2 }
  0x83   :  { %v44_v4 = vpop.f32.mrf.mxu0 }
  0x84   :  { %v45_v5 = vadd.f32 %v64_v3, %v44_v4 }
  0x86   :  { %v49_v6 = vpack.c.bf16 %v45_v5, %v45_v5 }
  0x88   :  { %52 = vst.msk [vmem:[%s103_s3] sm:$0xf] %vm51_vm2, %v49_v6 }
  0x8b   :  { %v46_v7 = vpop.f32.mrf.mxu0 }
  0x8c   :  { %v47_v8 = vadd.f32 %v64_v3, %v46_v7 }
  0x8e   :  { %v50_v9 = vpack.c.bf16 %v47_v8, %v47_v8 }
  0x90   :  { %53 = vst.msk [vmem:[%s103_s3 + $0x4] sm:$0xf] %vm51_vm2, %v50_v9 }

// kernel: _lambda_.17
= control target key start
LH: loop header
LB: loop body
LE: loop exit
PB: predicated region body
PF: predicated region fallthrough
CT: control target
= control target key end

     0   :  { %vm145_vm0 = vcmask 1043456   ;;  %vm141_vm1 = vcmask 719872   ;;  %vm187_vm2 = vcmask 60416   ;;  %s366_s1 = inlined_call_operand.vmem [shape: bf16[216,8], index: 1, kind: input, shape index: {}]   ;;  %s367_s0 = inlined_call_operand.vmem [shape: bf16[16,216], index: 0, kind: input, shape index: {}]   ;;  %s368_s2 = inlined_call_operand.vmem [shape: f32[1,8], index: 2, kind: input, shape index: {}]   ;;  %s369_s3 = inlined_call_operand.vmem [shape: bf16[16,8], index: 3, kind: input, shape index: {}]   ;;  %s370_s4 = inlined_call_operand.vmem [shape: bf16[16,8], index: 4, kind: output, shape index: {}]  }
   0x1   :  { %v264_v0 = vld [vmem:[%s366_s1 + $0x38] sm:$0xff]  ;;  %v46_v1 = vld [vmem:[%s366_s1 + $0x68] sm:$0xf]  ;;  %v263_v3 = vld [vmem:[%s366_s1 + $0x30] sm:$0xff] }
   0x2   :  { %v113_v2 = vunpack.c.l.b16 %v46_v1  ;;  %149 = vmatpush.bf16.msra.mxu0 %v264_v0  ;;  %v269_v6 = vld [vmem:[%s366_s1 + $0x60] sm:$0xff]  ;;  %v262_v7 = vld [vmem:[%s366_s1 + $0x28] sm:$0xff]  ;;  %v268_v8 = vld [vmem:[%s366_s1 + $0x58] sm:$0xff] }
   0x3   :  { %v261_v9 = vld [vmem:[%s366_s1 + $0x20] sm:$0xff]  ;;  %v267_v10 = vld [vmem:[%s366_s1 + $0x50] sm:$0xff]  ;;  %v260_v11 = vld [vmem:[%s366_s1 + $0x18] sm:$0xff] }
   0x4   :  { %v127_v4 = vpack.c.b16 %v113_v2, %v113_v2  ;;  %v266_v12 = vld [vmem:[%s366_s1 + $0x48] sm:$0xff]  ;;  %v259_v13 = vld [vmem:[%s366_s1 + $0x10] sm:$0xff]  ;;  %v265_v14 = vld [vmem:[%s366_s1 + $0x40] sm:$0xff] }
   0x5   :  { %v258_v15 = vld [vmem:[%s366_s1 + $0x8] sm:$0xff]  ;;  %v255_v16 = vld [vmem:[%s367_s0 + $0x4] sm:$0xf]  ;;  %v196_v20 = vld [vmem:[%s367_s0] sm:$0xf] }
   0x6   :  { %v147_v5 = vsel %vm145_vm0, %v127_v4, 0  ;;  %150 = vmatpush.bf16.msra.mxu0 %v263_v3  ;;  %v198_v17 = vld [vmem:[%s367_s0 + $0x8] sm:$0xf0]  ;;  %v257_v19 = vld [vmem:[%s366_s1] sm:$0xff]  ;;  %v256_v21 = vld [vmem:[%s367_s0 + $0x4] sm:$0xf0] }
   0x7   :  { %165 = vmatpush.bf16.msra.mxu1 %v147_v5  ;;  %v201_v18 = vor.u32 %v255_v16, %v198_v17  ;;  %v197_v22 = vor.u32 %v256_v21, %v196_v20  ;;  %v274_v23 = vld [vmem:[%s368_s2] ss:$0 sm:$0xff] }
   0x8   :  { %v271_v24 = vld [vmem:[%s369_s3] sm:$0xff]  }
   0x9   :  { %v272_v28 = vunpack.c.l.bf16 %v271_v24  ;;  %v273_v35 = vunpack.c.h.bf16 %v271_v24 }
   0xa   :  { %151 = vmatpush.bf16.msra.mxu0 %v262_v7 }
   0xb   :  { %166 = vmatpush.bf16.msra.mxu1 %v269_v6 }
   0xe   :  { %152 = vmatpush.bf16.msra.mxu0 %v261_v9 }
   0xf   :  { %167 = vmatpush.bf16.msra.mxu1 %v268_v8 }
  0x12   :  { %153 = vmatpush.bf16.msra.mxu0 %v260_v11 }
  0x13   :  { %168 = vmatpush.bf16.msra.mxu1 %v267_v10 }
  0x16   :  { %154 = vmatpush.bf16.msra.mxu0 %v259_v13 }
  0x17   :  { %169 = vmatpush.bf16.msra.mxu1 %v266_v12 }
  0x1a   :  { %155 = vmatpush.bf16.msra.mxu0 %v258_v15 }
  0x1b   :  { %170 = vmatpush.bf16.msra.mxu1 %v265_v14 }
  0x1e   :  { %254 = vmatmul.msk.bf16.vlgmr.msra.gmra.mxu1 %vm141_vm1, %v201_v18  ;;  %156 = vmatpush.bf16.msra.mxu0 %v257_v19 }
  0x21   :  { %157 = vmatmul.bf16.vlgmr.msra.gmra.mxu0 %v197_v22 }
  0x9b   :  { %v172_v25 = vpop.f32.mrf.mxu1 }
  0x9e   :  { %v158_v26 = vpop.f32.mrf.mxu0 }
  0x9f   :  { %v159_v27 = vadd.f32 %v274_v23, %v158_v26 }
  0xa1   :  { %v173_v29 = vadd.f32 %v172_v25, %v159_v27 }
  0xa3   :  { %v181_v30 = vadd.f32 %v272_v28, %v173_v29  ;;  %v174_v36 = vpop.f32.mrf.mxu1 }
  0xa5   :  { %v183_v31 = vmax.f32 %v181_v30, 0.0 }
  0xa6   :  { %v160_v32 = vpop.f32.mrf.mxu0 }
  0xa7   :  { %v185_v33 = vpack.c.bf16 %v183_v31, %v183_v31  ;;  %v161_v34 = vadd.f32 %v274_v23, %v160_v32 }
  0xa9   :  { %188 = vst.msk [vmem:[%s370_s4] sm:$0xf] %vm187_vm2, %v185_v33  ;;  %v175_v37 = vadd.f32 %v174_v36, %v161_v34 }
  0xab   :  { %v182_v38 = vadd.f32 %v273_v35, %v175_v37 }
  0xad   :  { %v184_v39 = vmax.f32 %v182_v38, 0.0 }
  0xaf   :  { %v186_v40 = vpack.c.bf16 %v184_v39, %v184_v39 }
  0xb1   :  { %189 = vst.msk [vmem:[%s370_s4 + $0x4] sm:$0xf] %vm187_vm2, %v186_v40 }

// kernel: _lambda_.18
= control target key start
LH: loop header
LB: loop body
LE: loop exit
PB: predicated region body
PF: predicated region fallthrough
CT: control target
= control target key end

     0   :  { %vm138_vm0 = vcmask 1043456   ;;  %vm134_vm1 = vcmask 719872   ;;  %vm170_vm2 = vcmask 125952   ;;  %s314_s1 = inlined_call_operand.vmem [shape: bf16[216,16], index: 1, kind: input, shape index: {}]   ;;  %s315_s0 = inlined_call_operand.vmem [shape: bf16[8,216], index: 0, kind: input, shape index: {}]   ;;  %s316_s2 = inlined_call_operand.vmem [shape: f32[1,16], index: 2, kind: input, shape index: {}]   ;;  %s317_s3 = inlined_call_operand.vmem [shape: bf16[8,16], index: 3, kind: output, shape index: {}]  }
   0x1   :  { %v236_v0 = vld [vmem:[%s314_s1 + $0x38] sm:$0xff]  ;;  %v42_v1 = vld [vmem:[%s314_s1 + $0x68] sm:$0xf]  ;;  %v235_v3 = vld [vmem:[%s314_s1 + $0x30] sm:$0xff] }
   0x2   :  { %v106_v2 = vunpack.c.l.b16 %v42_v1  ;;  %142 = vmatpush.bf16.msra.mxu0 %v236_v0  ;;  %v241_v6 = vld [vmem:[%s314_s1 + $0x60] sm:$0xff]  ;;  %v234_v7 = vld [vmem:[%s314_s1 + $0x28] sm:$0xff]  ;;  %v240_v8 = vld [vmem:[%s314_s1 + $0x58] sm:$0xff] }
   0x3   :  { %v233_v9 = vld [vmem:[%s314_s1 + $0x20] sm:$0xff]  ;;  %v239_v10 = vld [vmem:[%s314_s1 + $0x50] sm:$0xff]  ;;  %v232_v11 = vld [vmem:[%s314_s1 + $0x18] sm:$0xff] }
   0x4   :  { %v120_v4 = vpack.c.b16 %v106_v2, %v106_v2  ;;  %v238_v12 = vld [vmem:[%s314_s1 + $0x48] sm:$0xff]  ;;  %v231_v13 = vld [vmem:[%s314_s1 + $0x10] sm:$0xff]  ;;  %v15_v14 = vld [vmem:[%s315_s0] sm:$0xff] }
   0x5   :  { %v49_v15 = vunpack.c.h.b16 %v15_v14  ;;  %v237_v16 = vld [vmem:[%s314_s1 + $0x40] sm:$0xff]  ;;  %v230_v17 = vld [vmem:[%s314_s1 + $0x8] sm:$0xff]  ;;  %v48_v19 = vunpack.c.l.b16 %v15_v14 }
   0x6   :  { %v140_v5 = vsel %vm138_vm0, %v120_v4, 0  ;;  %143 = vmatpush.bf16.msra.mxu0 %v235_v3  ;;  %v229_v20 = vld [vmem:[%s314_s1] sm:$0xff] }
   0x7   :  { %157 = vmatpush.bf16.msra.mxu1 %v140_v5  ;;  %v51_v18 = vpack.c.b16 %v49_v15, %v49_v15  ;;  %v50_v21 = vpack.c.b16 %v48_v19, %v48_v19  ;;  %v242_v23 = vld [vmem:[%s316_s2] ss:$0 sm:$0xff] }
   0xa   :  { %144 = vmatpush.bf16.msra.mxu0 %v234_v7 }
   0xb   :  { %158 = vmatpush.bf16.msra.mxu1 %v241_v6 }
   0xe   :  { %145 = vmatpush.bf16.msra.mxu0 %v233_v9 }
   0xf   :  { %159 = vmatpush.bf16.msra.mxu1 %v240_v8 }
  0x12   :  { %146 = vmatpush.bf16.msra.mxu0 %v232_v11 }
  0x13   :  { %160 = vmatpush.bf16.msra.mxu1 %v239_v10 }
  0x16   :  { %147 = vmatpush.bf16.msra.mxu0 %v231_v13 }
  0x17   :  { %161 = vmatpush.bf16.msra.mxu1 %v238_v12 }
  0x1a   :  { %148 = vmatpush.bf16.msra.mxu0 %v230_v17 }
  0x1b   :  { %162 = vmatpush.bf16.msra.mxu1 %v237_v16 }
  0x1e   :  { %228 = vmatmul.msk.bf16.vlgmr.msra.gmra.mxu1 %vm134_vm1, %v51_v18  ;;  %149 = vmatpush.bf16.msra.mxu0 %v229_v20 }
  0x21   :  { %150 = vmatmul.bf16.vlgmr.msra.gmra.mxu0 %v50_v21 }
  0x9b   :  { %v164_v22 = vpop.f32.mrf.mxu1 }
  0x9e   :  { %v151_v24 = vpop.f32.mrf.mxu0 }
  0x9f   :  { %v152_v25 = vadd.f32 %v242_v23, %v151_v24 }
  0xa1   :  { %v165_v26 = vadd.f32 %v164_v22, %v152_v25 }
  0xa3   :  { %v166_v27 = vpop.f32.mrf.mxu1  ;;  %v168_v28 = vmax.f32 %v165_v26, 0.0 }
  0xa5   :  { %v169_v29 = vpack.c.bf16 %v168_v28, %v168_v28 }
  0xa6   :  { %v153_v30 = vpop.f32.mrf.mxu0 }
  0xa7   :  { %171 = vst.msk [vmem:[%s317_s3] sm:$0xf] %vm170_vm2, %v169_v29 }

// kernel: _lambda_.19
= control target key start
LH: loop header
LB: loop body
LE: loop exit
PB: predicated region body
PF: predicated region fallthrough
CT: control target
= control target key end

     0   :  { %vm25_vm0 = vcmask 1043456   ;;  %vm21_vm1 = vcmask 64512   ;;  %vm43_vm2 = vcmask 125952   ;;  %s83_s1 = inlined_call_operand.vmem [shape: bf16[8,16], index: 1, kind: input, shape index: {}]   ;;  %s84_s0 = inlined_call_operand.vmem [shape: bf16[8,8], index: 0, kind: input, shape index: {}]   ;;  %s85_s2 = inlined_call_operand.vmem [shape: f32[1,16], index: 2, kind: input, shape index: {}]   ;;  %s86_s3 = inlined_call_operand.vmem [shape: bf16[8,16], index: 3, kind: output, shape index: {}]  }
   0x1   :  { %v16_v0 = vld [vmem:[%s83_s1] sm:$0xf] }
   0x2   :  { %v27_v1 = vsel %vm25_vm0, %v16_v0, 0  ;;  %v15_v2 = vld [vmem:[%s84_s0] sm:$0xf] }
   0x3   :  { %36 = vmatpush.bf16.msra.mxu0 %v27_v1  ;;  %v50_v3 = vld [vmem:[%s85_s2] ss:$0 sm:$0xff] }
   0x6   :  { %49 = vmatmul.msk.bf16.vlgmr.msra.gmra.mxu0 %vm21_vm1, %v15_v2 }
  0x83   :  { %v38_v4 = vpop.f32.mrf.mxu0 }
  0x84   :  { %v39_v5 = vadd.f32 %v50_v3, %v38_v4 }
  0x86   :  { %v42_v6 = vpack.c.bf16 %v39_v5, %v39_v5 }
  0x88   :  { %44 = vst.msk [vmem:[%s86_s3] sm:$0xf] %vm43_vm2, %v42_v6 }
  0x8b   :  { %v40_v7 = vpop.f32.mrf.mxu0 }

// kernel: _lambda_.20
= control target key start
LH: loop header
LB: loop body
LE: loop exit
PB: predicated region body
PF: predicated region fallthrough
CT: control target
= control target key end

     0   :  { %vm253_vm0 = vcmask 392192   ;;  %vm314_vm1 = vcmask 125952   ;;  %s578_s1 = inlined_call_operand.vmem [shape: bf16[432,16], index: 1, kind: input, shape index: {}]   ;;  %s579_s0 = inlined_call_operand.vmem [shape: bf16[8,432], index: 0, kind: input, shape index: {}]   ;;  %s580_s2 = inlined_call_operand.vmem [shape: f32[1,16], index: 2, kind: input, shape index: {}]   ;;  %s581_s3 = inlined_call_operand.vmem [shape: bf16[8,16], index: 3, kind: input, shape index: {}]   ;;  %s582_s4 = inlined_call_operand.vmem [shape: bf16[8,16], index: 4, kind: output, shape index: {}]  }
   0x1   :  { %v436_v0 = vld [vmem:[%s578_s1 + $0x38] sm:$0xff]  ;;  %v435_v3 = vld [vmem:[%s578_s1 + $0x30] sm:$0xff]  ;;  %v434_v7 = vld [vmem:[%s578_s1 + $0x28] sm:$0xff] }
   0x2   :  { %v444_v1 = vld [vmem:[%s578_s1 + $0x78] sm:$0xff]  ;;  %257 = vmatpush.bf16.msra.mxu0 %v436_v0  ;;  %v443_v4 = vld [vmem:[%s578_s1 + $0x70] sm:$0xff]  ;;  %v442_v8 = vld [vmem:[%s578_s1 + $0x68] sm:$0xff] }
   0x3   :  { %v452_v2 = vld [vmem:[%s578_s1 + $0xb8] sm:$0xff]  ;;  %270 = vmatpush.bf16.msra.mxu1 %v444_v1  ;;  %v451_v5 = vld [vmem:[%s578_s1 + $0xb0] sm:$0xff]  ;;  %v450_v9 = vld [vmem:[%s578_s1 + $0xa8] sm:$0xff] }
   0x4   :  { %283 = vmatpush.bf16.msra.mxu2 %v452_v2  ;;  %v455_v6 = vld [vmem:[%s578_s1 + $0xd0] sm:$0xff]  ;;  %v454_v10 = vld [vmem:[%s578_s1 + $0xc8] sm:$0xff]  ;;  %v433_v12 = vld [vmem:[%s578_s1 + $0x20] sm:$0xff] }
   0x5   :  { %301 = vmatpush.bf16.msra.mxu3 %v455_v6  ;;  %v19_v11 = vld [vmem:[%s579_s0 + $0x8] sm:$0xff]  ;;  %v441_v13 = vld [vmem:[%s578_s1 + $0x60] sm:$0xff]  ;;  %v432_v17 = vld [vmem:[%s578_s1 + $0x18] sm:$0xff] }
   0x6   :  { %258 = vmatpush.bf16.msra.mxu0 %v435_v3  ;;  %v449_v14 = vld [vmem:[%s578_s1 + $0xa0] sm:$0xff]  ;;  %v83_v16 = vunpack.c.h.b16 %v19_v11  ;;  %v440_v18 = vld [vmem:[%s578_s1 + $0x58] sm:$0xff]  ;;  %v431_v21 = vld [vmem:[%s578_s1 + $0x10] sm:$0xff]  ;;  %v82_v32 = vunpack.c.l.b16 %v19_v11 }
   0x7   :  { %271 = vmatpush.bf16.msra.mxu1 %v443_v4  ;;  %v453_v15 = vld [vmem:[%s578_s1 + $0xc0] sm:$0xff]  ;;  %v448_v19 = vld [vmem:[%s578_s1 + $0x98] sm:$0xff]  ;;  %v439_v22 = vld [vmem:[%s578_s1 + $0x50] sm:$0xff] }
   0x8   :  { %284 = vmatpush.bf16.msra.mxu2 %v451_v5  ;;  %v87_v20 = vpack.c.b16 %v83_v16, %v83_v16  ;;  %v447_v23 = vld [vmem:[%s578_s1 + $0x90] sm:$0xff]  ;;  %v430_v24 = vld [vmem:[%s578_s1 + $0x8] sm:$0xff]  ;;  %v18_v26 = vld [vmem:[%s579_s0] sm:$0xff]  ;;  %v86_v36 = vpack.c.b16 %v82_v32, %v82_v32 }
   0x9   :  { %302 = vmatpush.bf16.msra.mxu3 %v454_v10  ;;  %v438_v25 = vld [vmem:[%s578_s1 + $0x48] sm:$0xff]  ;;  %v80_v28 = vunpack.c.l.b16 %v18_v26  ;;  %v81_v29 = vunpack.c.h.b16 %v18_v26  ;;  %v429_v30 = vld [vmem:[%s578_s1] sm:$0xff] }
   0xa   :  { %259 = vmatpush.bf16.msra.mxu0 %v434_v7  ;;  %v446_v27 = vld [vmem:[%s578_s1 + $0x88] sm:$0xff]  ;;  %v437_v31 = vld [vmem:[%s578_s1 + $0x40] sm:$0xff] }
   0xb   :  { %272 = vmatpush.bf16.msra.mxu1 %v442_v8  ;;  %v445_v33 = vld [vmem:[%s578_s1 + $0x80] sm:$0xff]  ;;  %v84_v34 = vpack.c.b16 %v80_v28, %v80_v28  ;;  %v85_v35 = vpack.c.b16 %v81_v29, %v81_v29 }
   0xc   :  { %285 = vmatpush.bf16.msra.mxu2 %v450_v9  ;;  %v456_v38 = vld [vmem:[%s580_s2] ss:$0 sm:$0xff] }
   0xd   :  { %303 = vmatpush.bf16.msra.mxu3 %v453_v15  ;;  %v309_v44 = vld [vmem:[%s581_s3] sm:$0xf] }
   0xe   :  { %260 = vmatpush.bf16.msra.mxu0 %v433_v12  ;;  %v310_v47 = vunpack.c.l.bf16 %v309_v44 }
   0xf   :  { %273 = vmatpush.bf16.msra.mxu1 %v441_v13 }
  0x10   :  { %286 = vmatpush.bf16.msra.mxu2 %v449_v14  ;;  %428 = vmatmul.msk.bf16.vlgmr.msra.gmra.mxu3 %vm253_vm0, %v87_v20 }
  0x12   :  { %261 = vmatpush.bf16.msra.mxu0 %v432_v17 }
  0x13   :  { %274 = vmatpush.bf16.msra.mxu1 %v440_v18 }
  0x14   :  { %287 = vmatpush.bf16.msra.mxu2 %v448_v19 }
  0x16   :  { %262 = vmatpush.bf16.msra.mxu0 %v431_v21 }
  0x17   :  { %275 = vmatpush.bf16.msra.mxu1 %v439_v22 }
  0x18   :  { %288 = vmatpush.bf16.msra.mxu2 %v447_v23 }
  0x1a   :  { %263 = vmatpush.bf16.msra.mxu0 %v430_v24 }
  0x1b   :  { %276 = vmatpush.bf16.msra.mxu1 %v438_v25 }
  0x1c   :  { %289 = vmatpush.bf16.msra.mxu2 %v446_v27 }
  0x1e   :  { %264 = vmatpush.bf16.msra.mxu0 %v429_v30 }
  0x1f   :  { %277 = vmatpush.bf16.msra.mxu1 %v437_v31 }
  0x20   :  { %290 = vmatpush.bf16.msra.mxu2 %v445_v33 }
  0x21   :  { %265 = vmatmul.bf16.vlgmr.msra.gmra.mxu0 %v84_v34 }
  0x22   :  { %278 = vmatmul.bf16.vlgmr.msra.gmra.mxu1 %v85_v35 }
  0x23   :  { %291 = vmatmul.bf16.vlgmr.msra.gmra.mxu2 %v86_v36 }
  0x93   :  { %v305_v37 = vpop.f32.mrf.mxu3 }
  0x9b   :  { %v307_v42 = vpop.f32.mrf.mxu3 }
  0x9e   :  { %v266_v39 = vpop.f32.mrf.mxu0 }
  0x9f   :  { %v279_v40 = vpop.f32.mrf.mxu1  ;;  %v267_v41 = vadd.f32 %v456_v38, %v266_v39 }
  0xa1   :  { %v280_v43 = vadd.f32 %v279_v40, %v267_v41 }
  0xa6   :  { %v292_v45 = vpop.f32.mrf.mxu2  ;;  %v268_v48 = vpop.f32.mrf.mxu0 }
  0xa7   :  { %v293_v46 = vadd.f32 %v292_v45, %v280_v43  ;;  %v281_v49 = vpop.f32.mrf.mxu1 }
  0xa9   :  { %v306_v50 = vadd.f32 %v305_v37, %v293_v46 }
  0xab   :  { %v311_v51 = vadd.f32 %v310_v47, %v306_v50 }
  0xad   :  { %v312_v52 = vmax.f32 %v311_v51, 0.0 }
  0xae   :  { %v294_v53 = vpop.f32.mrf.mxu2 }
  0xaf   :  { %v313_v54 = vpack.c.bf16 %v312_v52, %v312_v52 }
  0xb1   :  { %315 = vst.msk [vmem:[%s582_s4] sm:$0xf] %vm314_vm1, %v313_v54 }

// kernel: _lambda_.22
= control target key start
LH: loop header
LB: loop body
LE: loop exit
PB: predicated region body
PF: predicated region fallthrough
CT: control target
= control target key end

     0   :  { %vm28_vm0 = vcmask 130048   ;;  %vm46_vm1 = vcmask 257024   ;;  %s91_s1 = inlined_call_operand.vmem [shape: bf16[16,32], index: 1, kind: input, shape index: {}]   ;;  %s92_s0 = inlined_call_operand.vmem [shape: bf16[8,16], index: 0, kind: input, shape index: {}]   ;;  %s93_s2 = inlined_call_operand.vmem [shape: f32[1,32], index: 2, kind: input, shape index: {}]   ;;  %s94_s3 = inlined_call_operand.vmem [shape: bf16[8,32], index: 3, kind: output, shape index: {}]  }
   0x1   :  { %v57_v0 = vld [vmem:[%s91_s1] sm:$0xff] }
   0x2   :  { %39 = vmatpush.bf16.msra.mxu0 %v57_v0  ;;  %v15_v1 = vld [vmem:[%s92_s0] sm:$0xf] }
   0x3   :  { %v58_v2 = vld [vmem:[%s93_s2] ss:$0 sm:$0xff] }
   0x5   :  { %56 = vmatmul.msk.bf16.vlgmr.msra.gmra.mxu0 %vm28_vm0, %v15_v1 }
  0x82   :  { %v41_v3 = vpop.f32.mrf.mxu0 }
  0x83   :  { %v42_v4 = vadd.f32 %v58_v2, %v41_v3 }
  0x85   :  { %v45_v5 = vpack.c.bf16 %v42_v4, %v42_v4 }
  0x87   :  { %47 = vst.msk [vmem:[%s94_s3] sm:$0xf] %vm46_vm1, %v45_v5 }
  0x8a   :  { %v43_v6 = vpop.f32.mrf.mxu0 }

// kernel: _lambda_.21
= control target key start
LH: loop header
LB: loop body
LE: loop exit
PB: predicated region body
PF: predicated region fallthrough
CT: control target
= control target key end

     0   :  { %vm250_vm0 = vcmask 392192   ;;  %vm308_vm1 = vcmask 257024   ;;  %s564_s1 = inlined_call_operand.vmem [shape: bf16[432,32], index: 1, kind: input, shape index: {}]   ;;  %s565_s0 = inlined_call_operand.vmem [shape: bf16[8,432], index: 0, kind: input, shape index: {}]   ;;  %s566_s2 = inlined_call_operand.vmem [shape: f32[1,32], index: 2, kind: input, shape index: {}]   ;;  %s567_s3 = inlined_call_operand.vmem [shape: bf16[8,32], index: 3, kind: output, shape index: {}]  }
   0x1   :  { %v430_v0 = vld [vmem:[%s564_s1 + $0x38] sm:$0xff]  ;;  %v429_v3 = vld [vmem:[%s564_s1 + $0x30] sm:$0xff]  ;;  %v428_v7 = vld [vmem:[%s564_s1 + $0x28] sm:$0xff] }
   0x2   :  { %v438_v1 = vld [vmem:[%s564_s1 + $0x78] sm:$0xff]  ;;  %254 = vmatpush.bf16.msra.mxu0 %v430_v0  ;;  %v437_v4 = vld [vmem:[%s564_s1 + $0x70] sm:$0xff]  ;;  %v436_v8 = vld [vmem:[%s564_s1 + $0x68] sm:$0xff] }
   0x3   :  { %v446_v2 = vld [vmem:[%s564_s1 + $0xb8] sm:$0xff]  ;;  %267 = vmatpush.bf16.msra.mxu1 %v438_v1  ;;  %v445_v5 = vld [vmem:[%s564_s1 + $0xb0] sm:$0xff]  ;;  %v444_v9 = vld [vmem:[%s564_s1 + $0xa8] sm:$0xff] }
   0x4   :  { %280 = vmatpush.bf16.msra.mxu2 %v446_v2  ;;  %v449_v6 = vld [vmem:[%s564_s1 + $0xd0] sm:$0xff]  ;;  %v448_v10 = vld [vmem:[%s564_s1 + $0xc8] sm:$0xff]  ;;  %v427_v12 = vld [vmem:[%s564_s1 + $0x20] sm:$0xff] }
   0x5   :  { %298 = vmatpush.bf16.msra.mxu3 %v449_v6  ;;  %v16_v11 = vld [vmem:[%s565_s0 + $0x8] sm:$0xff]  ;;  %v435_v13 = vld [vmem:[%s564_s1 + $0x60] sm:$0xff]  ;;  %v426_v17 = vld [vmem:[%s564_s1 + $0x18] sm:$0xff] }
   0x6   :  { %255 = vmatpush.bf16.msra.mxu0 %v429_v3  ;;  %v443_v14 = vld [vmem:[%s564_s1 + $0xa0] sm:$0xff]  ;;  %v80_v16 = vunpack.c.h.b16 %v16_v11  ;;  %v434_v18 = vld [vmem:[%s564_s1 + $0x58] sm:$0xff]  ;;  %v425_v21 = vld [vmem:[%s564_s1 + $0x10] sm:$0xff]  ;;  %v79_v32 = vunpack.c.l.b16 %v16_v11 }
   0x7   :  { %268 = vmatpush.bf16.msra.mxu1 %v437_v4  ;;  %v447_v15 = vld [vmem:[%s564_s1 + $0xc0] sm:$0xff]  ;;  %v442_v19 = vld [vmem:[%s564_s1 + $0x98] sm:$0xff]  ;;  %v433_v22 = vld [vmem:[%s564_s1 + $0x50] sm:$0xff] }
   0x8   :  { %281 = vmatpush.bf16.msra.mxu2 %v445_v5  ;;  %v84_v20 = vpack.c.b16 %v80_v16, %v80_v16  ;;  %v441_v23 = vld [vmem:[%s564_s1 + $0x90] sm:$0xff]  ;;  %v424_v24 = vld [vmem:[%s564_s1 + $0x8] sm:$0xff]  ;;  %v15_v26 = vld [vmem:[%s565_s0] sm:$0xff]  ;;  %v83_v36 = vpack.c.b16 %v79_v32, %v79_v32 }
   0x9   :  { %299 = vmatpush.bf16.msra.mxu3 %v448_v10  ;;  %v432_v25 = vld [vmem:[%s564_s1 + $0x48] sm:$0xff]  ;;  %v77_v28 = vunpack.c.l.b16 %v15_v26  ;;  %v78_v29 = vunpack.c.h.b16 %v15_v26  ;;  %v423_v30 = vld [vmem:[%s564_s1] sm:$0xff] }
   0xa   :  { %256 = vmatpush.bf16.msra.mxu0 %v428_v7  ;;  %v440_v27 = vld [vmem:[%s564_s1 + $0x88] sm:$0xff]  ;;  %v431_v31 = vld [vmem:[%s564_s1 + $0x40] sm:$0xff] }
   0xb   :  { %269 = vmatpush.bf16.msra.mxu1 %v436_v8  ;;  %v439_v33 = vld [vmem:[%s564_s1 + $0x80] sm:$0xff]  ;;  %v81_v34 = vpack.c.b16 %v77_v28, %v77_v28  ;;  %v82_v35 = vpack.c.b16 %v78_v29, %v78_v29 }
   0xc   :  { %282 = vmatpush.bf16.msra.mxu2 %v444_v9  ;;  %v450_v38 = vld [vmem:[%s566_s2] ss:$0 sm:$0xff] }
   0xd   :  { %300 = vmatpush.bf16.msra.mxu3 %v447_v15 }
   0xe   :  { %257 = vmatpush.bf16.msra.mxu0 %v427_v12 }
   0xf   :  { %270 = vmatpush.bf16.msra.mxu1 %v435_v13 }
  0x10   :  { %283 = vmatpush.bf16.msra.mxu2 %v443_v14  ;;  %422 = vmatmul.msk.bf16.vlgmr.msra.gmra.mxu3 %vm250_vm0, %v84_v20 }
  0x12   :  { %258 = vmatpush.bf16.msra.mxu0 %v426_v17 }
  0x13   :  { %271 = vmatpush.bf16.msra.mxu1 %v434_v18 }
  0x14   :  { %284 = vmatpush.bf16.msra.mxu2 %v442_v19 }
  0x16   :  { %259 = vmatpush.bf16.msra.mxu0 %v425_v21 }
  0x17   :  { %272 = vmatpush.bf16.msra.mxu1 %v433_v22 }
  0x18   :  { %285 = vmatpush.bf16.msra.mxu2 %v441_v23 }
  0x1a   :  { %260 = vmatpush.bf16.msra.mxu0 %v424_v24 }
  0x1b   :  { %273 = vmatpush.bf16.msra.mxu1 %v432_v25 }
  0x1c   :  { %286 = vmatpush.bf16.msra.mxu2 %v440_v27 }
  0x1e   :  { %261 = vmatpush.bf16.msra.mxu0 %v423_v30 }
  0x1f   :  { %274 = vmatpush.bf16.msra.mxu1 %v431_v31 }
  0x20   :  { %287 = vmatpush.bf16.msra.mxu2 %v439_v33 }
  0x21   :  { %262 = vmatmul.bf16.vlgmr.msra.gmra.mxu0 %v81_v34 }
  0x22   :  { %275 = vmatmul.bf16.vlgmr.msra.gmra.mxu1 %v82_v35 }
  0x23   :  { %288 = vmatmul.bf16.vlgmr.msra.gmra.mxu2 %v83_v36 }
  0x93   :  { %v302_v37 = vpop.f32.mrf.mxu3 }
  0x9b   :  { %v304_v42 = vpop.f32.mrf.mxu3 }
  0x9e   :  { %v263_v39 = vpop.f32.mrf.mxu0 }
  0x9f   :  { %v276_v40 = vpop.f32.mrf.mxu1  ;;  %v264_v41 = vadd.f32 %v450_v38, %v263_v39 }
  0xa1   :  { %v277_v43 = vadd.f32 %v276_v40, %v264_v41 }
  0xa6   :  { %v289_v44 = vpop.f32.mrf.mxu2  ;;  %v265_v46 = vpop.f32.mrf.mxu0 }
  0xa7   :  { %v290_v45 = vadd.f32 %v289_v44, %v277_v43  ;;  %v278_v47 = vpop.f32.mrf.mxu1 }
  0xa9   :  { %v303_v48 = vadd.f32 %v302_v37, %v290_v45 }
  0xab   :  { %v306_v49 = vmax.f32 %v303_v48, 0.0 }
  0xad   :  { %v307_v50 = vpack.c.bf16 %v306_v49, %v306_v49 }
  0xae   :  { %v291_v51 = vpop.f32.mrf.mxu2 }
  0xaf   :  { %309 = vst.msk [vmem:[%s567_s3] sm:$0xf] %vm308_vm1, %v307_v50 }

// kernel: _lambda_.23
= control target key start
LH: loop header
LB: loop body
LE: loop exit
PB: predicated region body
PF: predicated region fallthrough
CT: control target
= control target key end

     0   :  { %vm482_vm0 = vcmask 785408   ;;  %vm582_vm1 = vcmask 257024   ;;  %s1068_s1 = inlined_call_operand.vmem [shape: bf16[864,32], index: 1, kind: input, shape index: {}]   ;;  %s1069_s2 = inlined_call_operand.vmem [shape: f32[1,32], index: 2, kind: input, shape index: {}]   ;;  %s1070_s0 = inlined_call_operand.vmem [shape: bf16[8,864], index: 0, kind: input, shape index: {}]   ;;  %s1071_s3 = inlined_call_operand.vmem [shape: bf16[8,32], index: 3, kind: input, shape index: {}]   ;;  %s1072_s4 = inlined_call_operand.vmem [shape: bf16[8,32], index: 4, kind: output, shape index: {}]  }
   0x1   :  { %v812_v0 = vld [vmem:[%s1068_s1 + $0x38] sm:$0xff]  ;;  %v811_v3 = vld [vmem:[%s1068_s1 + $0x30] sm:$0xff]  ;;  %v810_v7 = vld [vmem:[%s1068_s1 + $0x28] sm:$0xff] }
   0x2   :  { %v820_v1 = vld [vmem:[%s1068_s1 + $0x78] sm:$0xff]  ;;  %486 = vmatpush.bf16.msra.mxu0 %v812_v0  ;;  %v819_v4 = vld [vmem:[%s1068_s1 + $0x70] sm:$0xff]  ;;  %v818_v8 = vld [vmem:[%s1068_s1 + $0x68] sm:$0xff] }
   0x3   :  { %v828_v2 = vld [vmem:[%s1068_s1 + $0xb8] sm:$0xff]  ;;  %499 = vmatpush.bf16.msra.mxu1 %v820_v1  ;;  %v827_v5 = vld [vmem:[%s1068_s1 + $0xb0] sm:$0xff]  ;;  %v826_v9 = vld [vmem:[%s1068_s1 + $0xa8] sm:$0xff] }
   0x4   :  { %512 = vmatpush.bf16.msra.mxu2 %v828_v2  ;;  %v836_v6 = vld [vmem:[%s1068_s1 + $0xf8] sm:$0xff]  ;;  %v835_v10 = vld [vmem:[%s1068_s1 + $0xf0] sm:$0xff]  ;;  %v809_v11 = vld [vmem:[%s1068_s1 + $0x20] sm:$0xff] }
   0x5   :  { %525 = vmatpush.bf16.msra.mxu3 %v836_v6  ;;  %v817_v12 = vld [vmem:[%s1068_s1 + $0x60] sm:$0xff]  ;;  %v834_v14 = vld [vmem:[%s1068_s1 + $0xe8] sm:$0xff]  ;;  %v808_v15 = vld [vmem:[%s1068_s1 + $0x18] sm:$0xff] }
   0x6   :  { %487 = vmatpush.bf16.msra.mxu0 %v811_v3  ;;  %v825_v13 = vld [vmem:[%s1068_s1 + $0xa0] sm:$0xff]  ;;  %v816_v16 = vld [vmem:[%s1068_s1 + $0x58] sm:$0xff]  ;;  %v807_v19 = vld [vmem:[%s1068_s1 + $0x10] sm:$0xff] }
   0x7   :  { %500 = vmatpush.bf16.msra.mxu1 %v819_v4  ;;  %v824_v17 = vld [vmem:[%s1068_s1 + $0x98] sm:$0xff]  ;;  %v833_v18 = vld [vmem:[%s1068_s1 + $0xe0] sm:$0xff]  ;;  %v815_v20 = vld [vmem:[%s1068_s1 + $0x50] sm:$0xff] }
   0x8   :  { %513 = vmatpush.bf16.msra.mxu2 %v827_v5  ;;  %v823_v21 = vld [vmem:[%s1068_s1 + $0x90] sm:$0xff]  ;;  %v832_v22 = vld [vmem:[%s1068_s1 + $0xd8] sm:$0xff]  ;;  %v806_v23 = vld [vmem:[%s1068_s1 + $0x8] sm:$0xff] }
   0x9   :  { %526 = vmatpush.bf16.msra.mxu3 %v835_v10  ;;  %v814_v24 = vld [vmem:[%s1068_s1 + $0x48] sm:$0xff]  ;;  %v18_v25 = vld [vmem:[%s1070_s0] sm:$0xff]  ;;  %v831_v27 = vld [vmem:[%s1068_s1 + $0xd0] sm:$0xff] }
   0xa   :  { %488 = vmatpush.bf16.msra.mxu0 %v810_v7  ;;  %v822_v26 = vld [vmem:[%s1068_s1 + $0x88] sm:$0xff]  ;;  %v138_v29 = vunpack.c.l.b16 %v18_v25  ;;  %v805_v30 = vld [vmem:[%s1068_s1] sm:$0xff]  ;;  %v139_v33 = vunpack.c.h.b16 %v18_v25  ;;  %v844_v35 = vld [vmem:[%s1068_s1 + $0x138] sm:$0xff] }
   0xb   :  { %501 = vmatpush.bf16.msra.mxu1 %v818_v8  ;;  %v19_v28 = vld [vmem:[%s1070_s0 + $0x8] sm:$0xff]  ;;  %v813_v31 = vld [vmem:[%s1068_s1 + $0x40] sm:$0xff]  ;;  %v852_v36 = vld [vmem:[%s1068_s1 + $0x178] sm:$0xff] }
   0xc   :  { %514 = vmatpush.bf16.msra.mxu2 %v826_v9  ;;  %v140_v32 = vunpack.c.l.b16 %v19_v28  ;;  %v821_v34 = vld [vmem:[%s1068_s1 + $0x80] sm:$0xff]  ;;  %v858_v37 = vld [vmem:[%s1068_s1 + $0x1a8] sm:$0xff]  ;;  %v145_v38 = vpack.c.b16 %v138_v29, %v138_v29  ;;  %v146_v41 = vpack.c.b16 %v139_v33, %v139_v33  ;;  %v843_v42 = vld [vmem:[%s1068_s1 + $0x130] sm:$0xff]  ;;  %v141_v46 = vunpack.c.h.b16 %v19_v28 }
   0xd   :  { %527 = vmatpush.bf16.msra.mxu3 %v834_v14  ;;  %v830_v39 = vld [vmem:[%s1068_s1 + $0xc8] sm:$0xff]  ;;  %v851_v43 = vld [vmem:[%s1068_s1 + $0x170] sm:$0xff]  ;;  %v857_v44 = vld [vmem:[%s1068_s1 + $0x1a0] sm:$0xff] }
   0xe   :  { %489 = vmatpush.bf16.msra.mxu0 %v809_v11  ;;  %v147_v40 = vpack.c.b16 %v140_v32, %v140_v32  ;;  %v829_v45 = vld [vmem:[%s1068_s1 + $0xc0] sm:$0xff]  ;;  %v842_v47 = vld [vmem:[%s1068_s1 + $0x128] sm:$0xff]  ;;  %v856_v49 = vld [vmem:[%s1068_s1 + $0x198] sm:$0xff]  ;;  %v148_v50 = vpack.c.b16 %v141_v46, %v141_v46 }
   0xf   :  { %502 = vmatpush.bf16.msra.mxu1 %v817_v12  ;;  %v850_v48 = vld [vmem:[%s1068_s1 + $0x168] sm:$0xff]  ;;  %v841_v51 = vld [vmem:[%s1068_s1 + $0x120] sm:$0xff]  ;;  %v855_v53 = vld [vmem:[%s1068_s1 + $0x190] sm:$0xff] }
  0x10   :  { %515 = vmatpush.bf16.msra.mxu2 %v825_v13  ;;  %v849_v52 = vld [vmem:[%s1068_s1 + $0x160] sm:$0xff]  ;;  %v840_v54 = vld [vmem:[%s1068_s1 + $0x118] sm:$0xff]  ;;  %v854_v56 = vld [vmem:[%s1068_s1 + $0x188] sm:$0xff] }
  0x11   :  { %528 = vmatpush.bf16.msra.mxu3 %v833_v18  ;;  %v848_v55 = vld [vmem:[%s1068_s1 + $0x158] sm:$0xff]  ;;  %v839_v58 = vld [vmem:[%s1068_s1 + $0x110] sm:$0xff]  ;;  %v853_v61 = vld [vmem:[%s1068_s1 + $0x180] sm:$0xff] }
  0x12   :  { %490 = vmatpush.bf16.msra.mxu0 %v808_v15  ;;  %v21_v57 = vld [vmem:[%s1070_s0 + $0x18] sm:$0xf]  ;;  %v847_v60 = vld [vmem:[%s1068_s1 + $0x150] sm:$0xff]  ;;  %v838_v63 = vld [vmem:[%s1068_s1 + $0x108] sm:$0xff] }
  0x13   :  { %503 = vmatpush.bf16.msra.mxu1 %v816_v16  ;;  %v144_v59 = vunpack.c.l.b16 %v21_v57  ;;  %v20_v0 = vld [vmem:[%s1070_s0 + $0x10] sm:$0xff]  ;;  %v846_v1 = vld [vmem:[%s1068_s1 + $0x148] sm:$0xff]  ;;  %v837_v3 = vld [vmem:[%s1068_s1 + $0x100] sm:$0xff] }
  0x14   :  { %516 = vmatpush.bf16.msra.mxu2 %v824_v17  ;;  %v142_v2 = vunpack.c.l.b16 %v20_v0  ;;  %v143_v4 = vunpack.c.h.b16 %v20_v0  ;;  %v845_v5 = vld [vmem:[%s1068_s1 + $0x140] sm:$0xff] }
  0x15   :  { %529 = vmatpush.bf16.msra.mxu3 %v832_v22  ;;  %v151_v62 = vpack.c.b16 %v144_v59, %v144_v59  ;;  %v859_v13 = vld [vmem:[%s1069_s2] ss:$0 sm:$0xff] }
  0x16   :  { %491 = vmatpush.bf16.msra.mxu0 %v807_v19  ;;  %v149_v6 = vpack.c.b16 %v142_v2, %v142_v2  ;;  %v150_v7 = vpack.c.b16 %v143_v4, %v143_v4 }
  0x17   :  { %504 = vmatpush.bf16.msra.mxu1 %v815_v20 }
  0x18   :  { %517 = vmatpush.bf16.msra.mxu2 %v823_v21 }
  0x19   :  { %530 = vmatpush.bf16.msra.mxu3 %v831_v27 }
  0x1a   :  { %492 = vmatpush.bf16.msra.mxu0 %v806_v23  ;;  %v577_v23 = vld [vmem:[%s1071_s3] sm:$0xf] }
  0x1b   :  { %505 = vmatpush.bf16.msra.mxu1 %v814_v24  ;;  %v578_v27 = vunpack.c.l.bf16 %v577_v23 }
  0x1c   :  { %518 = vmatpush.bf16.msra.mxu2 %v822_v26 }
  0x1d   :  { %531 = vmatpush.bf16.msra.mxu3 %v830_v39 }
  0x1e   :  { %493 = vmatpush.bf16.msra.mxu0 %v805_v30 }
  0x1f   :  { %506 = vmatpush.bf16.msra.mxu1 %v813_v31 }
  0x20   :  { %519 = vmatpush.bf16.msra.mxu2 %v821_v34 }
  0x21   :  { %494 = vmatmul.bf16.vlgmr.msra.gmra.mxu0 %v145_v38  ;;  %532 = vmatpush.bf16.msra.mxu3 %v829_v45 }
  0x22   :  { %538 = vmatpush.bf16.msrb.mxu0 %v844_v35  ;;  %507 = vmatmul.bf16.vlgmr.msra.gmra.mxu1 %v146_v41 }
  0x23   :  { %551 = vmatpush.bf16.msrb.mxu1 %v852_v36  ;;  %520 = vmatmul.bf16.vlgmr.msra.gmra.mxu2 %v147_v40 }
  0x24   :  { %566 = vmatpush.bf16.msrb.mxu2 %v858_v37  ;;  %533 = vmatmul.bf16.vlgmr.msra.gmra.mxu3 %v148_v50 }
  0x26   :  { %539 = vmatpush.bf16.msrb.mxu0 %v843_v42 }
  0x27   :  { %552 = vmatpush.bf16.msrb.mxu1 %v851_v43 }
  0x28   :  { %567 = vmatpush.bf16.msrb.mxu2 %v857_v44 }
  0x2a   :  { %540 = vmatpush.bf16.msrb.mxu0 %v842_v47 }
  0x2b   :  { %553 = vmatpush.bf16.msrb.mxu1 %v850_v48 }
  0x2c   :  { %568 = vmatpush.bf16.msrb.mxu2 %v856_v49 }
  0x2e   :  { %541 = vmatpush.bf16.msrb.mxu0 %v841_v51 }
  0x2f   :  { %554 = vmatpush.bf16.msrb.mxu1 %v849_v52 }
  0x30   :  { %569 = vmatpush.bf16.msrb.mxu2 %v855_v53 }
  0x32   :  { %542 = vmatpush.bf16.msrb.mxu0 %v840_v54 }
  0x33   :  { %555 = vmatpush.bf16.msrb.mxu1 %v848_v55 }
  0x34   :  { %570 = vmatpush.bf16.msrb.mxu2 %v854_v56 }
  0x36   :  { %543 = vmatpush.bf16.msrb.mxu0 %v839_v58 }
  0x37   :  { %556 = vmatpush.bf16.msrb.mxu1 %v847_v60 }
  0x38   :  { %571 = vmatpush.bf16.msrb.mxu2 %v853_v61 }
  0x3a   :  { %544 = vmatpush.bf16.msrb.mxu0 %v838_v63 }
  0x3b   :  { %804 = vmatmul.msk.bf16.vlgmr.msrb.gmra.mxu2 %vm482_vm0, %v151_v62  ;;  %557 = vmatpush.bf16.msrb.mxu1 %v846_v1 }
  0x3e   :  { %545 = vmatpush.bf16.msrb.mxu0 %v837_v3 }
  0x3f   :  { %558 = vmatpush.bf16.msrb.mxu1 %v845_v5 }
  0x41   :  { %546 = vmatmul.bf16.vlgmr.msrb.gmra.mxu0 %v149_v6 }
  0x42   :  { %559 = vmatmul.bf16.vlgmr.msrb.gmra.mxu1 %v150_v7 }
  0x9e   :  { %v495_v8 = vpop.f32.mrf.mxu0 }
  0x9f   :  { %v508_v9 = vpop.f32.mrf.mxu1  ;;  %v496_v16 = vadd.f32 %v859_v13, %v495_v8 }
  0xa1   :  { %v509_v17 = vadd.f32 %v508_v9, %v496_v16 }
  0xa6   :  { %v521_v10 = vpop.f32.mrf.mxu2  ;;  %v497_v11 = vpop.f32.mrf.mxu0 }
  0xa7   :  { %v510_v12 = vpop.f32.mrf.mxu1  ;;  %v534_v14 = vpop.f32.mrf.mxu3  ;;  %v522_v19 = vadd.f32 %v521_v10, %v509_v17 }
  0xa9   :  { %v535_v20 = vadd.f32 %v534_v14, %v522_v19 }
  0xae   :  { %v523_v15 = vpop.f32.mrf.mxu2 }
  0xaf   :  { %v536_v18 = vpop.f32.mrf.mxu3 }
  0xbe   :  { %v573_v21 = vpop.f32.mrf.mxu2  ;;  %v547_v22 = vpop.f32.mrf.mxu0 }
  0xbf   :  { %v548_v24 = vadd.f32 %v547_v22, %v535_v20  ;;  %v560_v25 = vpop.f32.mrf.mxu1 }
  0xc1   :  { %v561_v26 = vadd.f32 %v560_v25, %v548_v24 }
  0xc3   :  { %v574_v28 = vadd.f32 %v573_v21, %v561_v26 }
  0xc5   :  { %v579_v29 = vadd.f32 %v578_v27, %v574_v28 }
  0xc6   :  { %v575_v30 = vpop.f32.mrf.mxu2  ;;  %v549_v31 = vpop.f32.mrf.mxu0 }
  0xc7   :  { %v580_v32 = vmax.f32 %v579_v29, 0.0  ;;  %v562_v33 = vpop.f32.mrf.mxu1 }
  0xc9   :  { %v581_v34 = vpack.c.bf16 %v580_v32, %v580_v32 }
  0xcb   :  { %583 = vst.msk [vmem:[%s1072_s4] sm:$0xf] %vm582_vm1, %v581_v34 }

</bundles_post_ra>
